<compile_context>
chip_gen: v7x
topology: tpu7x:2x2x1
jax: 0.10.0
libtpu: 0.0.40
codegen_flags: <defaults>
</compile_context>

<pallas_src>
import jax
import jax.numpy as jnp
from jax import lax
from jax.experimental import pallas as pl
from jax.experimental.pallas import tpu as pltpu


def _upsample_conv_kernel(x_ref, w_ref, bvec_ref, o_ref, xs_ref):
    """One batch element per grid step.

    x_ref   : (Cin, H, W)          VMEM  original-resolution input
    w_ref   : (2*2*Cout*Cin*2*2,)  SMEM  effective 2x2 phase weights [b,a,co,ci,r,s]
    bvec_ref: (1, Cout*2*W)        VMEM  bias replicated along the lane-dense axis
    o_ref   : (2, H, Cout*2*W)     VMEM  phase-separated, lane-dense output
    xs_ref  : (Cin, 3, H+2, W)     VMEM  scratch: zero-padded, kx-shifted planes
    """
    cin, hh, ww = x_ref.shape
    lanes = o_ref.shape[-1]
    cout = lanes // (2 * ww)

    # ---- fused zero-pad + the three column-shifted planes (one lane shift per
    #      plane, done once per ci; all tap loads below are lane-aligned).
    xs_ref[...] = jnp.zeros_like(xs_ref)
    for ci in range(cin):
        xc = x_ref[ci]                                    # (H, W)
        xs_ref[ci, 0, 1:hh + 1, 1:ww] = xc[:, 0:ww - 1]   # dx = -1 column tap
        xs_ref[ci, 1, 1:hh + 1, :] = xc                   # dx =  0
        xs_ref[ci, 2, 1:hh + 1, 0:ww - 1] = xc[:, 1:ww]   # dx = +1

    def widx(bp, a, co, ci, r, s):
        # C-order flat index into weff of shape (2, 2, Cout, Cin, 2, 2)
        return ((((bp * 2 + a) * cout + co) * cin + ci) * 2 + r) * 2 + s

    bvec = bvec_ref[...]                                  # (1, Cout*2*W)

    for a in (0, 1):                                      # output-row phase
        # 2 (col phase) x Cout live accumulators; co is the innermost loop.
        acc = [[jnp.zeros((hh, ww), jnp.float32) for _ in range(cout)]
               for _ in range(2)]
        for ci in range(cin):
            for r in (0, 1):                              # effective row tap
                ro = r + a                                # row offset in padded plane
                for cs in range(3):                       # distinct column shift
                    patch = xs_ref[ci, cs, ro:ro + hh, :]     # (H, W) aligned load
                    for bp in (0, 1):                     # output-col phase
                        s = cs - bp                       # effective col tap
                        if s < 0 or s > 1:
                            continue
                        for co in range(cout):
                            w = w_ref[widx(bp, a, co, ci, r, s)]
                            acc[bp][co] = acc[bp][co] + w * patch
        # Lane-dense slab (H, Cout*2*W): columns ordered (co, col-phase, j).
        slab = jnp.concatenate(
            [jnp.concatenate([acc[0][co], acc[1][co]], axis=1)
             for co in range(cout)], axis=1)
        o_ref[a] = (slab + bvec).astype(o_ref.dtype)


def upsample_forward(x, weight, bias):
    """Nearest 2x upsample followed by Conv2d(3x3, stride=1, padding=1).

    x:      (B, Cin, H, W)    float32, NCHW
    weight: (Cout, Cin, 3, 3) float32, OIHW
    bias:   (Cout,)           float32
    returns (B, Cout, 2H, 2W) float32, NCHW
    """
    B, Cin, H, W = x.shape
    Cout = weight.shape[0]
    lanes = Cout * 2 * W  # 128 at the test shapes -> unmasked 128-lane stores

    w = weight.astype(jnp.float32)
    # Combine the 3 ky taps into 2 effective row taps per row-phase a.
    wa = jnp.stack([
        jnp.stack([w[:, :, 0, :], w[:, :, 1, :] + w[:, :, 2, :]], axis=2),  # a=0
        jnp.stack([w[:, :, 0, :] + w[:, :, 1, :], w[:, :, 2, :]], axis=2),  # a=1
    ], axis=0)                                            # (2, Cout, Cin, 2, 3)
    # Combine the 3 kx taps into 2 effective col taps per col-phase b.
    weff = jnp.stack([
        jnp.stack([wa[..., 0], wa[..., 1] + wa[..., 2]], axis=-1),          # b=0
        jnp.stack([wa[..., 0] + wa[..., 1], wa[..., 2]], axis=-1),          # b=1
    ], axis=0)                                            # (2, 2, Cout, Cin, 2, 2)
    weff_flat = weff.reshape(-1)

    # Bias laid out along the lane-dense output axis (co*2W + bp*W + j).
    bias_lane = jnp.repeat(bias.astype(jnp.float32), 2 * W).reshape(1, lanes)

    out_k = pl.pallas_call(
        _upsample_conv_kernel,
        out_shape=jax.ShapeDtypeStruct((B, 2, H, lanes), x.dtype),
        grid=(B,),
        in_specs=[
            pl.BlockSpec((None, Cin, H, W), lambda b: (b, 0, 0, 0)),
            pl.BlockSpec(memory_space=pltpu.MemorySpace.SMEM),
            pl.BlockSpec((1, lanes), lambda b: (0, 0)),
        ],
        out_specs=pl.BlockSpec((None, 2, H, lanes), lambda b: (b, 0, 0, 0)),
        scratch_shapes=[pltpu.VMEM((Cin, 3, H + 2, W), jnp.float32)],
        compiler_params=pltpu.CompilerParams(
            dimension_semantics=("parallel",)),  # B=2 -> one batch elem per v7x TC
    )(x, weff_flat, bias_lane)
    # TODO(synk): for B == 1 add a "parallel" spatial (row-band) grid axis so
    # both v7x TensorCores stay busy.

    # Interleave phases back to NCHW (B, Cout, 2H, 2W): pure layout plumbing.
    y = (out_k.reshape(B, 2, H, Cout, 2, W)
              .transpose(0, 3, 2, 1, 5, 4)
              .reshape(B, Cout, 2 * H, 2 * W))
    return y


if __name__ == "__main__":
    key = jax.random.PRNGKey(0)
    k1, k2, k3 = jax.random.split(key, 3)

    B, Cin, H, W = 2, 4, 16, 16
    Cout = 4

    x = jax.random.normal(k1, (B, Cin, H, W), jnp.float32)

    # PyTorch-Conv2d-style uniform init: U(-1/sqrt(fan_in), +1/sqrt(fan_in))
    fan_in = Cin * 3 * 3
    bound = 1.0 / (fan_in ** 0.5)
    weight = jax.random.uniform(k2, (Cout, Cin, 3, 3), jnp.float32, -bound, bound)
    bias = jax.random.uniform(k3, (Cout,), jnp.float32, -bound, bound)

    y = jax.block_until_ready(upsample_forward(x, weight, bias))

    # pure-JAX reference for correctness
    x_up = jnp.repeat(jnp.repeat(x, 2, axis=2), 2, axis=3)
    y_ref = lax.conv_general_dilated(
        x_up, weight, window_strides=(1, 1), padding=((1, 1), (1, 1)),
        dimension_numbers=("NCHW", "OIHW", "NCHW")) + bias[None, :, None, None]

    assert y.shape == (B, Cout, 2 * H, 2 * W), y.shape
    assert jnp.allclose(y, y_ref, atol=1e-4, rtol=1e-4), float(
        jnp.max(jnp.abs(y - y_ref)))
    print("KERNEL_OK")
</pallas_src>

<mosaic_0001>
module attributes {stable_mosaic.version = 11 : i64} {
  func.func @_upsample_conv_kernel(%arg0: i32, %arg1: memref<1x4x16x16xf32, #tpu.memory_space<vmem>>, %arg2: memref<256xf32, #tpu.memory_space<smem>>, %arg3: memref<1x128xf32, #tpu.memory_space<vmem>>, %arg4: memref<1x2x16x128xf32, #tpu.memory_space<vmem>>, %arg5: memref<4x3x18x16xf32, #tpu.memory_space<vmem>>) attributes {dimension_semantics = [#tpu.dimension_semantics<parallel>], iteration_bounds = array<i64: 2>, scalar_prefetch = 0 : i64, scratch_operands = 1 : i64, tpu.core_type = #tpu.core_type<tc>, window_params = [{transform_indices = @transform_0, window_bounds = array<i64: 1, 4, 16, 16>}, {transform_indices = @transform_1, window_bounds = array<i64: 256>}, {pipeline_mode = #tpu.pipeline_mode<synchronous>, transform_indices = @transform_2, window_bounds = array<i64: 1, 128>}, {transform_indices = @transform_3, window_bounds = array<i64: 1, 2, 16, 128>}]} {
    %cst = arith.constant 0.000000e+00 : f32
    %0 = vector.broadcast %cst : f32 to vector<4x3x18x16xf32>
    %c0 = arith.constant 0 : index
    %c0_0 = arith.constant 0 : index
    %c0_1 = arith.constant 0 : index
    %c0_2 = arith.constant 0 : index
    %1 = vector.load %arg5[%c0, %c0_0, %c0_1, %c0_2] : memref<4x3x18x16xf32, #tpu.memory_space<vmem>>, vector<4x3x18x16xf32>
    tpu.vector_store %arg5[%c0, %c0_0, %c0_1, %c0_2], %0 {strides = array<i32>} : memref<4x3x18x16xf32, #tpu.memory_space<vmem>>, vector<4x3x18x16xf32>,
    %c0_3 = arith.constant 0 : index
    %c0_4 = arith.constant 0 : index
    %c0_5 = arith.constant 0 : index
    %c0_6 = arith.constant 0 : index
    %2 = vector.load %arg1[%c0_3, %c0_4, %c0_5, %c0_6] : memref<1x4x16x16xf32, #tpu.memory_space<vmem>>, vector<1x1x16x16xf32>
    %3 = vector.shape_cast %2 : vector<1x1x16x16xf32> to vector<16x16xf32>
    %4 = vector.extract_strided_slice %3 {offsets = [0, 0], sizes = [16, 15], strides = [1, 1]} : vector<16x16xf32> to vector<16x15xf32>
    %c0_7 = arith.constant 0 : index
    %c0_8 = arith.constant 0 : index
    %c1 = arith.constant 1 : index
    %c1_9 = arith.constant 1 : index
    %5 = vector.load %arg5[%c0_7, %c0_8, %c1, %c1_9] : memref<4x3x18x16xf32, #tpu.memory_space<vmem>>, vector<1x1x16x15xf32>
    %6 = vector.shape_cast %5 : vector<1x1x16x15xf32> to vector<16x15xf32>
    %7 = vector.shape_cast %4 : vector<16x15xf32> to vector<1x1x16x15xf32>
    tpu.vector_store %arg5[%c0_7, %c0_8, %c1, %c1_9], %7 {strides = array<i32>} : memref<4x3x18x16xf32, #tpu.memory_space<vmem>>, vector<1x1x16x15xf32>,
    %c0_10 = arith.constant 0 : index
    %c1_11 = arith.constant 1 : index
    %c1_12 = arith.constant 1 : index
    %c0_13 = arith.constant 0 : index
    %8 = vector.load %arg5[%c0_10, %c1_11, %c1_12, %c0_13] : memref<4x3x18x16xf32, #tpu.memory_space<vmem>>, vector<1x1x16x16xf32>
    %9 = vector.shape_cast %8 : vector<1x1x16x16xf32> to vector<16x16xf32>
    %10 = vector.shape_cast %3 : vector<16x16xf32> to vector<1x1x16x16xf32>
    tpu.vector_store %arg5[%c0_10, %c1_11, %c1_12, %c0_13], %10 {strides = array<i32>} : memref<4x3x18x16xf32, #tpu.memory_space<vmem>>, vector<1x1x16x16xf32>,
    %11 = vector.extract_strided_slice %3 {offsets = [0, 1], sizes = [16, 15], strides = [1, 1]} : vector<16x16xf32> to vector<16x15xf32>
    %c0_14 = arith.constant 0 : index
    %c2 = arith.constant 2 : index
    %c1_15 = arith.constant 1 : index
    %c0_16 = arith.constant 0 : index
    %12 = vector.load %arg5[%c0_14, %c2, %c1_15, %c0_16] : memref<4x3x18x16xf32, #tpu.memory_space<vmem>>, vector<1x1x16x15xf32>
    %13 = vector.shape_cast %12 : vector<1x1x16x15xf32> to vector<16x15xf32>
    %14 = vector.shape_cast %11 : vector<16x15xf32> to vector<1x1x16x15xf32>
    tpu.vector_store %arg5[%c0_14, %c2, %c1_15, %c0_16], %14 {strides = array<i32>} : memref<4x3x18x16xf32, #tpu.memory_space<vmem>>, vector<1x1x16x15xf32>,
    %c0_17 = arith.constant 0 : index
    %c1_18 = arith.constant 1 : index
    %c0_19 = arith.constant 0 : index
    %c0_20 = arith.constant 0 : index
    %15 = vector.load %arg1[%c0_17, %c1_18, %c0_19, %c0_20] : memref<1x4x16x16xf32, #tpu.memory_space<vmem>>, vector<1x1x16x16xf32>
    %16 = vector.shape_cast %15 : vector<1x1x16x16xf32> to vector<16x16xf32>
    %17 = vector.extract_strided_slice %16 {offsets = [0, 0], sizes = [16, 15], strides = [1, 1]} : vector<16x16xf32> to vector<16x15xf32>
    %c1_21 = arith.constant 1 : index
    %c0_22 = arith.constant 0 : index
    %c1_23 = arith.constant 1 : index
    %c1_24 = arith.constant 1 : index
    %18 = vector.load %arg5[%c1_21, %c0_22, %c1_23, %c1_24] : memref<4x3x18x16xf32, #tpu.memory_space<vmem>>, vector<1x1x16x15xf32>
    %19 = vector.shape_cast %18 : vector<1x1x16x15xf32> to vector<16x15xf32>
    %20 = vector.shape_cast %17 : vector<16x15xf32> to vector<1x1x16x15xf32>
    tpu.vector_store %arg5[%c1_21, %c0_22, %c1_23, %c1_24], %20 {strides = array<i32>} : memref<4x3x18x16xf32, #tpu.memory_space<vmem>>, vector<1x1x16x15xf32>,
    %c1_25 = arith.constant 1 : index
    %c1_26 = arith.constant 1 : index
    %c1_27 = arith.constant 1 : index
    %c0_28 = arith.constant 0 : index
    %21 = vector.load %arg5[%c1_25, %c1_26, %c1_27, %c0_28] : memref<4x3x18x16xf32, #tpu.memory_space<vmem>>, vector<1x1x16x16xf32>
    %22 = vector.shape_cast %21 : vector<1x1x16x16xf32> to vector<16x16xf32>
    %23 = vector.shape_cast %16 : vector<16x16xf32> to vector<1x1x16x16xf32>
    tpu.vector_store %arg5[%c1_25, %c1_26, %c1_27, %c0_28], %23 {strides = array<i32>} : memref<4x3x18x16xf32, #tpu.memory_space<vmem>>, vector<1x1x16x16xf32>,
    %24 = vector.extract_strided_slice %16 {offsets = [0, 1], sizes = [16, 15], strides = [1, 1]} : vector<16x16xf32> to vector<16x15xf32>
    %c1_29 = arith.constant 1 : index
    %c2_30 = arith.constant 2 : index
    %c1_31 = arith.constant 1 : index
    %c0_32 = arith.constant 0 : index
    %25 = vector.load %arg5[%c1_29, %c2_30, %c1_31, %c0_32] : memref<4x3x18x16xf32, #tpu.memory_space<vmem>>, vector<1x1x16x15xf32>
    %26 = vector.shape_cast %25 : vector<1x1x16x15xf32> to vector<16x15xf32>
    %27 = vector.shape_cast %24 : vector<16x15xf32> to vector<1x1x16x15xf32>
    tpu.vector_store %arg5[%c1_29, %c2_30, %c1_31, %c0_32], %27 {strides = array<i32>} : memref<4x3x18x16xf32, #tpu.memory_space<vmem>>, vector<1x1x16x15xf32>,
    %c0_33 = arith.constant 0 : index
    %c2_34 = arith.constant 2 : index
    %c0_35 = arith.constant 0 : index
    %c0_36 = arith.constant 0 : index
    %28 = vector.load %arg1[%c0_33, %c2_34, %c0_35, %c0_36] : memref<1x4x16x16xf32, #tpu.memory_space<vmem>>, vector<1x1x16x16xf32>
    %29 = vector.shape_cast %28 : vector<1x1x16x16xf32> to vector<16x16xf32>
    %30 = vector.extract_strided_slice %29 {offsets = [0, 0], sizes = [16, 15], strides = [1, 1]} : vector<16x16xf32> to vector<16x15xf32>
    %c2_37 = arith.constant 2 : index
    %c0_38 = arith.constant 0 : index
    %c1_39 = arith.constant 1 : index
    %c1_40 = arith.constant 1 : index
    %31 = vector.load %arg5[%c2_37, %c0_38, %c1_39, %c1_40] : memref<4x3x18x16xf32, #tpu.memory_space<vmem>>, vector<1x1x16x15xf32>
    %32 = vector.shape_cast %31 : vector<1x1x16x15xf32> to vector<16x15xf32>
    %33 = vector.shape_cast %30 : vector<16x15xf32> to vector<1x1x16x15xf32>
    tpu.vector_store %arg5[%c2_37, %c0_38, %c1_39, %c1_40], %33 {strides = array<i32>} : memref<4x3x18x16xf32, #tpu.memory_space<vmem>>, vector<1x1x16x15xf32>,
    %c2_41 = arith.constant 2 : index
    %c1_42 = arith.constant 1 : index
    %c1_43 = arith.constant 1 : index
    %c0_44 = arith.constant 0 : index
    %34 = vector.load %arg5[%c2_41, %c1_42, %c1_43, %c0_44] : memref<4x3x18x16xf32, #tpu.memory_space<vmem>>, vector<1x1x16x16xf32>
    %35 = vector.shape_cast %34 : vector<1x1x16x16xf32> to vector<16x16xf32>
    %36 = vector.shape_cast %29 : vector<16x16xf32> to vector<1x1x16x16xf32>
    tpu.vector_store %arg5[%c2_41, %c1_42, %c1_43, %c0_44], %36 {strides = array<i32>} : memref<4x3x18x16xf32, #tpu.memory_space<vmem>>, vector<1x1x16x16xf32>,
    %37 = vector.extract_strided_slice %29 {offsets = [0, 1], sizes = [16, 15], strides = [1, 1]} : vector<16x16xf32> to vector<16x15xf32>
    %c2_45 = arith.constant 2 : index
    %c2_46 = arith.constant 2 : index
    %c1_47 = arith.constant 1 : index
    %c0_48 = arith.constant 0 : index
    %38 = vector.load %arg5[%c2_45, %c2_46, %c1_47, %c0_48] : memref<4x3x18x16xf32, #tpu.memory_space<vmem>>, vector<1x1x16x15xf32>
    %39 = vector.shape_cast %38 : vector<1x1x16x15xf32> to vector<16x15xf32>
    %40 = vector.shape_cast %37 : vector<16x15xf32> to vector<1x1x16x15xf32>
    tpu.vector_store %arg5[%c2_45, %c2_46, %c1_47, %c0_48], %40 {strides = array<i32>} : memref<4x3x18x16xf32, #tpu.memory_space<vmem>>, vector<1x1x16x15xf32>,
    %c0_49 = arith.constant 0 : index
    %c3 = arith.constant 3 : index
    %c0_50 = arith.constant 0 : index
    %c0_51 = arith.constant 0 : index
    %41 = vector.load %arg1[%c0_49, %c3, %c0_50, %c0_51] : memref<1x4x16x16xf32, #tpu.memory_space<vmem>>, vector<1x1x16x16xf32>
    %42 = vector.shape_cast %41 : vector<1x1x16x16xf32> to vector<16x16xf32>
    %43 = vector.extract_strided_slice %42 {offsets = [0, 0], sizes = [16, 15], strides = [1, 1]} : vector<16x16xf32> to vector<16x15xf32>
    %c3_52 = arith.constant 3 : index
    %c0_53 = arith.constant 0 : index
    %c1_54 = arith.constant 1 : index
    %c1_55 = arith.constant 1 : index
    %44 = vector.load %arg5[%c3_52, %c0_53, %c1_54, %c1_55] : memref<4x3x18x16xf32, #tpu.memory_space<vmem>>, vector<1x1x16x15xf32>
    %45 = vector.shape_cast %44 : vector<1x1x16x15xf32> to vector<16x15xf32>
    %46 = vector.shape_cast %43 : vector<16x15xf32> to vector<1x1x16x15xf32>
    tpu.vector_store %arg5[%c3_52, %c0_53, %c1_54, %c1_55], %46 {strides = array<i32>} : memref<4x3x18x16xf32, #tpu.memory_space<vmem>>, vector<1x1x16x15xf32>,
    %c3_56 = arith.constant 3 : index
    %c1_57 = arith.constant 1 : index
    %c1_58 = arith.constant 1 : index
    %c0_59 = arith.constant 0 : index
    %47 = vector.load %arg5[%c3_56, %c1_57, %c1_58, %c0_59] : memref<4x3x18x16xf32, #tpu.memory_space<vmem>>, vector<1x1x16x16xf32>
    %48 = vector.shape_cast %47 : vector<1x1x16x16xf32> to vector<16x16xf32>
    %49 = vector.shape_cast %42 : vector<16x16xf32> to vector<1x1x16x16xf32>
    tpu.vector_store %arg5[%c3_56, %c1_57, %c1_58, %c0_59], %49 {strides = array<i32>} : memref<4x3x18x16xf32, #tpu.memory_space<vmem>>, vector<1x1x16x16xf32>,
    %50 = vector.extract_strided_slice %42 {offsets = [0, 1], sizes = [16, 15], strides = [1, 1]} : vector<16x16xf32> to vector<16x15xf32>
    %c3_60 = arith.constant 3 : index
    %c2_61 = arith.constant 2 : index
    %c1_62 = arith.constant 1 : index
    %c0_63 = arith.constant 0 : index
    %51 = vector.load %arg5[%c3_60, %c2_61, %c1_62, %c0_63] : memref<4x3x18x16xf32, #tpu.memory_space<vmem>>, vector<1x1x16x15xf32>
    %52 = vector.shape_cast %51 : vector<1x1x16x15xf32> to vector<16x15xf32>
    %53 = vector.shape_cast %50 : vector<16x15xf32> to vector<1x1x16x15xf32>
    tpu.vector_store %arg5[%c3_60, %c2_61, %c1_62, %c0_63], %53 {strides = array<i32>} : memref<4x3x18x16xf32, #tpu.memory_space<vmem>>, vector<1x1x16x15xf32>,
    %c0_64 = arith.constant 0 : index
    %c0_65 = arith.constant 0 : index
    %54 = vector.load %arg3[%c0_64, %c0_65] : memref<1x128xf32, #tpu.memory_space<vmem>>, vector<1x128xf32>
    %cst_66 = arith.constant 0.000000e+00 : f32
    %55 = vector.broadcast %cst_66 : f32 to vector<16x16xf32>
    %cst_67 = arith.constant 0.000000e+00 : f32
    %56 = vector.broadcast %cst_67 : f32 to vector<16x16xf32>
    %cst_68 = arith.constant 0.000000e+00 : f32
    %57 = vector.broadcast %cst_68 : f32 to vector<16x16xf32>
    %cst_69 = arith.constant 0.000000e+00 : f32
    %58 = vector.broadcast %cst_69 : f32 to vector<16x16xf32>
    %cst_70 = arith.constant 0.000000e+00 : f32
    %59 = vector.broadcast %cst_70 : f32 to vector<16x16xf32>
    %cst_71 = arith.constant 0.000000e+00 : f32
    %60 = vector.broadcast %cst_71 : f32 to vector<16x16xf32>
    %cst_72 = arith.constant 0.000000e+00 : f32
    %61 = vector.broadcast %cst_72 : f32 to vector<16x16xf32>
    %cst_73 = arith.constant 0.000000e+00 : f32
    %62 = vector.broadcast %cst_73 : f32 to vector<16x16xf32>
    %c0_74 = arith.constant 0 : index
    %c0_75 = arith.constant 0 : index
    %c0_76 = arith.constant 0 : index
    %c0_77 = arith.constant 0 : index
    %63 = vector.load %arg5[%c0_74, %c0_75, %c0_76, %c0_77] : memref<4x3x18x16xf32, #tpu.memory_space<vmem>>, vector<1x1x16x16xf32>
    %64 = vector.shape_cast %63 : vector<1x1x16x16xf32> to vector<16x16xf32>
    %c0_78 = arith.constant 0 : index
    %65 = memref.load %arg2[%c0_78] : memref<256xf32, #tpu.memory_space<smem>>
    %66 = vector.broadcast %65 : f32 to vector<16x16xf32>
    %67 = arith.mulf %66, %64 : vector<16x16xf32>
    %68 = arith.addf %55, %67 : vector<16x16xf32>
    %c16 = arith.constant 16 : index
    %69 = memref.load %arg2[%c16] : memref<256xf32, #tpu.memory_space<smem>>
    %70 = vector.broadcast %69 : f32 to vector<16x16xf32>
    %71 = arith.mulf %70, %64 : vector<16x16xf32>
    %72 = arith.addf %56, %71 : vector<16x16xf32>
    %c32 = arith.constant 32 : index
    %73 = memref.load %arg2[%c32] : memref<256xf32, #tpu.memory_space<smem>>
    %74 = vector.broadcast %73 : f32 to vector<16x16xf32>
    %75 = arith.mulf %74, %64 : vector<16x16xf32>
    %76 = arith.addf %57, %75 : vector<16x16xf32>
    %c48 = arith.constant 48 : index
    %77 = memref.load %arg2[%c48] : memref<256xf32, #tpu.memory_space<smem>>
    %78 = vector.broadcast %77 : f32 to vector<16x16xf32>
    %79 = arith.mulf %78, %64 : vector<16x16xf32>
    %80 = arith.addf %58, %79 : vector<16x16xf32>
    %c0_79 = arith.constant 0 : index
    %c1_80 = arith.constant 1 : index
    %c0_81 = arith.constant 0 : index
    %c0_82 = arith.constant 0 : index
    %81 = vector.load %arg5[%c0_79, %c1_80, %c0_81, %c0_82] : memref<4x3x18x16xf32, #tpu.memory_space<vmem>>, vector<1x1x16x16xf32>
    %82 = vector.shape_cast %81 : vector<1x1x16x16xf32> to vector<16x16xf32>
    %c1_83 = arith.constant 1 : index
    %83 = memref.load %arg2[%c1_83] : memref<256xf32, #tpu.memory_space<smem>>
    %84 = vector.broadcast %83 : f32 to vector<16x16xf32>
    %85 = arith.mulf %84, %82 : vector<16x16xf32>
    %86 = arith.addf %68, %85 : vector<16x16xf32>
    %c17 = arith.constant 17 : index
    %87 = memref.load %arg2[%c17] : memref<256xf32, #tpu.memory_space<smem>>
    %88 = vector.broadcast %87 : f32 to vector<16x16xf32>
    %89 = arith.mulf %88, %82 : vector<16x16xf32>
    %90 = arith.addf %72, %89 : vector<16x16xf32>
    %c33 = arith.constant 33 : index
    %91 = memref.load %arg2[%c33] : memref<256xf32, #tpu.memory_space<smem>>
    %92 = vector.broadcast %91 : f32 to vector<16x16xf32>
    %93 = arith.mulf %92, %82 : vector<16x16xf32>
    %94 = arith.addf %76, %93 : vector<16x16xf32>
    %c49 = arith.constant 49 : index
    %95 = memref.load %arg2[%c49] : memref<256xf32, #tpu.memory_space<smem>>
    %96 = vector.broadcast %95 : f32 to vector<16x16xf32>
    %97 = arith.mulf %96, %82 : vector<16x16xf32>
    %98 = arith.addf %80, %97 : vector<16x16xf32>
    %c128 = arith.constant 128 : index
    %99 = memref.load %arg2[%c128] : memref<256xf32, #tpu.memory_space<smem>>
    %100 = vector.broadcast %99 : f32 to vector<16x16xf32>
    %101 = arith.mulf %100, %82 : vector<16x16xf32>
    %102 = arith.addf %59, %101 : vector<16x16xf32>
    %c144 = arith.constant 144 : index
    %103 = memref.load %arg2[%c144] : memref<256xf32, #tpu.memory_space<smem>>
    %104 = vector.broadcast %103 : f32 to vector<16x16xf32>
    %105 = arith.mulf %104, %82 : vector<16x16xf32>
    %106 = arith.addf %60, %105 : vector<16x16xf32>
    %c160 = arith.constant 160 : index
    %107 = memref.load %arg2[%c160] : memref<256xf32, #tpu.memory_space<smem>>
    %108 = vector.broadcast %107 : f32 to vector<16x16xf32>
    %109 = arith.mulf %108, %82 : vector<16x16xf32>
    %110 = arith.addf %61, %109 : vector<16x16xf32>
    %c176 = arith.constant 176 : index
    %111 = memref.load %arg2[%c176] : memref<256xf32, #tpu.memory_space<smem>>
    %112 = vector.broadcast %111 : f32 to vector<16x16xf32>
    %113 = arith.mulf %112, %82 : vector<16x16xf32>
    %114 = arith.addf %62, %113 : vector<16x16xf32>
    %c0_84 = arith.constant 0 : index
    %c2_85 = arith.constant 2 : index
    %c0_86 = arith.constant 0 : index
    %c0_87 = arith.constant 0 : index
    %115 = vector.load %arg5[%c0_84, %c2_85, %c0_86, %c0_87] : memref<4x3x18x16xf32, #tpu.memory_space<vmem>>, vector<1x1x16x16xf32>
    %116 = vector.shape_cast %115 : vector<1x1x16x16xf32> to vector<16x16xf32>
    %c129 = arith.constant 129 : index
    %117 = memref.load %arg2[%c129] : memref<256xf32, #tpu.memory_space<smem>>
    %118 = vector.broadcast %117 : f32 to vector<16x16xf32>
    %119 = arith.mulf %118, %116 : vector<16x16xf32>
    %120 = arith.addf %102, %119 : vector<16x16xf32>
    %c145 = arith.constant 145 : index
    %121 = memref.load %arg2[%c145] : memref<256xf32, #tpu.memory_space<smem>>
    %122 = vector.broadcast %121 : f32 to vector<16x16xf32>
    %123 = arith.mulf %122, %116 : vector<16x16xf32>
    %124 = arith.addf %106, %123 : vector<16x16xf32>
    %c161 = arith.constant 161 : index
    %125 = memref.load %arg2[%c161] : memref<256xf32, #tpu.memory_space<smem>>
    %126 = vector.broadcast %125 : f32 to vector<16x16xf32>
    %127 = arith.mulf %126, %116 : vector<16x16xf32>
    %128 = arith.addf %110, %127 : vector<16x16xf32>
    %c177 = arith.constant 177 : index
    %129 = memref.load %arg2[%c177] : memref<256xf32, #tpu.memory_space<smem>>
    %130 = vector.broadcast %129 : f32 to vector<16x16xf32>
    %131 = arith.mulf %130, %116 : vector<16x16xf32>
    %132 = arith.addf %114, %131 : vector<16x16xf32>
    %c0_88 = arith.constant 0 : index
    %c0_89 = arith.constant 0 : index
    %c1_90 = arith.constant 1 : index
    %c0_91 = arith.constant 0 : index
    %133 = vector.load %arg5[%c0_88, %c0_89, %c1_90, %c0_91] : memref<4x3x18x16xf32, #tpu.memory_space<vmem>>, vector<1x1x16x16xf32>
    %134 = vector.shape_cast %133 : vector<1x1x16x16xf32> to vector<16x16xf32>
    %c2_92 = arith.constant 2 : index
    %135 = memref.load %arg2[%c2_92] : memref<256xf32, #tpu.memory_space<smem>>
    %136 = vector.broadcast %135 : f32 to vector<16x16xf32>
    %137 = arith.mulf %136, %134 : vector<16x16xf32>
    %138 = arith.addf %86, %137 : vector<16x16xf32>
    %c18 = arith.constant 18 : index
    %139 = memref.load %arg2[%c18] : memref<256xf32, #tpu.memory_space<smem>>
    %140 = vector.broadcast %139 : f32 to vector<16x16xf32>
    %141 = arith.mulf %140, %134 : vector<16x16xf32>
    %142 = arith.addf %90, %141 : vector<16x16xf32>
    %c34 = arith.constant 34 : index
    %143 = memref.load %arg2[%c34] : memref<256xf32, #tpu.memory_space<smem>>
    %144 = vector.broadcast %143 : f32 to vector<16x16xf32>
    %145 = arith.mulf %144, %134 : vector<16x16xf32>
    %146 = arith.addf %94, %145 : vector<16x16xf32>
    %c50 = arith.constant 50 : index
    %147 = memref.load %arg2[%c50] : memref<256xf32, #tpu.memory_space<smem>>
    %148 = vector.broadcast %147 : f32 to vector<16x16xf32>
    %149 = arith.mulf %148, %134 : vector<16x16xf32>
    %150 = arith.addf %98, %149 : vector<16x16xf32>
    %c0_93 = arith.constant 0 : index
    %c1_94 = arith.constant 1 : index
    %c1_95 = arith.constant 1 : index
    %c0_96 = arith.constant 0 : index
    %151 = vector.load %arg5[%c0_93, %c1_94, %c1_95, %c0_96] : memref<4x3x18x16xf32, #tpu.memory_space<vmem>>, vector<1x1x16x16xf32>
    %152 = vector.shape_cast %151 : vector<1x1x16x16xf32> to vector<16x16xf32>
    %c3_97 = arith.constant 3 : index
    %153 = memref.load %arg2[%c3_97] : memref<256xf32, #tpu.memory_space<smem>>
    %154 = vector.broadcast %153 : f32 to vector<16x16xf32>
    %155 = arith.mulf %154, %152 : vector<16x16xf32>
    %156 = arith.addf %138, %155 : vector<16x16xf32>
    %c19 = arith.constant 19 : index
    %157 = memref.load %arg2[%c19] : memref<256xf32, #tpu.memory_space<smem>>
    %158 = vector.broadcast %157 : f32 to vector<16x16xf32>
    %159 = arith.mulf %158, %152 : vector<16x16xf32>
    %160 = arith.addf %142, %159 : vector<16x16xf32>
    %c35 = arith.constant 35 : index
    %161 = memref.load %arg2[%c35] : memref<256xf32, #tpu.memory_space<smem>>
    %162 = vector.broadcast %161 : f32 to vector<16x16xf32>
    %163 = arith.mulf %162, %152 : vector<16x16xf32>
    %164 = arith.addf %146, %163 : vector<16x16xf32>
    %c51 = arith.constant 51 : index
    %165 = memref.load %arg2[%c51] : memref<256xf32, #tpu.memory_space<smem>>
    %166 = vector.broadcast %165 : f32 to vector<16x16xf32>
    %167 = arith.mulf %166, %152 : vector<16x16xf32>
    %168 = arith.addf %150, %167 : vector<16x16xf32>
    %c130 = arith.constant 130 : index
    %169 = memref.load %arg2[%c130] : memref<256xf32, #tpu.memory_space<smem>>
    %170 = vector.broadcast %169 : f32 to vector<16x16xf32>
    %171 = arith.mulf %170, %152 : vector<16x16xf32>
    %172 = arith.addf %120, %171 : vector<16x16xf32>
    %c146 = arith.constant 146 : index
    %173 = memref.load %arg2[%c146] : memref<256xf32, #tpu.memory_space<smem>>
    %174 = vector.broadcast %173 : f32 to vector<16x16xf32>
    %175 = arith.mulf %174, %152 : vector<16x16xf32>
    %176 = arith.addf %124, %175 : vector<16x16xf32>
    %c162 = arith.constant 162 : index
    %177 = memref.load %arg2[%c162] : memref<256xf32, #tpu.memory_space<smem>>
    %178 = vector.broadcast %177 : f32 to vector<16x16xf32>
    %179 = arith.mulf %178, %152 : vector<16x16xf32>
    %180 = arith.addf %128, %179 : vector<16x16xf32>
    %c178 = arith.constant 178 : index
    %181 = memref.load %arg2[%c178] : memref<256xf32, #tpu.memory_space<smem>>
    %182 = vector.broadcast %181 : f32 to vector<16x16xf32>
    %183 = arith.mulf %182, %152 : vector<16x16xf32>
    %184 = arith.addf %132, %183 : vector<16x16xf32>
    %c0_98 = arith.constant 0 : index
    %c2_99 = arith.constant 2 : index
    %c1_100 = arith.constant 1 : index
    %c0_101 = arith.constant 0 : index
    %185 = vector.load %arg5[%c0_98, %c2_99, %c1_100, %c0_101] : memref<4x3x18x16xf32, #tpu.memory_space<vmem>>, vector<1x1x16x16xf32>
    %186 = vector.shape_cast %185 : vector<1x1x16x16xf32> to vector<16x16xf32>
    %c131 = arith.constant 131 : index
    %187 = memref.load %arg2[%c131] : memref<256xf32, #tpu.memory_space<smem>>
    %188 = vector.broadcast %187 : f32 to vector<16x16xf32>
    %189 = arith.mulf %188, %186 : vector<16x16xf32>
    %190 = arith.addf %172, %189 : vector<16x16xf32>
    %c147 = arith.constant 147 : index
    %191 = memref.load %arg2[%c147] : memref<256xf32, #tpu.memory_space<smem>>
    %192 = vector.broadcast %191 : f32 to vector<16x16xf32>
    %193 = arith.mulf %192, %186 : vector<16x16xf32>
    %194 = arith.addf %176, %193 : vector<16x16xf32>
    %c163 = arith.constant 163 : index
    %195 = memref.load %arg2[%c163] : memref<256xf32, #tpu.memory_space<smem>>
    %196 = vector.broadcast %195 : f32 to vector<16x16xf32>
    %197 = arith.mulf %196, %186 : vector<16x16xf32>
    %198 = arith.addf %180, %197 : vector<16x16xf32>
    %c179 = arith.constant 179 : index
    %199 = memref.load %arg2[%c179] : memref<256xf32, #tpu.memory_space<smem>>
    %200 = vector.broadcast %199 : f32 to vector<16x16xf32>
    %201 = arith.mulf %200, %186 : vector<16x16xf32>
    %202 = arith.addf %184, %201 : vector<16x16xf32>
    %c1_102 = arith.constant 1 : index
    %c0_103 = arith.constant 0 : index
    %c0_104 = arith.constant 0 : index
    %c0_105 = arith.constant 0 : index
    %203 = vector.load %arg5[%c1_102, %c0_103, %c0_104, %c0_105] : memref<4x3x18x16xf32, #tpu.memory_space<vmem>>, vector<1x1x16x16xf32>
    %204 = vector.shape_cast %203 : vector<1x1x16x16xf32> to vector<16x16xf32>
    %c4 = arith.constant 4 : index
    %205 = memref.load %arg2[%c4] : memref<256xf32, #tpu.memory_space<smem>>
    %206 = vector.broadcast %205 : f32 to vector<16x16xf32>
    %207 = arith.mulf %206, %204 : vector<16x16xf32>
    %208 = arith.addf %156, %207 : vector<16x16xf32>
    %c20 = arith.constant 20 : index
    %209 = memref.load %arg2[%c20] : memref<256xf32, #tpu.memory_space<smem>>
    %210 = vector.broadcast %209 : f32 to vector<16x16xf32>
    %211 = arith.mulf %210, %204 : vector<16x16xf32>
    %212 = arith.addf %160, %211 : vector<16x16xf32>
    %c36 = arith.constant 36 : index
    %213 = memref.load %arg2[%c36] : memref<256xf32, #tpu.memory_space<smem>>
    %214 = vector.broadcast %213 : f32 to vector<16x16xf32>
    %215 = arith.mulf %214, %204 : vector<16x16xf32>
    %216 = arith.addf %164, %215 : vector<16x16xf32>
    %c52 = arith.constant 52 : index
    %217 = memref.load %arg2[%c52] : memref<256xf32, #tpu.memory_space<smem>>
    %218 = vector.broadcast %217 : f32 to vector<16x16xf32>
    %219 = arith.mulf %218, %204 : vector<16x16xf32>
    %220 = arith.addf %168, %219 : vector<16x16xf32>
    %c1_106 = arith.constant 1 : index
    %c1_107 = arith.constant 1 : index
    %c0_108 = arith.constant 0 : index
    %c0_109 = arith.constant 0 : index
    %221 = vector.load %arg5[%c1_106, %c1_107, %c0_108, %c0_109] : memref<4x3x18x16xf32, #tpu.memory_space<vmem>>, vector<1x1x16x16xf32>
    %222 = vector.shape_cast %221 : vector<1x1x16x16xf32> to vector<16x16xf32>
    %c5 = arith.constant 5 : index
    %223 = memref.load %arg2[%c5] : memref<256xf32, #tpu.memory_space<smem>>
    %224 = vector.broadcast %223 : f32 to vector<16x16xf32>
    %225 = arith.mulf %224, %222 : vector<16x16xf32>
    %226 = arith.addf %208, %225 : vector<16x16xf32>
    %c21 = arith.constant 21 : index
    %227 = memref.load %arg2[%c21] : memref<256xf32, #tpu.memory_space<smem>>
    %228 = vector.broadcast %227 : f32 to vector<16x16xf32>
    %229 = arith.mulf %228, %222 : vector<16x16xf32>
    %230 = arith.addf %212, %229 : vector<16x16xf32>
    %c37 = arith.constant 37 : index
    %231 = memref.load %arg2[%c37] : memref<256xf32, #tpu.memory_space<smem>>
    %232 = vector.broadcast %231 : f32 to vector<16x16xf32>
    %233 = arith.mulf %232, %222 : vector<16x16xf32>
    %234 = arith.addf %216, %233 : vector<16x16xf32>
    %c53 = arith.constant 53 : index
    %235 = memref.load %arg2[%c53] : memref<256xf32, #tpu.memory_space<smem>>
    %236 = vector.broadcast %235 : f32 to vector<16x16xf32>
    %237 = arith.mulf %236, %222 : vector<16x16xf32>
    %238 = arith.addf %220, %237 : vector<16x16xf32>
    %c132 = arith.constant 132 : index
    %239 = memref.load %arg2[%c132] : memref<256xf32, #tpu.memory_space<smem>>
    %240 = vector.broadcast %239 : f32 to vector<16x16xf32>
    %241 = arith.mulf %240, %222 : vector<16x16xf32>
    %242 = arith.addf %190, %241 : vector<16x16xf32>
    %c148 = arith.constant 148 : index
    %243 = memref.load %arg2[%c148] : memref<256xf32, #tpu.memory_space<smem>>
    %244 = vector.broadcast %243 : f32 to vector<16x16xf32>
    %245 = arith.mulf %244, %222 : vector<16x16xf32>
    %246 = arith.addf %194, %245 : vector<16x16xf32>
    %c164 = arith.constant 164 : index
    %247 = memref.load %arg2[%c164] : memref<256xf32, #tpu.memory_space<smem>>
    %248 = vector.broadcast %247 : f32 to vector<16x16xf32>
    %249 = arith.mulf %248, %222 : vector<16x16xf32>
    %250 = arith.addf %198, %249 : vector<16x16xf32>
    %c180 = arith.constant 180 : index
    %251 = memref.load %arg2[%c180] : memref<256xf32, #tpu.memory_space<smem>>
    %252 = vector.broadcast %251 : f32 to vector<16x16xf32>
    %253 = arith.mulf %252, %222 : vector<16x16xf32>
    %254 = arith.addf %202, %253 : vector<16x16xf32>
    %c1_110 = arith.constant 1 : index
    %c2_111 = arith.constant 2 : index
    %c0_112 = arith.constant 0 : index
    %c0_113 = arith.constant 0 : index
    %255 = vector.load %arg5[%c1_110, %c2_111, %c0_112, %c0_113] : memref<4x3x18x16xf32, #tpu.memory_space<vmem>>, vector<1x1x16x16xf32>
    %256 = vector.shape_cast %255 : vector<1x1x16x16xf32> to vector<16x16xf32>
    %c133 = arith.constant 133 : index
    %257 = memref.load %arg2[%c133] : memref<256xf32, #tpu.memory_space<smem>>
    %258 = vector.broadcast %257 : f32 to vector<16x16xf32>
    %259 = arith.mulf %258, %256 : vector<16x16xf32>
    %260 = arith.addf %242, %259 : vector<16x16xf32>
    %c149 = arith.constant 149 : index
    %261 = memref.load %arg2[%c149] : memref<256xf32, #tpu.memory_space<smem>>
    %262 = vector.broadcast %261 : f32 to vector<16x16xf32>
    %263 = arith.mulf %262, %256 : vector<16x16xf32>
    %264 = arith.addf %246, %263 : vector<16x16xf32>
    %c165 = arith.constant 165 : index
    %265 = memref.load %arg2[%c165] : memref<256xf32, #tpu.memory_space<smem>>
    %266 = vector.broadcast %265 : f32 to vector<16x16xf32>
    %267 = arith.mulf %266, %256 : vector<16x16xf32>
    %268 = arith.addf %250, %267 : vector<16x16xf32>
    %c181 = arith.constant 181 : index
    %269 = memref.load %arg2[%c181] : memref<256xf32, #tpu.memory_space<smem>>
    %270 = vector.broadcast %269 : f32 to vector<16x16xf32>
    %271 = arith.mulf %270, %256 : vector<16x16xf32>
    %272 = arith.addf %254, %271 : vector<16x16xf32>
    %c1_114 = arith.constant 1 : index
    %c0_115 = arith.constant 0 : index
    %c1_116 = arith.constant 1 : index
    %c0_117 = arith.constant 0 : index
    %273 = vector.load %arg5[%c1_114, %c0_115, %c1_116, %c0_117] : memref<4x3x18x16xf32, #tpu.memory_space<vmem>>, vector<1x1x16x16xf32>
    %274 = vector.shape_cast %273 : vector<1x1x16x16xf32> to vector<16x16xf32>
    %c6 = arith.constant 6 : index
    %275 = memref.load %arg2[%c6] : memref<256xf32, #tpu.memory_space<smem>>
    %276 = vector.broadcast %275 : f32 to vector<16x16xf32>
    %277 = arith.mulf %276, %274 : vector<16x16xf32>
    %278 = arith.addf %226, %277 : vector<16x16xf32>
    %c22 = arith.constant 22 : index
    %279 = memref.load %arg2[%c22] : memref<256xf32, #tpu.memory_space<smem>>
    %280 = vector.broadcast %279 : f32 to vector<16x16xf32>
    %281 = arith.mulf %280, %274 : vector<16x16xf32>
    %282 = arith.addf %230, %281 : vector<16x16xf32>
    %c38 = arith.constant 38 : index
    %283 = memref.load %arg2[%c38] : memref<256xf32, #tpu.memory_space<smem>>
    %284 = vector.broadcast %283 : f32 to vector<16x16xf32>
    %285 = arith.mulf %284, %274 : vector<16x16xf32>
    %286 = arith.addf %234, %285 : vector<16x16xf32>
    %c54 = arith.constant 54 : index
    %287 = memref.load %arg2[%c54] : memref<256xf32, #tpu.memory_space<smem>>
    %288 = vector.broadcast %287 : f32 to vector<16x16xf32>
    %289 = arith.mulf %288, %274 : vector<16x16xf32>
    %290 = arith.addf %238, %289 : vector<16x16xf32>
    %c1_118 = arith.constant 1 : index
    %c1_119 = arith.constant 1 : index
    %c1_120 = arith.constant 1 : index
    %c0_121 = arith.constant 0 : index
    %291 = vector.load %arg5[%c1_118, %c1_119, %c1_120, %c0_121] : memref<4x3x18x16xf32, #tpu.memory_space<vmem>>, vector<1x1x16x16xf32>
    %292 = vector.shape_cast %291 : vector<1x1x16x16xf32> to vector<16x16xf32>
    %c7 = arith.constant 7 : index
    %293 = memref.load %arg2[%c7] : memref<256xf32, #tpu.memory_space<smem>>
    %294 = vector.broadcast %293 : f32 to vector<16x16xf32>
    %295 = arith.mulf %294, %292 : vector<16x16xf32>
    %296 = arith.addf %278, %295 : vector<16x16xf32>
    %c23 = arith.constant 23 : index
    %297 = memref.load %arg2[%c23] : memref<256xf32, #tpu.memory_space<smem>>
    %298 = vector.broadcast %297 : f32 to vector<16x16xf32>
    %299 = arith.mulf %298, %292 : vector<16x16xf32>
    %300 = arith.addf %282, %299 : vector<16x16xf32>
    %c39 = arith.constant 39 : index
    %301 = memref.load %arg2[%c39] : memref<256xf32, #tpu.memory_space<smem>>
    %302 = vector.broadcast %301 : f32 to vector<16x16xf32>
    %303 = arith.mulf %302, %292 : vector<16x16xf32>
    %304 = arith.addf %286, %303 : vector<16x16xf32>
    %c55 = arith.constant 55 : index
    %305 = memref.load %arg2[%c55] : memref<256xf32, #tpu.memory_space<smem>>
    %306 = vector.broadcast %305 : f32 to vector<16x16xf32>
    %307 = arith.mulf %306, %292 : vector<16x16xf32>
    %308 = arith.addf %290, %307 : vector<16x16xf32>
    %c134 = arith.constant 134 : index
    %309 = memref.load %arg2[%c134] : memref<256xf32, #tpu.memory_space<smem>>
    %310 = vector.broadcast %309 : f32 to vector<16x16xf32>
    %311 = arith.mulf %310, %292 : vector<16x16xf32>
    %312 = arith.addf %260, %311 : vector<16x16xf32>
    %c150 = arith.constant 150 : index
    %313 = memref.load %arg2[%c150] : memref<256xf32, #tpu.memory_space<smem>>
    %314 = vector.broadcast %313 : f32 to vector<16x16xf32>
    %315 = arith.mulf %314, %292 : vector<16x16xf32>
    %316 = arith.addf %264, %315 : vector<16x16xf32>
    %c166 = arith.constant 166 : index
    %317 = memref.load %arg2[%c166] : memref<256xf32, #tpu.memory_space<smem>>
    %318 = vector.broadcast %317 : f32 to vector<16x16xf32>
    %319 = arith.mulf %318, %292 : vector<16x16xf32>
    %320 = arith.addf %268, %319 : vector<16x16xf32>
    %c182 = arith.constant 182 : index
    %321 = memref.load %arg2[%c182] : memref<256xf32, #tpu.memory_space<smem>>
    %322 = vector.broadcast %321 : f32 to vector<16x16xf32>
    %323 = arith.mulf %322, %292 : vector<16x16xf32>
    %324 = arith.addf %272, %323 : vector<16x16xf32>
    %c1_122 = arith.constant 1 : index
    %c2_123 = arith.constant 2 : index
    %c1_124 = arith.constant 1 : index
    %c0_125 = arith.constant 0 : index
    %325 = vector.load %arg5[%c1_122, %c2_123, %c1_124, %c0_125] : memref<4x3x18x16xf32, #tpu.memory_space<vmem>>, vector<1x1x16x16xf32>
    %326 = vector.shape_cast %325 : vector<1x1x16x16xf32> to vector<16x16xf32>
    %c135 = arith.constant 135 : index
    %327 = memref.load %arg2[%c135] : memref<256xf32, #tpu.memory_space<smem>>
    %328 = vector.broadcast %327 : f32 to vector<16x16xf32>
    %329 = arith.mulf %328, %326 : vector<16x16xf32>
    %330 = arith.addf %312, %329 : vector<16x16xf32>
    %c151 = arith.constant 151 : index
    %331 = memref.load %arg2[%c151] : memref<256xf32, #tpu.memory_space<smem>>
    %332 = vector.broadcast %331 : f32 to vector<16x16xf32>
    %333 = arith.mulf %332, %326 : vector<16x16xf32>
    %334 = arith.addf %316, %333 : vector<16x16xf32>
    %c167 = arith.constant 167 : index
    %335 = memref.load %arg2[%c167] : memref<256xf32, #tpu.memory_space<smem>>
    %336 = vector.broadcast %335 : f32 to vector<16x16xf32>
    %337 = arith.mulf %336, %326 : vector<16x16xf32>
    %338 = arith.addf %320, %337 : vector<16x16xf32>
    %c183 = arith.constant 183 : index
    %339 = memref.load %arg2[%c183] : memref<256xf32, #tpu.memory_space<smem>>
    %340 = vector.broadcast %339 : f32 to vector<16x16xf32>
    %341 = arith.mulf %340, %326 : vector<16x16xf32>
    %342 = arith.addf %324, %341 : vector<16x16xf32>
    %c2_126 = arith.constant 2 : index
    %c0_127 = arith.constant 0 : index
    %c0_128 = arith.constant 0 : index
    %c0_129 = arith.constant 0 : index
    %343 = vector.load %arg5[%c2_126, %c0_127, %c0_128, %c0_129] : memref<4x3x18x16xf32, #tpu.memory_space<vmem>>, vector<1x1x16x16xf32>
    %344 = vector.shape_cast %343 : vector<1x1x16x16xf32> to vector<16x16xf32>
    %c8 = arith.constant 8 : index
    %345 = memref.load %arg2[%c8] : memref<256xf32, #tpu.memory_space<smem>>
    %346 = vector.broadcast %345 : f32 to vector<16x16xf32>
    %347 = arith.mulf %346, %344 : vector<16x16xf32>
    %348 = arith.addf %296, %347 : vector<16x16xf32>
    %c24 = arith.constant 24 : index
    %349 = memref.load %arg2[%c24] : memref<256xf32, #tpu.memory_space<smem>>
    %350 = vector.broadcast %349 : f32 to vector<16x16xf32>
    %351 = arith.mulf %350, %344 : vector<16x16xf32>
    %352 = arith.addf %300, %351 : vector<16x16xf32>
    %c40 = arith.constant 40 : index
    %353 = memref.load %arg2[%c40] : memref<256xf32, #tpu.memory_space<smem>>
    %354 = vector.broadcast %353 : f32 to vector<16x16xf32>
    %355 = arith.mulf %354, %344 : vector<16x16xf32>
    %356 = arith.addf %304, %355 : vector<16x16xf32>
    %c56 = arith.constant 56 : index
    %357 = memref.load %arg2[%c56] : memref<256xf32, #tpu.memory_space<smem>>
    %358 = vector.broadcast %357 : f32 to vector<16x16xf32>
    %359 = arith.mulf %358, %344 : vector<16x16xf32>
    %360 = arith.addf %308, %359 : vector<16x16xf32>
    %c2_130 = arith.constant 2 : index
    %c1_131 = arith.constant 1 : index
    %c0_132 = arith.constant 0 : index
    %c0_133 = arith.constant 0 : index
    %361 = vector.load %arg5[%c2_130, %c1_131, %c0_132, %c0_133] : memref<4x3x18x16xf32, #tpu.memory_space<vmem>>, vector<1x1x16x16xf32>
    %362 = vector.shape_cast %361 : vector<1x1x16x16xf32> to vector<16x16xf32>
    %c9 = arith.constant 9 : index
    %363 = memref.load %arg2[%c9] : memref<256xf32, #tpu.memory_space<smem>>
    %364 = vector.broadcast %363 : f32 to vector<16x16xf32>
    %365 = arith.mulf %364, %362 : vector<16x16xf32>
    %366 = arith.addf %348, %365 : vector<16x16xf32>
    %c25 = arith.constant 25 : index
    %367 = memref.load %arg2[%c25] : memref<256xf32, #tpu.memory_space<smem>>
    %368 = vector.broadcast %367 : f32 to vector<16x16xf32>
    %369 = arith.mulf %368, %362 : vector<16x16xf32>
    %370 = arith.addf %352, %369 : vector<16x16xf32>
    %c41 = arith.constant 41 : index
    %371 = memref.load %arg2[%c41] : memref<256xf32, #tpu.memory_space<smem>>
    %372 = vector.broadcast %371 : f32 to vector<16x16xf32>
    %373 = arith.mulf %372, %362 : vector<16x16xf32>
    %374 = arith.addf %356, %373 : vector<16x16xf32>
    %c57 = arith.constant 57 : index
    %375 = memref.load %arg2[%c57] : memref<256xf32, #tpu.memory_space<smem>>
    %376 = vector.broadcast %375 : f32 to vector<16x16xf32>
    %377 = arith.mulf %376, %362 : vector<16x16xf32>
    %378 = arith.addf %360, %377 : vector<16x16xf32>
    %c136 = arith.constant 136 : index
    %379 = memref.load %arg2[%c136] : memref<256xf32, #tpu.memory_space<smem>>
    %380 = vector.broadcast %379 : f32 to vector<16x16xf32>
    %381 = arith.mulf %380, %362 : vector<16x16xf32>
    %382 = arith.addf %330, %381 : vector<16x16xf32>
    %c152 = arith.constant 152 : index
    %383 = memref.load %arg2[%c152] : memref<256xf32, #tpu.memory_space<smem>>
    %384 = vector.broadcast %383 : f32 to vector<16x16xf32>
    %385 = arith.mulf %384, %362 : vector<16x16xf32>
    %386 = arith.addf %334, %385 : vector<16x16xf32>
    %c168 = arith.constant 168 : index
    %387 = memref.load %arg2[%c168] : memref<256xf32, #tpu.memory_space<smem>>
    %388 = vector.broadcast %387 : f32 to vector<16x16xf32>
    %389 = arith.mulf %388, %362 : vector<16x16xf32>
    %390 = arith.addf %338, %389 : vector<16x16xf32>
    %c184 = arith.constant 184 : index
    %391 = memref.load %arg2[%c184] : memref<256xf32, #tpu.memory_space<smem>>
    %392 = vector.broadcast %391 : f32 to vector<16x16xf32>
    %393 = arith.mulf %392, %362 : vector<16x16xf32>
    %394 = arith.addf %342, %393 : vector<16x16xf32>
    %c2_134 = arith.constant 2 : index
    %c2_135 = arith.constant 2 : index
    %c0_136 = arith.constant 0 : index
    %c0_137 = arith.constant 0 : index
    %395 = vector.load %arg5[%c2_134, %c2_135, %c0_136, %c0_137] : memref<4x3x18x16xf32, #tpu.memory_space<vmem>>, vector<1x1x16x16xf32>
    %396 = vector.shape_cast %395 : vector<1x1x16x16xf32> to vector<16x16xf32>
    %c137 = arith.constant 137 : index
    %397 = memref.load %arg2[%c137] : memref<256xf32, #tpu.memory_space<smem>>
    %398 = vector.broadcast %397 : f32 to vector<16x16xf32>
    %399 = arith.mulf %398, %396 : vector<16x16xf32>
    %400 = arith.addf %382, %399 : vector<16x16xf32>
    %c153 = arith.constant 153 : index
    %401 = memref.load %arg2[%c153] : memref<256xf32, #tpu.memory_space<smem>>
    %402 = vector.broadcast %401 : f32 to vector<16x16xf32>
    %403 = arith.mulf %402, %396 : vector<16x16xf32>
    %404 = arith.addf %386, %403 : vector<16x16xf32>
    %c169 = arith.constant 169 : index
    %405 = memref.load %arg2[%c169] : memref<256xf32, #tpu.memory_space<smem>>
    %406 = vector.broadcast %405 : f32 to vector<16x16xf32>
    %407 = arith.mulf %406, %396 : vector<16x16xf32>
    %408 = arith.addf %390, %407 : vector<16x16xf32>
    %c185 = arith.constant 185 : index
    %409 = memref.load %arg2[%c185] : memref<256xf32, #tpu.memory_space<smem>>
    %410 = vector.broadcast %409 : f32 to vector<16x16xf32>
    %411 = arith.mulf %410, %396 : vector<16x16xf32>
    %412 = arith.addf %394, %411 : vector<16x16xf32>
    %c2_138 = arith.constant 2 : index
    %c0_139 = arith.constant 0 : index
    %c1_140 = arith.constant 1 : index
    %c0_141 = arith.constant 0 : index
    %413 = vector.load %arg5[%c2_138, %c0_139, %c1_140, %c0_141] : memref<4x3x18x16xf32, #tpu.memory_space<vmem>>, vector<1x1x16x16xf32>
    %414 = vector.shape_cast %413 : vector<1x1x16x16xf32> to vector<16x16xf32>
    %c10 = arith.constant 10 : index
    %415 = memref.load %arg2[%c10] : memref<256xf32, #tpu.memory_space<smem>>
    %416 = vector.broadcast %415 : f32 to vector<16x16xf32>
    %417 = arith.mulf %416, %414 : vector<16x16xf32>
    %418 = arith.addf %366, %417 : vector<16x16xf32>
    %c26 = arith.constant 26 : index
    %419 = memref.load %arg2[%c26] : memref<256xf32, #tpu.memory_space<smem>>
    %420 = vector.broadcast %419 : f32 to vector<16x16xf32>
    %421 = arith.mulf %420, %414 : vector<16x16xf32>
    %422 = arith.addf %370, %421 : vector<16x16xf32>
    %c42 = arith.constant 42 : index
    %423 = memref.load %arg2[%c42] : memref<256xf32, #tpu.memory_space<smem>>
    %424 = vector.broadcast %423 : f32 to vector<16x16xf32>
    %425 = arith.mulf %424, %414 : vector<16x16xf32>
    %426 = arith.addf %374, %425 : vector<16x16xf32>
    %c58 = arith.constant 58 : index
    %427 = memref.load %arg2[%c58] : memref<256xf32, #tpu.memory_space<smem>>
    %428 = vector.broadcast %427 : f32 to vector<16x16xf32>
    %429 = arith.mulf %428, %414 : vector<16x16xf32>
    %430 = arith.addf %378, %429 : vector<16x16xf32>
    %c2_142 = arith.constant 2 : index
    %c1_143 = arith.constant 1 : index
    %c1_144 = arith.constant 1 : index
    %c0_145 = arith.constant 0 : index
    %431 = vector.load %arg5[%c2_142, %c1_143, %c1_144, %c0_145] : memref<4x3x18x16xf32, #tpu.memory_space<vmem>>, vector<1x1x16x16xf32>
    %432 = vector.shape_cast %431 : vector<1x1x16x16xf32> to vector<16x16xf32>
    %c11 = arith.constant 11 : index
    %433 = memref.load %arg2[%c11] : memref<256xf32, #tpu.memory_space<smem>>
    %434 = vector.broadcast %433 : f32 to vector<16x16xf32>
    %435 = arith.mulf %434, %432 : vector<16x16xf32>
    %436 = arith.addf %418, %435 : vector<16x16xf32>
    %c27 = arith.constant 27 : index
    %437 = memref.load %arg2[%c27] : memref<256xf32, #tpu.memory_space<smem>>
    %438 = vector.broadcast %437 : f32 to vector<16x16xf32>
    %439 = arith.mulf %438, %432 : vector<16x16xf32>
    %440 = arith.addf %422, %439 : vector<16x16xf32>
    %c43 = arith.constant 43 : index
    %441 = memref.load %arg2[%c43] : memref<256xf32, #tpu.memory_space<smem>>
    %442 = vector.broadcast %441 : f32 to vector<16x16xf32>
    %443 = arith.mulf %442, %432 : vector<16x16xf32>
    %444 = arith.addf %426, %443 : vector<16x16xf32>
    %c59 = arith.constant 59 : index
    %445 = memref.load %arg2[%c59] : memref<256xf32, #tpu.memory_space<smem>>
    %446 = vector.broadcast %445 : f32 to vector<16x16xf32>
    %447 = arith.mulf %446, %432 : vector<16x16xf32>
    %448 = arith.addf %430, %447 : vector<16x16xf32>
    %c138 = arith.constant 138 : index
    %449 = memref.load %arg2[%c138] : memref<256xf32, #tpu.memory_space<smem>>
    %450 = vector.broadcast %449 : f32 to vector<16x16xf32>
    %451 = arith.mulf %450, %432 : vector<16x16xf32>
    %452 = arith.addf %400, %451 : vector<16x16xf32>
    %c154 = arith.constant 154 : index
    %453 = memref.load %arg2[%c154] : memref<256xf32, #tpu.memory_space<smem>>
    %454 = vector.broadcast %453 : f32 to vector<16x16xf32>
    %455 = arith.mulf %454, %432 : vector<16x16xf32>
    %456 = arith.addf %404, %455 : vector<16x16xf32>
    %c170 = arith.constant 170 : index
    %457 = memref.load %arg2[%c170] : memref<256xf32, #tpu.memory_space<smem>>
    %458 = vector.broadcast %457 : f32 to vector<16x16xf32>
    %459 = arith.mulf %458, %432 : vector<16x16xf32>
    %460 = arith.addf %408, %459 : vector<16x16xf32>
    %c186 = arith.constant 186 : index
    %461 = memref.load %arg2[%c186] : memref<256xf32, #tpu.memory_space<smem>>
    %462 = vector.broadcast %461 : f32 to vector<16x16xf32>
    %463 = arith.mulf %462, %432 : vector<16x16xf32>
    %464 = arith.addf %412, %463 : vector<16x16xf32>
    %c2_146 = arith.constant 2 : index
    %c2_147 = arith.constant 2 : index
    %c1_148 = arith.constant 1 : index
    %c0_149 = arith.constant 0 : index
    %465 = vector.load %arg5[%c2_146, %c2_147, %c1_148, %c0_149] : memref<4x3x18x16xf32, #tpu.memory_space<vmem>>, vector<1x1x16x16xf32>
    %466 = vector.shape_cast %465 : vector<1x1x16x16xf32> to vector<16x16xf32>
    %c139 = arith.constant 139 : index
    %467 = memref.load %arg2[%c139] : memref<256xf32, #tpu.memory_space<smem>>
    %468 = vector.broadcast %467 : f32 to vector<16x16xf32>
    %469 = arith.mulf %468, %466 : vector<16x16xf32>
    %470 = arith.addf %452, %469 : vector<16x16xf32>
    %c155 = arith.constant 155 : index
    %471 = memref.load %arg2[%c155] : memref<256xf32, #tpu.memory_space<smem>>
    %472 = vector.broadcast %471 : f32 to vector<16x16xf32>
    %473 = arith.mulf %472, %466 : vector<16x16xf32>
    %474 = arith.addf %456, %473 : vector<16x16xf32>
    %c171 = arith.constant 171 : index
    %475 = memref.load %arg2[%c171] : memref<256xf32, #tpu.memory_space<smem>>
    %476 = vector.broadcast %475 : f32 to vector<16x16xf32>
    %477 = arith.mulf %476, %466 : vector<16x16xf32>
    %478 = arith.addf %460, %477 : vector<16x16xf32>
    %c187 = arith.constant 187 : index
    %479 = memref.load %arg2[%c187] : memref<256xf32, #tpu.memory_space<smem>>
    %480 = vector.broadcast %479 : f32 to vector<16x16xf32>
    %481 = arith.mulf %480, %466 : vector<16x16xf32>
    %482 = arith.addf %464, %481 : vector<16x16xf32>
    %c3_150 = arith.constant 3 : index
    %c0_151 = arith.constant 0 : index
    %c0_152 = arith.constant 0 : index
    %c0_153 = arith.constant 0 : index
    %483 = vector.load %arg5[%c3_150, %c0_151, %c0_152, %c0_153] : memref<4x3x18x16xf32, #tpu.memory_space<vmem>>, vector<1x1x16x16xf32>
    %484 = vector.shape_cast %483 : vector<1x1x16x16xf32> to vector<16x16xf32>
    %c12 = arith.constant 12 : index
    %485 = memref.load %arg2[%c12] : memref<256xf32, #tpu.memory_space<smem>>
    %486 = vector.broadcast %485 : f32 to vector<16x16xf32>
    %487 = arith.mulf %486, %484 : vector<16x16xf32>
    %488 = arith.addf %436, %487 : vector<16x16xf32>
    %c28 = arith.constant 28 : index
    %489 = memref.load %arg2[%c28] : memref<256xf32, #tpu.memory_space<smem>>
    %490 = vector.broadcast %489 : f32 to vector<16x16xf32>
    %491 = arith.mulf %490, %484 : vector<16x16xf32>
    %492 = arith.addf %440, %491 : vector<16x16xf32>
    %c44 = arith.constant 44 : index
    %493 = memref.load %arg2[%c44] : memref<256xf32, #tpu.memory_space<smem>>
    %494 = vector.broadcast %493 : f32 to vector<16x16xf32>
    %495 = arith.mulf %494, %484 : vector<16x16xf32>
    %496 = arith.addf %444, %495 : vector<16x16xf32>
    %c60 = arith.constant 60 : index
    %497 = memref.load %arg2[%c60] : memref<256xf32, #tpu.memory_space<smem>>
    %498 = vector.broadcast %497 : f32 to vector<16x16xf32>
    %499 = arith.mulf %498, %484 : vector<16x16xf32>
    %500 = arith.addf %448, %499 : vector<16x16xf32>
    %c3_154 = arith.constant 3 : index
    %c1_155 = arith.constant 1 : index
    %c0_156 = arith.constant 0 : index
    %c0_157 = arith.constant 0 : index
    %501 = vector.load %arg5[%c3_154, %c1_155, %c0_156, %c0_157] : memref<4x3x18x16xf32, #tpu.memory_space<vmem>>, vector<1x1x16x16xf32>
    %502 = vector.shape_cast %501 : vector<1x1x16x16xf32> to vector<16x16xf32>
    %c13 = arith.constant 13 : index
    %503 = memref.load %arg2[%c13] : memref<256xf32, #tpu.memory_space<smem>>
    %504 = vector.broadcast %503 : f32 to vector<16x16xf32>
    %505 = arith.mulf %504, %502 : vector<16x16xf32>
    %506 = arith.addf %488, %505 : vector<16x16xf32>
    %c29 = arith.constant 29 : index
    %507 = memref.load %arg2[%c29] : memref<256xf32, #tpu.memory_space<smem>>
    %508 = vector.broadcast %507 : f32 to vector<16x16xf32>
    %509 = arith.mulf %508, %502 : vector<16x16xf32>
    %510 = arith.addf %492, %509 : vector<16x16xf32>
    %c45 = arith.constant 45 : index
    %511 = memref.load %arg2[%c45] : memref<256xf32, #tpu.memory_space<smem>>
    %512 = vector.broadcast %511 : f32 to vector<16x16xf32>
    %513 = arith.mulf %512, %502 : vector<16x16xf32>
    %514 = arith.addf %496, %513 : vector<16x16xf32>
    %c61 = arith.constant 61 : index
    %515 = memref.load %arg2[%c61] : memref<256xf32, #tpu.memory_space<smem>>
    %516 = vector.broadcast %515 : f32 to vector<16x16xf32>
    %517 = arith.mulf %516, %502 : vector<16x16xf32>
    %518 = arith.addf %500, %517 : vector<16x16xf32>
    %c140 = arith.constant 140 : index
    %519 = memref.load %arg2[%c140] : memref<256xf32, #tpu.memory_space<smem>>
    %520 = vector.broadcast %519 : f32 to vector<16x16xf32>
    %521 = arith.mulf %520, %502 : vector<16x16xf32>
    %522 = arith.addf %470, %521 : vector<16x16xf32>
    %c156 = arith.constant 156 : index
    %523 = memref.load %arg2[%c156] : memref<256xf32, #tpu.memory_space<smem>>
    %524 = vector.broadcast %523 : f32 to vector<16x16xf32>
    %525 = arith.mulf %524, %502 : vector<16x16xf32>
    %526 = arith.addf %474, %525 : vector<16x16xf32>
    %c172 = arith.constant 172 : index
    %527 = memref.load %arg2[%c172] : memref<256xf32, #tpu.memory_space<smem>>
    %528 = vector.broadcast %527 : f32 to vector<16x16xf32>
    %529 = arith.mulf %528, %502 : vector<16x16xf32>
    %530 = arith.addf %478, %529 : vector<16x16xf32>
    %c188 = arith.constant 188 : index
    %531 = memref.load %arg2[%c188] : memref<256xf32, #tpu.memory_space<smem>>
    %532 = vector.broadcast %531 : f32 to vector<16x16xf32>
    %533 = arith.mulf %532, %502 : vector<16x16xf32>
    %534 = arith.addf %482, %533 : vector<16x16xf32>
    %c3_158 = arith.constant 3 : index
    %c2_159 = arith.constant 2 : index
    %c0_160 = arith.constant 0 : index
    %c0_161 = arith.constant 0 : index
    %535 = vector.load %arg5[%c3_158, %c2_159, %c0_160, %c0_161] : memref<4x3x18x16xf32, #tpu.memory_space<vmem>>, vector<1x1x16x16xf32>
    %536 = vector.shape_cast %535 : vector<1x1x16x16xf32> to vector<16x16xf32>
    %c141 = arith.constant 141 : index
    %537 = memref.load %arg2[%c141] : memref<256xf32, #tpu.memory_space<smem>>
    %538 = vector.broadcast %537 : f32 to vector<16x16xf32>
    %539 = arith.mulf %538, %536 : vector<16x16xf32>
    %540 = arith.addf %522, %539 : vector<16x16xf32>
    %c157 = arith.constant 157 : index
    %541 = memref.load %arg2[%c157] : memref<256xf32, #tpu.memory_space<smem>>
    %542 = vector.broadcast %541 : f32 to vector<16x16xf32>
    %543 = arith.mulf %542, %536 : vector<16x16xf32>
    %544 = arith.addf %526, %543 : vector<16x16xf32>
    %c173 = arith.constant 173 : index
    %545 = memref.load %arg2[%c173] : memref<256xf32, #tpu.memory_space<smem>>
    %546 = vector.broadcast %545 : f32 to vector<16x16xf32>
    %547 = arith.mulf %546, %536 : vector<16x16xf32>
    %548 = arith.addf %530, %547 : vector<16x16xf32>
    %c189 = arith.constant 189 : index
    %549 = memref.load %arg2[%c189] : memref<256xf32, #tpu.memory_space<smem>>
    %550 = vector.broadcast %549 : f32 to vector<16x16xf32>
    %551 = arith.mulf %550, %536 : vector<16x16xf32>
    %552 = arith.addf %534, %551 : vector<16x16xf32>
    %c3_162 = arith.constant 3 : index
    %c0_163 = arith.constant 0 : index
    %c1_164 = arith.constant 1 : index
    %c0_165 = arith.constant 0 : index
    %553 = vector.load %arg5[%c3_162, %c0_163, %c1_164, %c0_165] : memref<4x3x18x16xf32, #tpu.memory_space<vmem>>, vector<1x1x16x16xf32>
    %554 = vector.shape_cast %553 : vector<1x1x16x16xf32> to vector<16x16xf32>
    %c14 = arith.constant 14 : index
    %555 = memref.load %arg2[%c14] : memref<256xf32, #tpu.memory_space<smem>>
    %556 = vector.broadcast %555 : f32 to vector<16x16xf32>
    %557 = arith.mulf %556, %554 : vector<16x16xf32>
    %558 = arith.addf %506, %557 : vector<16x16xf32>
    %c30 = arith.constant 30 : index
    %559 = memref.load %arg2[%c30] : memref<256xf32, #tpu.memory_space<smem>>
    %560 = vector.broadcast %559 : f32 to vector<16x16xf32>
    %561 = arith.mulf %560, %554 : vector<16x16xf32>
    %562 = arith.addf %510, %561 : vector<16x16xf32>
    %c46 = arith.constant 46 : index
    %563 = memref.load %arg2[%c46] : memref<256xf32, #tpu.memory_space<smem>>
    %564 = vector.broadcast %563 : f32 to vector<16x16xf32>
    %565 = arith.mulf %564, %554 : vector<16x16xf32>
    %566 = arith.addf %514, %565 : vector<16x16xf32>
    %c62 = arith.constant 62 : index
    %567 = memref.load %arg2[%c62] : memref<256xf32, #tpu.memory_space<smem>>
    %568 = vector.broadcast %567 : f32 to vector<16x16xf32>
    %569 = arith.mulf %568, %554 : vector<16x16xf32>
    %570 = arith.addf %518, %569 : vector<16x16xf32>
    %c3_166 = arith.constant 3 : index
    %c1_167 = arith.constant 1 : index
    %c1_168 = arith.constant 1 : index
    %c0_169 = arith.constant 0 : index
    %571 = vector.load %arg5[%c3_166, %c1_167, %c1_168, %c0_169] : memref<4x3x18x16xf32, #tpu.memory_space<vmem>>, vector<1x1x16x16xf32>
    %572 = vector.shape_cast %571 : vector<1x1x16x16xf32> to vector<16x16xf32>
    %c15 = arith.constant 15 : index
    %573 = memref.load %arg2[%c15] : memref<256xf32, #tpu.memory_space<smem>>
    %574 = vector.broadcast %573 : f32 to vector<16x16xf32>
    %575 = arith.mulf %574, %572 : vector<16x16xf32>
    %576 = arith.addf %558, %575 : vector<16x16xf32>
    %c31 = arith.constant 31 : index
    %577 = memref.load %arg2[%c31] : memref<256xf32, #tpu.memory_space<smem>>
    %578 = vector.broadcast %577 : f32 to vector<16x16xf32>
    %579 = arith.mulf %578, %572 : vector<16x16xf32>
    %580 = arith.addf %562, %579 : vector<16x16xf32>
    %c47 = arith.constant 47 : index
    %581 = memref.load %arg2[%c47] : memref<256xf32, #tpu.memory_space<smem>>
    %582 = vector.broadcast %581 : f32 to vector<16x16xf32>
    %583 = arith.mulf %582, %572 : vector<16x16xf32>
    %584 = arith.addf %566, %583 : vector<16x16xf32>
    %c63 = arith.constant 63 : index
    %585 = memref.load %arg2[%c63] : memref<256xf32, #tpu.memory_space<smem>>
    %586 = vector.broadcast %585 : f32 to vector<16x16xf32>
    %587 = arith.mulf %586, %572 : vector<16x16xf32>
    %588 = arith.addf %570, %587 : vector<16x16xf32>
    %c142 = arith.constant 142 : index
    %589 = memref.load %arg2[%c142] : memref<256xf32, #tpu.memory_space<smem>>
    %590 = vector.broadcast %589 : f32 to vector<16x16xf32>
    %591 = arith.mulf %590, %572 : vector<16x16xf32>
    %592 = arith.addf %540, %591 : vector<16x16xf32>
    %c158 = arith.constant 158 : index
    %593 = memref.load %arg2[%c158] : memref<256xf32, #tpu.memory_space<smem>>
    %594 = vector.broadcast %593 : f32 to vector<16x16xf32>
    %595 = arith.mulf %594, %572 : vector<16x16xf32>
    %596 = arith.addf %544, %595 : vector<16x16xf32>
    %c174 = arith.constant 174 : index
    %597 = memref.load %arg2[%c174] : memref<256xf32, #tpu.memory_space<smem>>
    %598 = vector.broadcast %597 : f32 to vector<16x16xf32>
    %599 = arith.mulf %598, %572 : vector<16x16xf32>
    %600 = arith.addf %548, %599 : vector<16x16xf32>
    %c190 = arith.constant 190 : index
    %601 = memref.load %arg2[%c190] : memref<256xf32, #tpu.memory_space<smem>>
    %602 = vector.broadcast %601 : f32 to vector<16x16xf32>
    %603 = arith.mulf %602, %572 : vector<16x16xf32>
    %604 = arith.addf %552, %603 : vector<16x16xf32>
    %c3_170 = arith.constant 3 : index
    %c2_171 = arith.constant 2 : index
    %c1_172 = arith.constant 1 : index
    %c0_173 = arith.constant 0 : index
    %605 = vector.load %arg5[%c3_170, %c2_171, %c1_172, %c0_173] : memref<4x3x18x16xf32, #tpu.memory_space<vmem>>, vector<1x1x16x16xf32>
    %606 = vector.shape_cast %605 : vector<1x1x16x16xf32> to vector<16x16xf32>
    %c143 = arith.constant 143 : index
    %607 = memref.load %arg2[%c143] : memref<256xf32, #tpu.memory_space<smem>>
    %608 = vector.broadcast %607 : f32 to vector<16x16xf32>
    %609 = arith.mulf %608, %606 : vector<16x16xf32>
    %610 = arith.addf %592, %609 : vector<16x16xf32>
    %c159 = arith.constant 159 : index
    %611 = memref.load %arg2[%c159] : memref<256xf32, #tpu.memory_space<smem>>
    %612 = vector.broadcast %611 : f32 to vector<16x16xf32>
    %613 = arith.mulf %612, %606 : vector<16x16xf32>
    %614 = arith.addf %596, %613 : vector<16x16xf32>
    %c175 = arith.constant 175 : index
    %615 = memref.load %arg2[%c175] : memref<256xf32, #tpu.memory_space<smem>>
    %616 = vector.broadcast %615 : f32 to vector<16x16xf32>
    %617 = arith.mulf %616, %606 : vector<16x16xf32>
    %618 = arith.addf %600, %617 : vector<16x16xf32>
    %c191 = arith.constant 191 : index
    %619 = memref.load %arg2[%c191] : memref<256xf32, #tpu.memory_space<smem>>
    %620 = vector.broadcast %619 : f32 to vector<16x16xf32>
    %621 = arith.mulf %620, %606 : vector<16x16xf32>
    %622 = arith.addf %604, %621 : vector<16x16xf32>
    %623 = tpu.concatenate %576, %610 in 1 : vector<16x16xf32>, vector<16x16xf32> -> vector<16x32xf32>
    %624 = tpu.concatenate %580, %614 in 1 : vector<16x16xf32>, vector<16x16xf32> -> vector<16x32xf32>
    %625 = tpu.concatenate %584, %618 in 1 : vector<16x16xf32>, vector<16x16xf32> -> vector<16x32xf32>
    %626 = tpu.concatenate %588, %622 in 1 : vector<16x16xf32>, vector<16x16xf32> -> vector<16x32xf32>
    %627 = tpu.concatenate %623, %624, %625, %626 in 1 : vector<16x32xf32>, vector<16x32xf32>, vector<16x32xf32>, vector<16x32xf32> -> vector<16x128xf32>
    %628 = vector.broadcast %54 : vector<1x128xf32> to vector<16x128xf32>
    %629 = arith.addf %627, %628 : vector<16x128xf32>
    %c0_174 = arith.constant 0 : index
    %c0_175 = arith.constant 0 : index
    %c0_176 = arith.constant 0 : index
    %c0_177 = arith.constant 0 : index
    %630 = vector.load %arg4[%c0_174, %c0_175, %c0_176, %c0_177] : memref<1x2x16x128xf32, #tpu.memory_space<vmem>>, vector<1x1x16x128xf32>
    %631 = vector.shape_cast %630 : vector<1x1x16x128xf32> to vector<16x128xf32>
    %632 = vector.shape_cast %629 : vector<16x128xf32> to vector<1x1x16x128xf32>
    tpu.vector_store %arg4[%c0_174, %c0_175, %c0_176, %c0_177], %632 {strides = array<i32>} : memref<1x2x16x128xf32, #tpu.memory_space<vmem>>, vector<1x1x16x128xf32>,
    %cst_178 = arith.constant 0.000000e+00 : f32
    %633 = vector.broadcast %cst_178 : f32 to vector<16x16xf32>
    %cst_179 = arith.constant 0.000000e+00 : f32
    %634 = vector.broadcast %cst_179 : f32 to vector<16x16xf32>
    %cst_180 = arith.constant 0.000000e+00 : f32
    %635 = vector.broadcast %cst_180 : f32 to vector<16x16xf32>
    %cst_181 = arith.constant 0.000000e+00 : f32
    %636 = vector.broadcast %cst_181 : f32 to vector<16x16xf32>
    %cst_182 = arith.constant 0.000000e+00 : f32
    %637 = vector.broadcast %cst_182 : f32 to vector<16x16xf32>
    %cst_183 = arith.constant 0.000000e+00 : f32
    %638 = vector.broadcast %cst_183 : f32 to vector<16x16xf32>
    %cst_184 = arith.constant 0.000000e+00 : f32
    %639 = vector.broadcast %cst_184 : f32 to vector<16x16xf32>
    %cst_185 = arith.constant 0.000000e+00 : f32
    %640 = vector.broadcast %cst_185 : f32 to vector<16x16xf32>
    %c0_186 = arith.constant 0 : index
    %c0_187 = arith.constant 0 : index
    %c1_188 = arith.constant 1 : index
    %c0_189 = arith.constant 0 : index
    %641 = vector.load %arg5[%c0_186, %c0_187, %c1_188, %c0_189] : memref<4x3x18x16xf32, #tpu.memory_space<vmem>>, vector<1x1x16x16xf32>
    %642 = vector.shape_cast %641 : vector<1x1x16x16xf32> to vector<16x16xf32>
    %c64 = arith.constant 64 : index
    %643 = memref.load %arg2[%c64] : memref<256xf32, #tpu.memory_space<smem>>
    %644 = vector.broadcast %643 : f32 to vector<16x16xf32>
    %645 = arith.mulf %644, %642 : vector<16x16xf32>
    %646 = arith.addf %633, %645 : vector<16x16xf32>
    %c80 = arith.constant 80 : index
    %647 = memref.load %arg2[%c80] : memref<256xf32, #tpu.memory_space<smem>>
    %648 = vector.broadcast %647 : f32 to vector<16x16xf32>
    %649 = arith.mulf %648, %642 : vector<16x16xf32>
    %650 = arith.addf %634, %649 : vector<16x16xf32>
    %c96 = arith.constant 96 : index
    %651 = memref.load %arg2[%c96] : memref<256xf32, #tpu.memory_space<smem>>
    %652 = vector.broadcast %651 : f32 to vector<16x16xf32>
    %653 = arith.mulf %652, %642 : vector<16x16xf32>
    %654 = arith.addf %635, %653 : vector<16x16xf32>
    %c112 = arith.constant 112 : index
    %655 = memref.load %arg2[%c112] : memref<256xf32, #tpu.memory_space<smem>>
    %656 = vector.broadcast %655 : f32 to vector<16x16xf32>
    %657 = arith.mulf %656, %642 : vector<16x16xf32>
    %658 = arith.addf %636, %657 : vector<16x16xf32>
    %c0_190 = arith.constant 0 : index
    %c1_191 = arith.constant 1 : index
    %c1_192 = arith.constant 1 : index
    %c0_193 = arith.constant 0 : index
    %659 = vector.load %arg5[%c0_190, %c1_191, %c1_192, %c0_193] : memref<4x3x18x16xf32, #tpu.memory_space<vmem>>, vector<1x1x16x16xf32>
    %660 = vector.shape_cast %659 : vector<1x1x16x16xf32> to vector<16x16xf32>
    %c65 = arith.constant 65 : index
    %661 = memref.load %arg2[%c65] : memref<256xf32, #tpu.memory_space<smem>>
    %662 = vector.broadcast %661 : f32 to vector<16x16xf32>
    %663 = arith.mulf %662, %660 : vector<16x16xf32>
    %664 = arith.addf %646, %663 : vector<16x16xf32>
    %c81 = arith.constant 81 : index
    %665 = memref.load %arg2[%c81] : memref<256xf32, #tpu.memory_space<smem>>
    %666 = vector.broadcast %665 : f32 to vector<16x16xf32>
    %667 = arith.mulf %666, %660 : vector<16x16xf32>
    %668 = arith.addf %650, %667 : vector<16x16xf32>
    %c97 = arith.constant 97 : index
    %669 = memref.load %arg2[%c97] : memref<256xf32, #tpu.memory_space<smem>>
    %670 = vector.broadcast %669 : f32 to vector<16x16xf32>
    %671 = arith.mulf %670, %660 : vector<16x16xf32>
    %672 = arith.addf %654, %671 : vector<16x16xf32>
    %c113 = arith.constant 113 : index
    %673 = memref.load %arg2[%c113] : memref<256xf32, #tpu.memory_space<smem>>
    %674 = vector.broadcast %673 : f32 to vector<16x16xf32>
    %675 = arith.mulf %674, %660 : vector<16x16xf32>
    %676 = arith.addf %658, %675 : vector<16x16xf32>
    %c192 = arith.constant 192 : index
    %677 = memref.load %arg2[%c192] : memref<256xf32, #tpu.memory_space<smem>>
    %678 = vector.broadcast %677 : f32 to vector<16x16xf32>
    %679 = arith.mulf %678, %660 : vector<16x16xf32>
    %680 = arith.addf %637, %679 : vector<16x16xf32>
    %c208 = arith.constant 208 : index
    %681 = memref.load %arg2[%c208] : memref<256xf32, #tpu.memory_space<smem>>
    %682 = vector.broadcast %681 : f32 to vector<16x16xf32>
    %683 = arith.mulf %682, %660 : vector<16x16xf32>
    %684 = arith.addf %638, %683 : vector<16x16xf32>
    %c224 = arith.constant 224 : index
    %685 = memref.load %arg2[%c224] : memref<256xf32, #tpu.memory_space<smem>>
    %686 = vector.broadcast %685 : f32 to vector<16x16xf32>
    %687 = arith.mulf %686, %660 : vector<16x16xf32>
    %688 = arith.addf %639, %687 : vector<16x16xf32>
    %c240 = arith.constant 240 : index
    %689 = memref.load %arg2[%c240] : memref<256xf32, #tpu.memory_space<smem>>
    %690 = vector.broadcast %689 : f32 to vector<16x16xf32>
    %691 = arith.mulf %690, %660 : vector<16x16xf32>
    %692 = arith.addf %640, %691 : vector<16x16xf32>
    %c0_194 = arith.constant 0 : index
    %c2_195 = arith.constant 2 : index
    %c1_196 = arith.constant 1 : index
    %c0_197 = arith.constant 0 : index
    %693 = vector.load %arg5[%c0_194, %c2_195, %c1_196, %c0_197] : memref<4x3x18x16xf32, #tpu.memory_space<vmem>>, vector<1x1x16x16xf32>
    %694 = vector.shape_cast %693 : vector<1x1x16x16xf32> to vector<16x16xf32>
    %c193 = arith.constant 193 : index
    %695 = memref.load %arg2[%c193] : memref<256xf32, #tpu.memory_space<smem>>
    %696 = vector.broadcast %695 : f32 to vector<16x16xf32>
    %697 = arith.mulf %696, %694 : vector<16x16xf32>
    %698 = arith.addf %680, %697 : vector<16x16xf32>
    %c209 = arith.constant 209 : index
    %699 = memref.load %arg2[%c209] : memref<256xf32, #tpu.memory_space<smem>>
    %700 = vector.broadcast %699 : f32 to vector<16x16xf32>
    %701 = arith.mulf %700, %694 : vector<16x16xf32>
    %702 = arith.addf %684, %701 : vector<16x16xf32>
    %c225 = arith.constant 225 : index
    %703 = memref.load %arg2[%c225] : memref<256xf32, #tpu.memory_space<smem>>
    %704 = vector.broadcast %703 : f32 to vector<16x16xf32>
    %705 = arith.mulf %704, %694 : vector<16x16xf32>
    %706 = arith.addf %688, %705 : vector<16x16xf32>
    %c241 = arith.constant 241 : index
    %707 = memref.load %arg2[%c241] : memref<256xf32, #tpu.memory_space<smem>>
    %708 = vector.broadcast %707 : f32 to vector<16x16xf32>
    %709 = arith.mulf %708, %694 : vector<16x16xf32>
    %710 = arith.addf %692, %709 : vector<16x16xf32>
    %c0_198 = arith.constant 0 : index
    %c0_199 = arith.constant 0 : index
    %c2_200 = arith.constant 2 : index
    %c0_201 = arith.constant 0 : index
    %711 = vector.load %arg5[%c0_198, %c0_199, %c2_200, %c0_201] : memref<4x3x18x16xf32, #tpu.memory_space<vmem>>, vector<1x1x16x16xf32>
    %712 = vector.shape_cast %711 : vector<1x1x16x16xf32> to vector<16x16xf32>
    %c66 = arith.constant 66 : index
    %713 = memref.load %arg2[%c66] : memref<256xf32, #tpu.memory_space<smem>>
    %714 = vector.broadcast %713 : f32 to vector<16x16xf32>
    %715 = arith.mulf %714, %712 : vector<16x16xf32>
    %716 = arith.addf %664, %715 : vector<16x16xf32>
    %c82 = arith.constant 82 : index
    %717 = memref.load %arg2[%c82] : memref<256xf32, #tpu.memory_space<smem>>
    %718 = vector.broadcast %717 : f32 to vector<16x16xf32>
    %719 = arith.mulf %718, %712 : vector<16x16xf32>
    %720 = arith.addf %668, %719 : vector<16x16xf32>
    %c98 = arith.constant 98 : index
    %721 = memref.load %arg2[%c98] : memref<256xf32, #tpu.memory_space<smem>>
    %722 = vector.broadcast %721 : f32 to vector<16x16xf32>
    %723 = arith.mulf %722, %712 : vector<16x16xf32>
    %724 = arith.addf %672, %723 : vector<16x16xf32>
    %c114 = arith.constant 114 : index
    %725 = memref.load %arg2[%c114] : memref<256xf32, #tpu.memory_space<smem>>
    %726 = vector.broadcast %725 : f32 to vector<16x16xf32>
    %727 = arith.mulf %726, %712 : vector<16x16xf32>
    %728 = arith.addf %676, %727 : vector<16x16xf32>
    %c0_202 = arith.constant 0 : index
    %c1_203 = arith.constant 1 : index
    %c2_204 = arith.constant 2 : index
    %c0_205 = arith.constant 0 : index
    %729 = vector.load %arg5[%c0_202, %c1_203, %c2_204, %c0_205] : memref<4x3x18x16xf32, #tpu.memory_space<vmem>>, vector<1x1x16x16xf32>
    %730 = vector.shape_cast %729 : vector<1x1x16x16xf32> to vector<16x16xf32>
    %c67 = arith.constant 67 : index
    %731 = memref.load %arg2[%c67] : memref<256xf32, #tpu.memory_space<smem>>
    %732 = vector.broadcast %731 : f32 to vector<16x16xf32>
    %733 = arith.mulf %732, %730 : vector<16x16xf32>
    %734 = arith.addf %716, %733 : vector<16x16xf32>
    %c83 = arith.constant 83 : index
    %735 = memref.load %arg2[%c83] : memref<256xf32, #tpu.memory_space<smem>>
    %736 = vector.broadcast %735 : f32 to vector<16x16xf32>
    %737 = arith.mulf %736, %730 : vector<16x16xf32>
    %738 = arith.addf %720, %737 : vector<16x16xf32>
    %c99 = arith.constant 99 : index
    %739 = memref.load %arg2[%c99] : memref<256xf32, #tpu.memory_space<smem>>
    %740 = vector.broadcast %739 : f32 to vector<16x16xf32>
    %741 = arith.mulf %740, %730 : vector<16x16xf32>
    %742 = arith.addf %724, %741 : vector<16x16xf32>
    %c115 = arith.constant 115 : index
    %743 = memref.load %arg2[%c115] : memref<256xf32, #tpu.memory_space<smem>>
    %744 = vector.broadcast %743 : f32 to vector<16x16xf32>
    %745 = arith.mulf %744, %730 : vector<16x16xf32>
    %746 = arith.addf %728, %745 : vector<16x16xf32>
    %c194 = arith.constant 194 : index
    %747 = memref.load %arg2[%c194] : memref<256xf32, #tpu.memory_space<smem>>
    %748 = vector.broadcast %747 : f32 to vector<16x16xf32>
    %749 = arith.mulf %748, %730 : vector<16x16xf32>
    %750 = arith.addf %698, %749 : vector<16x16xf32>
    %c210 = arith.constant 210 : index
    %751 = memref.load %arg2[%c210] : memref<256xf32, #tpu.memory_space<smem>>
    %752 = vector.broadcast %751 : f32 to vector<16x16xf32>
    %753 = arith.mulf %752, %730 : vector<16x16xf32>
    %754 = arith.addf %702, %753 : vector<16x16xf32>
    %c226 = arith.constant 226 : index
    %755 = memref.load %arg2[%c226] : memref<256xf32, #tpu.memory_space<smem>>
    %756 = vector.broadcast %755 : f32 to vector<16x16xf32>
    %757 = arith.mulf %756, %730 : vector<16x16xf32>
    %758 = arith.addf %706, %757 : vector<16x16xf32>
    %c242 = arith.constant 242 : index
    %759 = memref.load %arg2[%c242] : memref<256xf32, #tpu.memory_space<smem>>
    %760 = vector.broadcast %759 : f32 to vector<16x16xf32>
    %761 = arith.mulf %760, %730 : vector<16x16xf32>
    %762 = arith.addf %710, %761 : vector<16x16xf32>
    %c0_206 = arith.constant 0 : index
    %c2_207 = arith.constant 2 : index
    %c2_208 = arith.constant 2 : index
    %c0_209 = arith.constant 0 : index
    %763 = vector.load %arg5[%c0_206, %c2_207, %c2_208, %c0_209] : memref<4x3x18x16xf32, #tpu.memory_space<vmem>>, vector<1x1x16x16xf32>
    %764 = vector.shape_cast %763 : vector<1x1x16x16xf32> to vector<16x16xf32>
    %c195 = arith.constant 195 : index
    %765 = memref.load %arg2[%c195] : memref<256xf32, #tpu.memory_space<smem>>
    %766 = vector.broadcast %765 : f32 to vector<16x16xf32>
    %767 = arith.mulf %766, %764 : vector<16x16xf32>
    %768 = arith.addf %750, %767 : vector<16x16xf32>
    %c211 = arith.constant 211 : index
    %769 = memref.load %arg2[%c211] : memref<256xf32, #tpu.memory_space<smem>>
    %770 = vector.broadcast %769 : f32 to vector<16x16xf32>
    %771 = arith.mulf %770, %764 : vector<16x16xf32>
    %772 = arith.addf %754, %771 : vector<16x16xf32>
    %c227 = arith.constant 227 : index
    %773 = memref.load %arg2[%c227] : memref<256xf32, #tpu.memory_space<smem>>
    %774 = vector.broadcast %773 : f32 to vector<16x16xf32>
    %775 = arith.mulf %774, %764 : vector<16x16xf32>
    %776 = arith.addf %758, %775 : vector<16x16xf32>
    %c243 = arith.constant 243 : index
    %777 = memref.load %arg2[%c243] : memref<256xf32, #tpu.memory_space<smem>>
    %778 = vector.broadcast %777 : f32 to vector<16x16xf32>
    %779 = arith.mulf %778, %764 : vector<16x16xf32>
    %780 = arith.addf %762, %779 : vector<16x16xf32>
    %c1_210 = arith.constant 1 : index
    %c0_211 = arith.constant 0 : index
    %c1_212 = arith.constant 1 : index
    %c0_213 = arith.constant 0 : index
    %781 = vector.load %arg5[%c1_210, %c0_211, %c1_212, %c0_213] : memref<4x3x18x16xf32, #tpu.memory_space<vmem>>, vector<1x1x16x16xf32>
    %782 = vector.shape_cast %781 : vector<1x1x16x16xf32> to vector<16x16xf32>
    %c68 = arith.constant 68 : index
    %783 = memref.load %arg2[%c68] : memref<256xf32, #tpu.memory_space<smem>>
    %784 = vector.broadcast %783 : f32 to vector<16x16xf32>
    %785 = arith.mulf %784, %782 : vector<16x16xf32>
    %786 = arith.addf %734, %785 : vector<16x16xf32>
    %c84 = arith.constant 84 : index
    %787 = memref.load %arg2[%c84] : memref<256xf32, #tpu.memory_space<smem>>
    %788 = vector.broadcast %787 : f32 to vector<16x16xf32>
    %789 = arith.mulf %788, %782 : vector<16x16xf32>
    %790 = arith.addf %738, %789 : vector<16x16xf32>
    %c100 = arith.constant 100 : index
    %791 = memref.load %arg2[%c100] : memref<256xf32, #tpu.memory_space<smem>>
    %792 = vector.broadcast %791 : f32 to vector<16x16xf32>
    %793 = arith.mulf %792, %782 : vector<16x16xf32>
    %794 = arith.addf %742, %793 : vector<16x16xf32>
    %c116 = arith.constant 116 : index
    %795 = memref.load %arg2[%c116] : memref<256xf32, #tpu.memory_space<smem>>
    %796 = vector.broadcast %795 : f32 to vector<16x16xf32>
    %797 = arith.mulf %796, %782 : vector<16x16xf32>
    %798 = arith.addf %746, %797 : vector<16x16xf32>
    %c1_214 = arith.constant 1 : index
    %c1_215 = arith.constant 1 : index
    %c1_216 = arith.constant 1 : index
    %c0_217 = arith.constant 0 : index
    %799 = vector.load %arg5[%c1_214, %c1_215, %c1_216, %c0_217] : memref<4x3x18x16xf32, #tpu.memory_space<vmem>>, vector<1x1x16x16xf32>
    %800 = vector.shape_cast %799 : vector<1x1x16x16xf32> to vector<16x16xf32>
    %c69 = arith.constant 69 : index
    %801 = memref.load %arg2[%c69] : memref<256xf32, #tpu.memory_space<smem>>
    %802 = vector.broadcast %801 : f32 to vector<16x16xf32>
    %803 = arith.mulf %802, %800 : vector<16x16xf32>
    %804 = arith.addf %786, %803 : vector<16x16xf32>
    %c85 = arith.constant 85 : index
    %805 = memref.load %arg2[%c85] : memref<256xf32, #tpu.memory_space<smem>>
    %806 = vector.broadcast %805 : f32 to vector<16x16xf32>
    %807 = arith.mulf %806, %800 : vector<16x16xf32>
    %808 = arith.addf %790, %807 : vector<16x16xf32>
    %c101 = arith.constant 101 : index
    %809 = memref.load %arg2[%c101] : memref<256xf32, #tpu.memory_space<smem>>
    %810 = vector.broadcast %809 : f32 to vector<16x16xf32>
    %811 = arith.mulf %810, %800 : vector<16x16xf32>
    %812 = arith.addf %794, %811 : vector<16x16xf32>
    %c117 = arith.constant 117 : index
    %813 = memref.load %arg2[%c117] : memref<256xf32, #tpu.memory_space<smem>>
    %814 = vector.broadcast %813 : f32 to vector<16x16xf32>
    %815 = arith.mulf %814, %800 : vector<16x16xf32>
    %816 = arith.addf %798, %815 : vector<16x16xf32>
    %c196 = arith.constant 196 : index
    %817 = memref.load %arg2[%c196] : memref<256xf32, #tpu.memory_space<smem>>
    %818 = vector.broadcast %817 : f32 to vector<16x16xf32>
    %819 = arith.mulf %818, %800 : vector<16x16xf32>
    %820 = arith.addf %768, %819 : vector<16x16xf32>
    %c212 = arith.constant 212 : index
    %821 = memref.load %arg2[%c212] : memref<256xf32, #tpu.memory_space<smem>>
    %822 = vector.broadcast %821 : f32 to vector<16x16xf32>
    %823 = arith.mulf %822, %800 : vector<16x16xf32>
    %824 = arith.addf %772, %823 : vector<16x16xf32>
    %c228 = arith.constant 228 : index
    %825 = memref.load %arg2[%c228] : memref<256xf32, #tpu.memory_space<smem>>
    %826 = vector.broadcast %825 : f32 to vector<16x16xf32>
    %827 = arith.mulf %826, %800 : vector<16x16xf32>
    %828 = arith.addf %776, %827 : vector<16x16xf32>
    %c244 = arith.constant 244 : index
    %829 = memref.load %arg2[%c244] : memref<256xf32, #tpu.memory_space<smem>>
    %830 = vector.broadcast %829 : f32 to vector<16x16xf32>
    %831 = arith.mulf %830, %800 : vector<16x16xf32>
    %832 = arith.addf %780, %831 : vector<16x16xf32>
    %c1_218 = arith.constant 1 : index
    %c2_219 = arith.constant 2 : index
    %c1_220 = arith.constant 1 : index
    %c0_221 = arith.constant 0 : index
    %833 = vector.load %arg5[%c1_218, %c2_219, %c1_220, %c0_221] : memref<4x3x18x16xf32, #tpu.memory_space<vmem>>, vector<1x1x16x16xf32>
    %834 = vector.shape_cast %833 : vector<1x1x16x16xf32> to vector<16x16xf32>
    %c197 = arith.constant 197 : index
    %835 = memref.load %arg2[%c197] : memref<256xf32, #tpu.memory_space<smem>>
    %836 = vector.broadcast %835 : f32 to vector<16x16xf32>
    %837 = arith.mulf %836, %834 : vector<16x16xf32>
    %838 = arith.addf %820, %837 : vector<16x16xf32>
    %c213 = arith.constant 213 : index
    %839 = memref.load %arg2[%c213] : memref<256xf32, #tpu.memory_space<smem>>
    %840 = vector.broadcast %839 : f32 to vector<16x16xf32>
    %841 = arith.mulf %840, %834 : vector<16x16xf32>
    %842 = arith.addf %824, %841 : vector<16x16xf32>
    %c229 = arith.constant 229 : index
    %843 = memref.load %arg2[%c229] : memref<256xf32, #tpu.memory_space<smem>>
    %844 = vector.broadcast %843 : f32 to vector<16x16xf32>
    %845 = arith.mulf %844, %834 : vector<16x16xf32>
    %846 = arith.addf %828, %845 : vector<16x16xf32>
    %c245 = arith.constant 245 : index
    %847 = memref.load %arg2[%c245] : memref<256xf32, #tpu.memory_space<smem>>
    %848 = vector.broadcast %847 : f32 to vector<16x16xf32>
    %849 = arith.mulf %848, %834 : vector<16x16xf32>
    %850 = arith.addf %832, %849 : vector<16x16xf32>
    %c1_222 = arith.constant 1 : index
    %c0_223 = arith.constant 0 : index
    %c2_224 = arith.constant 2 : index
    %c0_225 = arith.constant 0 : index
    %851 = vector.load %arg5[%c1_222, %c0_223, %c2_224, %c0_225] : memref<4x3x18x16xf32, #tpu.memory_space<vmem>>, vector<1x1x16x16xf32>
    %852 = vector.shape_cast %851 : vector<1x1x16x16xf32> to vector<16x16xf32>
    %c70 = arith.constant 70 : index
    %853 = memref.load %arg2[%c70] : memref<256xf32, #tpu.memory_space<smem>>
    %854 = vector.broadcast %853 : f32 to vector<16x16xf32>
    %855 = arith.mulf %854, %852 : vector<16x16xf32>
    %856 = arith.addf %804, %855 : vector<16x16xf32>
    %c86 = arith.constant 86 : index
    %857 = memref.load %arg2[%c86] : memref<256xf32, #tpu.memory_space<smem>>
    %858 = vector.broadcast %857 : f32 to vector<16x16xf32>
    %859 = arith.mulf %858, %852 : vector<16x16xf32>
    %860 = arith.addf %808, %859 : vector<16x16xf32>
    %c102 = arith.constant 102 : index
    %861 = memref.load %arg2[%c102] : memref<256xf32, #tpu.memory_space<smem>>
    %862 = vector.broadcast %861 : f32 to vector<16x16xf32>
    %863 = arith.mulf %862, %852 : vector<16x16xf32>
    %864 = arith.addf %812, %863 : vector<16x16xf32>
    %c118 = arith.constant 118 : index
    %865 = memref.load %arg2[%c118] : memref<256xf32, #tpu.memory_space<smem>>
    %866 = vector.broadcast %865 : f32 to vector<16x16xf32>
    %867 = arith.mulf %866, %852 : vector<16x16xf32>
    %868 = arith.addf %816, %867 : vector<16x16xf32>
    %c1_226 = arith.constant 1 : index
    %c1_227 = arith.constant 1 : index
    %c2_228 = arith.constant 2 : index
    %c0_229 = arith.constant 0 : index
    %869 = vector.load %arg5[%c1_226, %c1_227, %c2_228, %c0_229] : memref<4x3x18x16xf32, #tpu.memory_space<vmem>>, vector<1x1x16x16xf32>
    %870 = vector.shape_cast %869 : vector<1x1x16x16xf32> to vector<16x16xf32>
    %c71 = arith.constant 71 : index
    %871 = memref.load %arg2[%c71] : memref<256xf32, #tpu.memory_space<smem>>
    %872 = vector.broadcast %871 : f32 to vector<16x16xf32>
    %873 = arith.mulf %872, %870 : vector<16x16xf32>
    %874 = arith.addf %856, %873 : vector<16x16xf32>
    %c87 = arith.constant 87 : index
    %875 = memref.load %arg2[%c87] : memref<256xf32, #tpu.memory_space<smem>>
    %876 = vector.broadcast %875 : f32 to vector<16x16xf32>
    %877 = arith.mulf %876, %870 : vector<16x16xf32>
    %878 = arith.addf %860, %877 : vector<16x16xf32>
    %c103 = arith.constant 103 : index
    %879 = memref.load %arg2[%c103] : memref<256xf32, #tpu.memory_space<smem>>
    %880 = vector.broadcast %879 : f32 to vector<16x16xf32>
    %881 = arith.mulf %880, %870 : vector<16x16xf32>
    %882 = arith.addf %864, %881 : vector<16x16xf32>
    %c119 = arith.constant 119 : index
    %883 = memref.load %arg2[%c119] : memref<256xf32, #tpu.memory_space<smem>>
    %884 = vector.broadcast %883 : f32 to vector<16x16xf32>
    %885 = arith.mulf %884, %870 : vector<16x16xf32>
    %886 = arith.addf %868, %885 : vector<16x16xf32>
    %c198 = arith.constant 198 : index
    %887 = memref.load %arg2[%c198] : memref<256xf32, #tpu.memory_space<smem>>
    %888 = vector.broadcast %887 : f32 to vector<16x16xf32>
    %889 = arith.mulf %888, %870 : vector<16x16xf32>
    %890 = arith.addf %838, %889 : vector<16x16xf32>
    %c214 = arith.constant 214 : index
    %891 = memref.load %arg2[%c214] : memref<256xf32, #tpu.memory_space<smem>>
    %892 = vector.broadcast %891 : f32 to vector<16x16xf32>
    %893 = arith.mulf %892, %870 : vector<16x16xf32>
    %894 = arith.addf %842, %893 : vector<16x16xf32>
    %c230 = arith.constant 230 : index
    %895 = memref.load %arg2[%c230] : memref<256xf32, #tpu.memory_space<smem>>
    %896 = vector.broadcast %895 : f32 to vector<16x16xf32>
    %897 = arith.mulf %896, %870 : vector<16x16xf32>
    %898 = arith.addf %846, %897 : vector<16x16xf32>
    %c246 = arith.constant 246 : index
    %899 = memref.load %arg2[%c246] : memref<256xf32, #tpu.memory_space<smem>>
    %900 = vector.broadcast %899 : f32 to vector<16x16xf32>
    %901 = arith.mulf %900, %870 : vector<16x16xf32>
    %902 = arith.addf %850, %901 : vector<16x16xf32>
    %c1_230 = arith.constant 1 : index
    %c2_231 = arith.constant 2 : index
    %c2_232 = arith.constant 2 : index
    %c0_233 = arith.constant 0 : index
    %903 = vector.load %arg5[%c1_230, %c2_231, %c2_232, %c0_233] : memref<4x3x18x16xf32, #tpu.memory_space<vmem>>, vector<1x1x16x16xf32>
    %904 = vector.shape_cast %903 : vector<1x1x16x16xf32> to vector<16x16xf32>
    %c199 = arith.constant 199 : index
    %905 = memref.load %arg2[%c199] : memref<256xf32, #tpu.memory_space<smem>>
    %906 = vector.broadcast %905 : f32 to vector<16x16xf32>
    %907 = arith.mulf %906, %904 : vector<16x16xf32>
    %908 = arith.addf %890, %907 : vector<16x16xf32>
    %c215 = arith.constant 215 : index
    %909 = memref.load %arg2[%c215] : memref<256xf32, #tpu.memory_space<smem>>
    %910 = vector.broadcast %909 : f32 to vector<16x16xf32>
    %911 = arith.mulf %910, %904 : vector<16x16xf32>
    %912 = arith.addf %894, %911 : vector<16x16xf32>
    %c231 = arith.constant 231 : index
    %913 = memref.load %arg2[%c231] : memref<256xf32, #tpu.memory_space<smem>>
    %914 = vector.broadcast %913 : f32 to vector<16x16xf32>
    %915 = arith.mulf %914, %904 : vector<16x16xf32>
    %916 = arith.addf %898, %915 : vector<16x16xf32>
    %c247 = arith.constant 247 : index
    %917 = memref.load %arg2[%c247] : memref<256xf32, #tpu.memory_space<smem>>
    %918 = vector.broadcast %917 : f32 to vector<16x16xf32>
    %919 = arith.mulf %918, %904 : vector<16x16xf32>
    %920 = arith.addf %902, %919 : vector<16x16xf32>
    %c2_234 = arith.constant 2 : index
    %c0_235 = arith.constant 0 : index
    %c1_236 = arith.constant 1 : index
    %c0_237 = arith.constant 0 : index
    %921 = vector.load %arg5[%c2_234, %c0_235, %c1_236, %c0_237] : memref<4x3x18x16xf32, #tpu.memory_space<vmem>>, vector<1x1x16x16xf32>
    %922 = vector.shape_cast %921 : vector<1x1x16x16xf32> to vector<16x16xf32>
    %c72 = arith.constant 72 : index
    %923 = memref.load %arg2[%c72] : memref<256xf32, #tpu.memory_space<smem>>
    %924 = vector.broadcast %923 : f32 to vector<16x16xf32>
    %925 = arith.mulf %924, %922 : vector<16x16xf32>
    %926 = arith.addf %874, %925 : vector<16x16xf32>
    %c88 = arith.constant 88 : index
    %927 = memref.load %arg2[%c88] : memref<256xf32, #tpu.memory_space<smem>>
    %928 = vector.broadcast %927 : f32 to vector<16x16xf32>
    %929 = arith.mulf %928, %922 : vector<16x16xf32>
    %930 = arith.addf %878, %929 : vector<16x16xf32>
    %c104 = arith.constant 104 : index
    %931 = memref.load %arg2[%c104] : memref<256xf32, #tpu.memory_space<smem>>
    %932 = vector.broadcast %931 : f32 to vector<16x16xf32>
    %933 = arith.mulf %932, %922 : vector<16x16xf32>
    %934 = arith.addf %882, %933 : vector<16x16xf32>
    %c120 = arith.constant 120 : index
    %935 = memref.load %arg2[%c120] : memref<256xf32, #tpu.memory_space<smem>>
    %936 = vector.broadcast %935 : f32 to vector<16x16xf32>
    %937 = arith.mulf %936, %922 : vector<16x16xf32>
    %938 = arith.addf %886, %937 : vector<16x16xf32>
    %c2_238 = arith.constant 2 : index
    %c1_239 = arith.constant 1 : index
    %c1_240 = arith.constant 1 : index
    %c0_241 = arith.constant 0 : index
    %939 = vector.load %arg5[%c2_238, %c1_239, %c1_240, %c0_241] : memref<4x3x18x16xf32, #tpu.memory_space<vmem>>, vector<1x1x16x16xf32>
    %940 = vector.shape_cast %939 : vector<1x1x16x16xf32> to vector<16x16xf32>
    %c73 = arith.constant 73 : index
    %941 = memref.load %arg2[%c73] : memref<256xf32, #tpu.memory_space<smem>>
    %942 = vector.broadcast %941 : f32 to vector<16x16xf32>
    %943 = arith.mulf %942, %940 : vector<16x16xf32>
    %944 = arith.addf %926, %943 : vector<16x16xf32>
    %c89 = arith.constant 89 : index
    %945 = memref.load %arg2[%c89] : memref<256xf32, #tpu.memory_space<smem>>
    %946 = vector.broadcast %945 : f32 to vector<16x16xf32>
    %947 = arith.mulf %946, %940 : vector<16x16xf32>
    %948 = arith.addf %930, %947 : vector<16x16xf32>
    %c105 = arith.constant 105 : index
    %949 = memref.load %arg2[%c105] : memref<256xf32, #tpu.memory_space<smem>>
    %950 = vector.broadcast %949 : f32 to vector<16x16xf32>
    %951 = arith.mulf %950, %940 : vector<16x16xf32>
    %952 = arith.addf %934, %951 : vector<16x16xf32>
    %c121 = arith.constant 121 : index
    %953 = memref.load %arg2[%c121] : memref<256xf32, #tpu.memory_space<smem>>
    %954 = vector.broadcast %953 : f32 to vector<16x16xf32>
    %955 = arith.mulf %954, %940 : vector<16x16xf32>
    %956 = arith.addf %938, %955 : vector<16x16xf32>
    %c200 = arith.constant 200 : index
    %957 = memref.load %arg2[%c200] : memref<256xf32, #tpu.memory_space<smem>>
    %958 = vector.broadcast %957 : f32 to vector<16x16xf32>
    %959 = arith.mulf %958, %940 : vector<16x16xf32>
    %960 = arith.addf %908, %959 : vector<16x16xf32>
    %c216 = arith.constant 216 : index
    %961 = memref.load %arg2[%c216] : memref<256xf32, #tpu.memory_space<smem>>
    %962 = vector.broadcast %961 : f32 to vector<16x16xf32>
    %963 = arith.mulf %962, %940 : vector<16x16xf32>
    %964 = arith.addf %912, %963 : vector<16x16xf32>
    %c232 = arith.constant 232 : index
    %965 = memref.load %arg2[%c232] : memref<256xf32, #tpu.memory_space<smem>>
    %966 = vector.broadcast %965 : f32 to vector<16x16xf32>
    %967 = arith.mulf %966, %940 : vector<16x16xf32>
    %968 = arith.addf %916, %967 : vector<16x16xf32>
    %c248 = arith.constant 248 : index
    %969 = memref.load %arg2[%c248] : memref<256xf32, #tpu.memory_space<smem>>
    %970 = vector.broadcast %969 : f32 to vector<16x16xf32>
    %971 = arith.mulf %970, %940 : vector<16x16xf32>
    %972 = arith.addf %920, %971 : vector<16x16xf32>
    %c2_242 = arith.constant 2 : index
    %c2_243 = arith.constant 2 : index
    %c1_244 = arith.constant 1 : index
    %c0_245 = arith.constant 0 : index
    %973 = vector.load %arg5[%c2_242, %c2_243, %c1_244, %c0_245] : memref<4x3x18x16xf32, #tpu.memory_space<vmem>>, vector<1x1x16x16xf32>
    %974 = vector.shape_cast %973 : vector<1x1x16x16xf32> to vector<16x16xf32>
    %c201 = arith.constant 201 : index
    %975 = memref.load %arg2[%c201] : memref<256xf32, #tpu.memory_space<smem>>
    %976 = vector.broadcast %975 : f32 to vector<16x16xf32>
    %977 = arith.mulf %976, %974 : vector<16x16xf32>
    %978 = arith.addf %960, %977 : vector<16x16xf32>
    %c217 = arith.constant 217 : index
    %979 = memref.load %arg2[%c217] : memref<256xf32, #tpu.memory_space<smem>>
    %980 = vector.broadcast %979 : f32 to vector<16x16xf32>
    %981 = arith.mulf %980, %974 : vector<16x16xf32>
    %982 = arith.addf %964, %981 : vector<16x16xf32>
    %c233 = arith.constant 233 : index
    %983 = memref.load %arg2[%c233] : memref<256xf32, #tpu.memory_space<smem>>
    %984 = vector.broadcast %983 : f32 to vector<16x16xf32>
    %985 = arith.mulf %984, %974 : vector<16x16xf32>
    %986 = arith.addf %968, %985 : vector<16x16xf32>
    %c249 = arith.constant 249 : index
    %987 = memref.load %arg2[%c249] : memref<256xf32, #tpu.memory_space<smem>>
    %988 = vector.broadcast %987 : f32 to vector<16x16xf32>
    %989 = arith.mulf %988, %974 : vector<16x16xf32>
    %990 = arith.addf %972, %989 : vector<16x16xf32>
    %c2_246 = arith.constant 2 : index
    %c0_247 = arith.constant 0 : index
    %c2_248 = arith.constant 2 : index
    %c0_249 = arith.constant 0 : index
    %991 = vector.load %arg5[%c2_246, %c0_247, %c2_248, %c0_249] : memref<4x3x18x16xf32, #tpu.memory_space<vmem>>, vector<1x1x16x16xf32>
    %992 = vector.shape_cast %991 : vector<1x1x16x16xf32> to vector<16x16xf32>
    %c74 = arith.constant 74 : index
    %993 = memref.load %arg2[%c74] : memref<256xf32, #tpu.memory_space<smem>>
    %994 = vector.broadcast %993 : f32 to vector<16x16xf32>
    %995 = arith.mulf %994, %992 : vector<16x16xf32>
    %996 = arith.addf %944, %995 : vector<16x16xf32>
    %c90 = arith.constant 90 : index
    %997 = memref.load %arg2[%c90] : memref<256xf32, #tpu.memory_space<smem>>
    %998 = vector.broadcast %997 : f32 to vector<16x16xf32>
    %999 = arith.mulf %998, %992 : vector<16x16xf32>
    %1000 = arith.addf %948, %999 : vector<16x16xf32>
    %c106 = arith.constant 106 : index
    %1001 = memref.load %arg2[%c106] : memref<256xf32, #tpu.memory_space<smem>>
    %1002 = vector.broadcast %1001 : f32 to vector<16x16xf32>
    %1003 = arith.mulf %1002, %992 : vector<16x16xf32>
    %1004 = arith.addf %952, %1003 : vector<16x16xf32>
    %c122 = arith.constant 122 : index
    %1005 = memref.load %arg2[%c122] : memref<256xf32, #tpu.memory_space<smem>>
    %1006 = vector.broadcast %1005 : f32 to vector<16x16xf32>
    %1007 = arith.mulf %1006, %992 : vector<16x16xf32>
    %1008 = arith.addf %956, %1007 : vector<16x16xf32>
    %c2_250 = arith.constant 2 : index
    %c1_251 = arith.constant 1 : index
    %c2_252 = arith.constant 2 : index
    %c0_253 = arith.constant 0 : index
    %1009 = vector.load %arg5[%c2_250, %c1_251, %c2_252, %c0_253] : memref<4x3x18x16xf32, #tpu.memory_space<vmem>>, vector<1x1x16x16xf32>
    %1010 = vector.shape_cast %1009 : vector<1x1x16x16xf32> to vector<16x16xf32>
    %c75 = arith.constant 75 : index
    %1011 = memref.load %arg2[%c75] : memref<256xf32, #tpu.memory_space<smem>>
    %1012 = vector.broadcast %1011 : f32 to vector<16x16xf32>
    %1013 = arith.mulf %1012, %1010 : vector<16x16xf32>
    %1014 = arith.addf %996, %1013 : vector<16x16xf32>
    %c91 = arith.constant 91 : index
    %1015 = memref.load %arg2[%c91] : memref<256xf32, #tpu.memory_space<smem>>
    %1016 = vector.broadcast %1015 : f32 to vector<16x16xf32>
    %1017 = arith.mulf %1016, %1010 : vector<16x16xf32>
    %1018 = arith.addf %1000, %1017 : vector<16x16xf32>
    %c107 = arith.constant 107 : index
    %1019 = memref.load %arg2[%c107] : memref<256xf32, #tpu.memory_space<smem>>
    %1020 = vector.broadcast %1019 : f32 to vector<16x16xf32>
    %1021 = arith.mulf %1020, %1010 : vector<16x16xf32>
    %1022 = arith.addf %1004, %1021 : vector<16x16xf32>
    %c123 = arith.constant 123 : index
    %1023 = memref.load %arg2[%c123] : memref<256xf32, #tpu.memory_space<smem>>
    %1024 = vector.broadcast %1023 : f32 to vector<16x16xf32>
    %1025 = arith.mulf %1024, %1010 : vector<16x16xf32>
    %1026 = arith.addf %1008, %1025 : vector<16x16xf32>
    %c202 = arith.constant 202 : index
    %1027 = memref.load %arg2[%c202] : memref<256xf32, #tpu.memory_space<smem>>
    %1028 = vector.broadcast %1027 : f32 to vector<16x16xf32>
    %1029 = arith.mulf %1028, %1010 : vector<16x16xf32>
    %1030 = arith.addf %978, %1029 : vector<16x16xf32>
    %c218 = arith.constant 218 : index
    %1031 = memref.load %arg2[%c218] : memref<256xf32, #tpu.memory_space<smem>>
    %1032 = vector.broadcast %1031 : f32 to vector<16x16xf32>
    %1033 = arith.mulf %1032, %1010 : vector<16x16xf32>
    %1034 = arith.addf %982, %1033 : vector<16x16xf32>
    %c234 = arith.constant 234 : index
    %1035 = memref.load %arg2[%c234] : memref<256xf32, #tpu.memory_space<smem>>
    %1036 = vector.broadcast %1035 : f32 to vector<16x16xf32>
    %1037 = arith.mulf %1036, %1010 : vector<16x16xf32>
    %1038 = arith.addf %986, %1037 : vector<16x16xf32>
    %c250 = arith.constant 250 : index
    %1039 = memref.load %arg2[%c250] : memref<256xf32, #tpu.memory_space<smem>>
    %1040 = vector.broadcast %1039 : f32 to vector<16x16xf32>
    %1041 = arith.mulf %1040, %1010 : vector<16x16xf32>
    %1042 = arith.addf %990, %1041 : vector<16x16xf32>
    %c2_254 = arith.constant 2 : index
    %c2_255 = arith.constant 2 : index
    %c2_256 = arith.constant 2 : index
    %c0_257 = arith.constant 0 : index
    %1043 = vector.load %arg5[%c2_254, %c2_255, %c2_256, %c0_257] : memref<4x3x18x16xf32, #tpu.memory_space<vmem>>, vector<1x1x16x16xf32>
    %1044 = vector.shape_cast %1043 : vector<1x1x16x16xf32> to vector<16x16xf32>
    %c203 = arith.constant 203 : index
    %1045 = memref.load %arg2[%c203] : memref<256xf32, #tpu.memory_space<smem>>
    %1046 = vector.broadcast %1045 : f32 to vector<16x16xf32>
    %1047 = arith.mulf %1046, %1044 : vector<16x16xf32>
    %1048 = arith.addf %1030, %1047 : vector<16x16xf32>
    %c219 = arith.constant 219 : index
    %1049 = memref.load %arg2[%c219] : memref<256xf32, #tpu.memory_space<smem>>
    %1050 = vector.broadcast %1049 : f32 to vector<16x16xf32>
    %1051 = arith.mulf %1050, %1044 : vector<16x16xf32>
    %1052 = arith.addf %1034, %1051 : vector<16x16xf32>
    %c235 = arith.constant 235 : index
    %1053 = memref.load %arg2[%c235] : memref<256xf32, #tpu.memory_space<smem>>
    %1054 = vector.broadcast %1053 : f32 to vector<16x16xf32>
    %1055 = arith.mulf %1054, %1044 : vector<16x16xf32>
    %1056 = arith.addf %1038, %1055 : vector<16x16xf32>
    %c251 = arith.constant 251 : index
    %1057 = memref.load %arg2[%c251] : memref<256xf32, #tpu.memory_space<smem>>
    %1058 = vector.broadcast %1057 : f32 to vector<16x16xf32>
    %1059 = arith.mulf %1058, %1044 : vector<16x16xf32>
    %1060 = arith.addf %1042, %1059 : vector<16x16xf32>
    %c3_258 = arith.constant 3 : index
    %c0_259 = arith.constant 0 : index
    %c1_260 = arith.constant 1 : index
    %c0_261 = arith.constant 0 : index
    %1061 = vector.load %arg5[%c3_258, %c0_259, %c1_260, %c0_261] : memref<4x3x18x16xf32, #tpu.memory_space<vmem>>, vector<1x1x16x16xf32>
    %1062 = vector.shape_cast %1061 : vector<1x1x16x16xf32> to vector<16x16xf32>
    %c76 = arith.constant 76 : index
    %1063 = memref.load %arg2[%c76] : memref<256xf32, #tpu.memory_space<smem>>
    %1064 = vector.broadcast %1063 : f32 to vector<16x16xf32>
    %1065 = arith.mulf %1064, %1062 : vector<16x16xf32>
    %1066 = arith.addf %1014, %1065 : vector<16x16xf32>
    %c92 = arith.constant 92 : index
    %1067 = memref.load %arg2[%c92] : memref<256xf32, #tpu.memory_space<smem>>
    %1068 = vector.broadcast %1067 : f32 to vector<16x16xf32>
    %1069 = arith.mulf %1068, %1062 : vector<16x16xf32>
    %1070 = arith.addf %1018, %1069 : vector<16x16xf32>
    %c108 = arith.constant 108 : index
    %1071 = memref.load %arg2[%c108] : memref<256xf32, #tpu.memory_space<smem>>
    %1072 = vector.broadcast %1071 : f32 to vector<16x16xf32>
    %1073 = arith.mulf %1072, %1062 : vector<16x16xf32>
    %1074 = arith.addf %1022, %1073 : vector<16x16xf32>
    %c124 = arith.constant 124 : index
    %1075 = memref.load %arg2[%c124] : memref<256xf32, #tpu.memory_space<smem>>
    %1076 = vector.broadcast %1075 : f32 to vector<16x16xf32>
    %1077 = arith.mulf %1076, %1062 : vector<16x16xf32>
    %1078 = arith.addf %1026, %1077 : vector<16x16xf32>
    %c3_262 = arith.constant 3 : index
    %c1_263 = arith.constant 1 : index
    %c1_264 = arith.constant 1 : index
    %c0_265 = arith.constant 0 : index
    %1079 = vector.load %arg5[%c3_262, %c1_263, %c1_264, %c0_265] : memref<4x3x18x16xf32, #tpu.memory_space<vmem>>, vector<1x1x16x16xf32>
    %1080 = vector.shape_cast %1079 : vector<1x1x16x16xf32> to vector<16x16xf32>
    %c77 = arith.constant 77 : index
    %1081 = memref.load %arg2[%c77] : memref<256xf32, #tpu.memory_space<smem>>
    %1082 = vector.broadcast %1081 : f32 to vector<16x16xf32>
    %1083 = arith.mulf %1082, %1080 : vector<16x16xf32>
    %1084 = arith.addf %1066, %1083 : vector<16x16xf32>
    %c93 = arith.constant 93 : index
    %1085 = memref.load %arg2[%c93] : memref<256xf32, #tpu.memory_space<smem>>
    %1086 = vector.broadcast %1085 : f32 to vector<16x16xf32>
    %1087 = arith.mulf %1086, %1080 : vector<16x16xf32>
    %1088 = arith.addf %1070, %1087 : vector<16x16xf32>
    %c109 = arith.constant 109 : index
    %1089 = memref.load %arg2[%c109] : memref<256xf32, #tpu.memory_space<smem>>
    %1090 = vector.broadcast %1089 : f32 to vector<16x16xf32>
    %1091 = arith.mulf %1090, %1080 : vector<16x16xf32>
    %1092 = arith.addf %1074, %1091 : vector<16x16xf32>
    %c125 = arith.constant 125 : index
    %1093 = memref.load %arg2[%c125] : memref<256xf32, #tpu.memory_space<smem>>
    %1094 = vector.broadcast %1093 : f32 to vector<16x16xf32>
    %1095 = arith.mulf %1094, %1080 : vector<16x16xf32>
    %1096 = arith.addf %1078, %1095 : vector<16x16xf32>
    %c204 = arith.constant 204 : index
    %1097 = memref.load %arg2[%c204] : memref<256xf32, #tpu.memory_space<smem>>
    %1098 = vector.broadcast %1097 : f32 to vector<16x16xf32>
    %1099 = arith.mulf %1098, %1080 : vector<16x16xf32>
    %1100 = arith.addf %1048, %1099 : vector<16x16xf32>
    %c220 = arith.constant 220 : index
    %1101 = memref.load %arg2[%c220] : memref<256xf32, #tpu.memory_space<smem>>
    %1102 = vector.broadcast %1101 : f32 to vector<16x16xf32>
    %1103 = arith.mulf %1102, %1080 : vector<16x16xf32>
    %1104 = arith.addf %1052, %1103 : vector<16x16xf32>
    %c236 = arith.constant 236 : index
    %1105 = memref.load %arg2[%c236] : memref<256xf32, #tpu.memory_space<smem>>
    %1106 = vector.broadcast %1105 : f32 to vector<16x16xf32>
    %1107 = arith.mulf %1106, %1080 : vector<16x16xf32>
    %1108 = arith.addf %1056, %1107 : vector<16x16xf32>
    %c252 = arith.constant 252 : index
    %1109 = memref.load %arg2[%c252] : memref<256xf32, #tpu.memory_space<smem>>
    %1110 = vector.broadcast %1109 : f32 to vector<16x16xf32>
    %1111 = arith.mulf %1110, %1080 : vector<16x16xf32>
    %1112 = arith.addf %1060, %1111 : vector<16x16xf32>
    %c3_266 = arith.constant 3 : index
    %c2_267 = arith.constant 2 : index
    %c1_268 = arith.constant 1 : index
    %c0_269 = arith.constant 0 : index
    %1113 = vector.load %arg5[%c3_266, %c2_267, %c1_268, %c0_269] : memref<4x3x18x16xf32, #tpu.memory_space<vmem>>, vector<1x1x16x16xf32>
    %1114 = vector.shape_cast %1113 : vector<1x1x16x16xf32> to vector<16x16xf32>
    %c205 = arith.constant 205 : index
    %1115 = memref.load %arg2[%c205] : memref<256xf32, #tpu.memory_space<smem>>
    %1116 = vector.broadcast %1115 : f32 to vector<16x16xf32>
    %1117 = arith.mulf %1116, %1114 : vector<16x16xf32>
    %1118 = arith.addf %1100, %1117 : vector<16x16xf32>
    %c221 = arith.constant 221 : index
    %1119 = memref.load %arg2[%c221] : memref<256xf32, #tpu.memory_space<smem>>
    %1120 = vector.broadcast %1119 : f32 to vector<16x16xf32>
    %1121 = arith.mulf %1120, %1114 : vector<16x16xf32>
    %1122 = arith.addf %1104, %1121 : vector<16x16xf32>
    %c237 = arith.constant 237 : index
    %1123 = memref.load %arg2[%c237] : memref<256xf32, #tpu.memory_space<smem>>
    %1124 = vector.broadcast %1123 : f32 to vector<16x16xf32>
    %1125 = arith.mulf %1124, %1114 : vector<16x16xf32>
    %1126 = arith.addf %1108, %1125 : vector<16x16xf32>
    %c253 = arith.constant 253 : index
    %1127 = memref.load %arg2[%c253] : memref<256xf32, #tpu.memory_space<smem>>
    %1128 = vector.broadcast %1127 : f32 to vector<16x16xf32>
    %1129 = arith.mulf %1128, %1114 : vector<16x16xf32>
    %1130 = arith.addf %1112, %1129 : vector<16x16xf32>
    %c3_270 = arith.constant 3 : index
    %c0_271 = arith.constant 0 : index
    %c2_272 = arith.constant 2 : index
    %c0_273 = arith.constant 0 : index
    %1131 = vector.load %arg5[%c3_270, %c0_271, %c2_272, %c0_273] : memref<4x3x18x16xf32, #tpu.memory_space<vmem>>, vector<1x1x16x16xf32>
    %1132 = vector.shape_cast %1131 : vector<1x1x16x16xf32> to vector<16x16xf32>
    %c78 = arith.constant 78 : index
    %1133 = memref.load %arg2[%c78] : memref<256xf32, #tpu.memory_space<smem>>
    %1134 = vector.broadcast %1133 : f32 to vector<16x16xf32>
    %1135 = arith.mulf %1134, %1132 : vector<16x16xf32>
    %1136 = arith.addf %1084, %1135 : vector<16x16xf32>
    %c94 = arith.constant 94 : index
    %1137 = memref.load %arg2[%c94] : memref<256xf32, #tpu.memory_space<smem>>
    %1138 = vector.broadcast %1137 : f32 to vector<16x16xf32>
    %1139 = arith.mulf %1138, %1132 : vector<16x16xf32>
    %1140 = arith.addf %1088, %1139 : vector<16x16xf32>
    %c110 = arith.constant 110 : index
    %1141 = memref.load %arg2[%c110] : memref<256xf32, #tpu.memory_space<smem>>
    %1142 = vector.broadcast %1141 : f32 to vector<16x16xf32>
    %1143 = arith.mulf %1142, %1132 : vector<16x16xf32>
    %1144 = arith.addf %1092, %1143 : vector<16x16xf32>
    %c126 = arith.constant 126 : index
    %1145 = memref.load %arg2[%c126] : memref<256xf32, #tpu.memory_space<smem>>
    %1146 = vector.broadcast %1145 : f32 to vector<16x16xf32>
    %1147 = arith.mulf %1146, %1132 : vector<16x16xf32>
    %1148 = arith.addf %1096, %1147 : vector<16x16xf32>
    %c3_274 = arith.constant 3 : index
    %c1_275 = arith.constant 1 : index
    %c2_276 = arith.constant 2 : index
    %c0_277 = arith.constant 0 : index
    %1149 = vector.load %arg5[%c3_274, %c1_275, %c2_276, %c0_277] : memref<4x3x18x16xf32, #tpu.memory_space<vmem>>, vector<1x1x16x16xf32>
    %1150 = vector.shape_cast %1149 : vector<1x1x16x16xf32> to vector<16x16xf32>
    %c79 = arith.constant 79 : index
    %1151 = memref.load %arg2[%c79] : memref<256xf32, #tpu.memory_space<smem>>
    %1152 = vector.broadcast %1151 : f32 to vector<16x16xf32>
    %1153 = arith.mulf %1152, %1150 : vector<16x16xf32>
    %1154 = arith.addf %1136, %1153 : vector<16x16xf32>
    %c95 = arith.constant 95 : index
    %1155 = memref.load %arg2[%c95] : memref<256xf32, #tpu.memory_space<smem>>
    %1156 = vector.broadcast %1155 : f32 to vector<16x16xf32>
    %1157 = arith.mulf %1156, %1150 : vector<16x16xf32>
    %1158 = arith.addf %1140, %1157 : vector<16x16xf32>
    %c111 = arith.constant 111 : index
    %1159 = memref.load %arg2[%c111] : memref<256xf32, #tpu.memory_space<smem>>
    %1160 = vector.broadcast %1159 : f32 to vector<16x16xf32>
    %1161 = arith.mulf %1160, %1150 : vector<16x16xf32>
    %1162 = arith.addf %1144, %1161 : vector<16x16xf32>
    %c127 = arith.constant 127 : index
    %1163 = memref.load %arg2[%c127] : memref<256xf32, #tpu.memory_space<smem>>
    %1164 = vector.broadcast %1163 : f32 to vector<16x16xf32>
    %1165 = arith.mulf %1164, %1150 : vector<16x16xf32>
    %1166 = arith.addf %1148, %1165 : vector<16x16xf32>
    %c206 = arith.constant 206 : index
    %1167 = memref.load %arg2[%c206] : memref<256xf32, #tpu.memory_space<smem>>
    %1168 = vector.broadcast %1167 : f32 to vector<16x16xf32>
    %1169 = arith.mulf %1168, %1150 : vector<16x16xf32>
    %1170 = arith.addf %1118, %1169 : vector<16x16xf32>
    %c222 = arith.constant 222 : index
    %1171 = memref.load %arg2[%c222] : memref<256xf32, #tpu.memory_space<smem>>
    %1172 = vector.broadcast %1171 : f32 to vector<16x16xf32>
    %1173 = arith.mulf %1172, %1150 : vector<16x16xf32>
    %1174 = arith.addf %1122, %1173 : vector<16x16xf32>
    %c238 = arith.constant 238 : index
    %1175 = memref.load %arg2[%c238] : memref<256xf32, #tpu.memory_space<smem>>
    %1176 = vector.broadcast %1175 : f32 to vector<16x16xf32>
    %1177 = arith.mulf %1176, %1150 : vector<16x16xf32>
    %1178 = arith.addf %1126, %1177 : vector<16x16xf32>
    %c254 = arith.constant 254 : index
    %1179 = memref.load %arg2[%c254] : memref<256xf32, #tpu.memory_space<smem>>
    %1180 = vector.broadcast %1179 : f32 to vector<16x16xf32>
    %1181 = arith.mulf %1180, %1150 : vector<16x16xf32>
    %1182 = arith.addf %1130, %1181 : vector<16x16xf32>
    %c3_278 = arith.constant 3 : index
    %c2_279 = arith.constant 2 : index
    %c2_280 = arith.constant 2 : index
    %c0_281 = arith.constant 0 : index
    %1183 = vector.load %arg5[%c3_278, %c2_279, %c2_280, %c0_281] : memref<4x3x18x16xf32, #tpu.memory_space<vmem>>, vector<1x1x16x16xf32>
    %1184 = vector.shape_cast %1183 : vector<1x1x16x16xf32> to vector<16x16xf32>
    %c207 = arith.constant 207 : index
    %1185 = memref.load %arg2[%c207] : memref<256xf32, #tpu.memory_space<smem>>
    %1186 = vector.broadcast %1185 : f32 to vector<16x16xf32>
    %1187 = arith.mulf %1186, %1184 : vector<16x16xf32>
    %1188 = arith.addf %1170, %1187 : vector<16x16xf32>
    %c223 = arith.constant 223 : index
    %1189 = memref.load %arg2[%c223] : memref<256xf32, #tpu.memory_space<smem>>
    %1190 = vector.broadcast %1189 : f32 to vector<16x16xf32>
    %1191 = arith.mulf %1190, %1184 : vector<16x16xf32>
    %1192 = arith.addf %1174, %1191 : vector<16x16xf32>
    %c239 = arith.constant 239 : index
    %1193 = memref.load %arg2[%c239] : memref<256xf32, #tpu.memory_space<smem>>
    %1194 = vector.broadcast %1193 : f32 to vector<16x16xf32>
    %1195 = arith.mulf %1194, %1184 : vector<16x16xf32>
    %1196 = arith.addf %1178, %1195 : vector<16x16xf32>
    %c255 = arith.constant 255 : index
    %1197 = memref.load %arg2[%c255] : memref<256xf32, #tpu.memory_space<smem>>
    %1198 = vector.broadcast %1197 : f32 to vector<16x16xf32>
    %1199 = arith.mulf %1198, %1184 : vector<16x16xf32>
    %1200 = arith.addf %1182, %1199 : vector<16x16xf32>
    %1201 = tpu.concatenate %1154, %1188 in 1 : vector<16x16xf32>, vector<16x16xf32> -> vector<16x32xf32>
    %1202 = tpu.concatenate %1158, %1192 in 1 : vector<16x16xf32>, vector<16x16xf32> -> vector<16x32xf32>
    %1203 = tpu.concatenate %1162, %1196 in 1 : vector<16x16xf32>, vector<16x16xf32> -> vector<16x32xf32>
    %1204 = tpu.concatenate %1166, %1200 in 1 : vector<16x16xf32>, vector<16x16xf32> -> vector<16x32xf32>
    %1205 = tpu.concatenate %1201, %1202, %1203, %1204 in 1 : vector<16x32xf32>, vector<16x32xf32>, vector<16x32xf32>, vector<16x32xf32> -> vector<16x128xf32>
    %1206 = vector.broadcast %54 : vector<1x128xf32> to vector<16x128xf32>
    %1207 = arith.addf %1205, %1206 : vector<16x128xf32>
    %c0_282 = arith.constant 0 : index
    %c1_283 = arith.constant 1 : index
    %c0_284 = arith.constant 0 : index
    %c0_285 = arith.constant 0 : index
    %1208 = vector.load %arg4[%c0_282, %c1_283, %c0_284, %c0_285] : memref<1x2x16x128xf32, #tpu.memory_space<vmem>>, vector<1x1x16x128xf32>
    %1209 = vector.shape_cast %1208 : vector<1x1x16x128xf32> to vector<16x128xf32>
    %1210 = vector.shape_cast %1207 : vector<16x128xf32> to vector<1x1x16x128xf32>
    tpu.vector_store %arg4[%c0_282, %c1_283, %c0_284, %c0_285], %1210 {strides = array<i32>} : memref<1x2x16x128xf32, #tpu.memory_space<vmem>>, vector<1x1x16x128xf32>,
    return
  }
  func.func @transform_0(%arg0: i32) -> (i32, i32, i32, i32) {
    %c0_i32 = arith.constant 0 : i32
    %c0_i32_0 = arith.constant 0 : i32
    %c0_i32_1 = arith.constant 0 : i32
    %c0_i32_2 = arith.constant 0 : i32
    return %arg0, %c0_i32, %c0_i32_0, %c0_i32_1 : i32, i32, i32, i32
  }
  func.func @transform_1(%arg0: i32) -> i32 {
    %c0_i32 = arith.constant 0 : i32
    %c0_i32_0 = arith.constant 0 : i32
    return %c0_i32 : i32
  }
  func.func @transform_2(%arg0: i32) -> (i32, i32) {
    %c0_i32 = arith.constant 0 : i32
    %c0_i32_0 = arith.constant 0 : i32
    %c0_i32_1 = arith.constant 0 : i32
    return %c0_i32, %c0_i32_0 : i32, i32
  }
  func.func @transform_3(%arg0: i32) -> (i32, i32, i32, i32) {
    %c0_i32 = arith.constant 0 : i32
    %c0_i32_0 = arith.constant 0 : i32
    %c0_i32_1 = arith.constant 0 : i32
    %c0_i32_2 = arith.constant 0 : i32
    return %arg0, %c0_i32, %c0_i32_0, %c0_i32_1 : i32, i32, i32, i32
  }
}

</mosaic_0001>

<bundles_post_ra>
// kernel: tpu_custom_call.1
= control target key start
LH: loop header
LB: loop body
LE: loop exit
PB: predicated region body
PF: predicated region fallthrough
CT: control target
= control target key end

     0   :  { %s5792_s0 = inlined_call_operand.hbm [shape: f32[2,4,16,16], index: 0, kind: input, shape index: {}]   ;;  %s5793_s1 = inlined_call_operand.vmem [shape: f32[256], index: 1, kind: input, shape index: {}]   ;;  %s5794_s2 = inlined_call_operand.vmem [shape: f32[1,128], index: 2, kind: input, shape index: {}]   ;;  %s5795_s3 = inlined_call_operand.hbm [shape: f32[2,2,16,128], index: 3, kind: output, shape index: {}]  }
   0x1   :  { %5965 = sst [smem:[#allocation168_spill]] %s5792_s0 }
   0x2   :  { %5966 = sst [smem:[#allocation169_spill]] %s5793_s1 }
   0x3   :  { %5967 = sst [smem:[#allocation170_spill]] %s5794_s2 }
   0x4   :  { %5968 = sst [smem:[#allocation171_spill]] %s5795_s3 }
   0x5   :  { %8 = vsyncpa [#allocation4], 0 }
   0x6   :  { %10 = vsyncpa [#allocation4 + $0x1], 0 }
   0x7   :  { %11 = vsyncpa [#allocation6], 0 }
   0x8   :  { %12 = vsyncpa [#allocation5], 0 }
   0x9   :  { %14 = vsyncpa [#allocation5 + $0x1], 0  ;;  %s2808_s12 = smov 0   ;;  %s2810_s13 = smov 0  }
   0xa   :  { %s2812_s14 = smov 0   ;;  %s2814_s15 = smov 0  }
   0xb LB: > { %5969 = sst [smem:[#allocation12_spill]] %s2760_s12  ;;  %s2829_s16 = sadd.s32 4294967295, %s2772_s15   ;;  %s2772_s15 = sphi %s2814_s15, %s6516_s15   ;;  %s2768_s14 = sphi %s2812_s14, %s6519_s14   ;;  %s2764_s13 = sphi %s2810_s13, %s6518_s13   ;;  %s2760_s12 = sphi %s2808_s12, %s6517_s12  }
   0xc   : > { %5970 = sst [smem:[#allocation13_spill]] %s2764_s13  ;;  %s2235_s17 = sadd.s32 4294967294, %s2772_s15  }
   0xd   : > { %5971 = sst [smem:[#allocation14_spill]] %s2768_s14  ;;  %s2833_s18 = sadd.s32 1, %s2772_s15  }
   0xe   : > { %5972 = sst [smem:[#allocation15_spill]] %s2772_s15  ;;  %s27_s19 = sadd.s32 1, %s2768_s14 }
   0xf   : > { %5973 = sst [smem:[#allocation16_spill]] %s2829_s16  ;;  %s24_s20 = ssub.s32 %s2772_s15, %s2833_s18 }
  0x10   : > { %5974 = sst [smem:[#allocation17_spill]] %s2833_s18  ;;  %p34_p0 = scmp.ne.s32.totalorder %s2768_s14, %s2764_s13 }
  0x11   : > { %p25_p1 = scmp.eq.s32.totalorder %s24_s20, 0  ;;  %p35_p2 = scmp.eq.s32.totalorder %s2772_s15, 0 }
  0x12   : > { %p40_p3 = scmp.ne.s32.totalorder %s2764_s13, %s2760_s12  ;;  %p5797_p4 = scmp.eq.s32.totalorder %s2829_s16, 0 }
  0x13   : > { %s2845_s21 = scalar_select %p25_p1, %s2768_s14, %s27_s19  }
  0x14   : > { %p2847_p5 = por %p35_p2, %p34_p0  ;;  %p2853_p6 = por %p5797_p4, %p40_p3 }
  0x15   : > { %5975 = sst [smem:[#allocation18_spill]] %s2845_s21  ;;  %p106_p7 = scmp.eq.s32.totalorder %s2829_s16, 1 }
  0x16   : > { %s5977_s23 = scalar_select %p2853_p6, 1, 0 }
  0x17   : > { %p112_p8 = scmp.eq.s32.totalorder %s2235_s17, 1  ;;  %p2236_p9 = scmp.ge.s32.totalorder %s2772_s15, 1 }
  0x18   : > { %p119_p10 = scmp.lt.s32.totalorder %s2772_s15, 3  ;;  %p2860_p11 = por %p106_p7, %p34_p0 }
  0x19   : > { %p2864_p12 = por %p112_p8, %p40_p3  ;;  %s5983_s1 = sld [smem:[#allocation169_spill]] }
  0x1a   : > { %s5978_s24 = scalar_select %p2860_p11, 1, 0 }
  0x1b   : > { %s5980_s25 = scalar_select %p2864_p12, 1, 0 }
  0x1c   : > { %5979 = sst [smem:[#allocation19_spill]] %s5978_s24  ;;  %p2868_p13 = pnand %p2236_p9, %p119_p10 }
  0x1d   : > { %5981 = sst [smem:[#allocation20_spill]] %s5980_s25  ;;  %p2538_p2 = scmp.lt.s32.totalorder %s2772_s15, 2 }
  0x1e   : > { %p2525_p1 = pneg %p2868_p13  ;;  %s146_s4 = sand.u32 1, %s2768_s14  }
  0x1f   : > { %s132_s29 = sshll.u32 %s5983_s1, 4  ;;  %p2888_p3 = pnand %p2538_p2, %p2847_p5  ;;  %s133_s29 = int_to_ptr.vmem [resolvable:$true] %s132_s29 }
  0x20   : > { %p2881_p7 = pnand %p2525_p1, %p5797_p4  ;;  %s2239_s6 = sshll.u32 %s146_s4, 6 }
  0x21   : > { %s2657_s7 = scalar_lea.vmem %s133_s29, 32  ;;  %p2665_p12 = scmp.lt.s32.totalorder %s133_s29, %s133_s29 }
  0x22   : > { %p2658_p8 = scmp.ne.s32.totalorder %s133_s29, %s2657_s7  ;;  %p2659_p9 = pneg %p2881_p7 }
  0x23   : > { %p2666_p11 = scmp.lt.s32.totalorder %s2657_s7, %s2657_s7 }
  0x24   : > { %p2660_p10 = pnand %p2659_p9, %p2658_p8 }
  0x25   : > { %p2667_p1 = por %p2666_p11, %p2665_p12 }
  0x26   : > { %p2661_p0 = pneg %p2660_p10 }
  0x28   : > { %p2668_p4 = pnand %p2667_p1, %p2661_p0 }
  0x2a   : > { %2671 = shalt.err (!%p2668_p4)
}
  0x2b   : > { %s2774_s8 = smov [#allocation7]   ;;  %s2515_s9 = sshll.u32 %s2772_s15, 10 }
  0x2c   : > { %2528 = dma.vmem_to_smem (!%p2881_p7), %s133_s29, 32, %s2774_s8, [#allocation6]  }
  0x2d   : > { %s150_s10 = scalar_lea.vmem [#allocation3], %s2239_s6  ;;  %s5986_s0 = sld [smem:[#allocation168_spill]] }
  0x2e   : > { %s157_s11 = sshll.u32 %s150_s10, 4  ;;  %s2904_s22 = scalar_lea.sflag [#allocation4], %s146_s4  ;;  %s2902_s11 = int_to_ptr.vmem [resolvable:$true] %s157_s11 }
  0x2f   : > { %p2674_p5 = pneg %p2888_p3 }
  0x33   : > { %s2900_s20 = scalar_lea.hbm %s5986_s0, %s2515_s9  ;;  %s2677_s30 = scalar_lea.hbm %s5986_s0, 2048 }
  0x34   : > { %s2672_s27 = scalar_lea.hbm %s2900_s20, 1024  ;;  %p2678_p0 = scmp.lt.u32.totalorder %s2900_s20, %s5986_s0 }
  0x35   : > { %p2673_p4 = scmp.ne.s32.totalorder %s2900_s20, %s2672_s27  ;;  %p2679_p2 = scmp.lt.u32.totalorder %s2677_s30, %s2672_s27 }
  0x36   : > { %p2681_p8 = scmp.lt.u32.totalorder %s2672_s27, %s2900_s20 }
  0x37   : > { %p2675_p11 = pnand %p2674_p5, %p2673_p4  ;;  %p2680_p7 = por %p2679_p2, %p2678_p0 }
  0x39   : > { %p2676_p12 = pneg %p2675_p11  ;;  %p2682_p9 = por %p2681_p8, %p2680_p7 }
  0x3b   : > { %p2683_p10 = pnand %p2682_p9, %p2676_p12 }
  0x3d   : > { %2686 = shalt.err (!%p2683_p10)
}
  0x3e   : > { %s2687_s4 = scalar_lea.vmem %s2902_s11, 1024  ;;  %s2775_s8 = smov [#allocation3]  }
  0x3f   : > { %p2688_p1 = scmp.ne.s32.totalorder %s2902_s11, %s2687_s4  ;;  %s2692_s9 = sshll.u32 %s2775_s8, 4  ;;  %s2693_s9 = int_to_ptr.vmem [resolvable:$false] %s2692_s9 }
  0x40   : > { %s2694_s10 = scalar_lea.vmem %s2693_s9, 2048  ;;  %p2695_p6 = scmp.lt.s32.totalorder %s2902_s11, %s2693_s9 }
  0x41   : > { %p2690_p4 = pnand %p2688_p1, %p2674_p5  ;;  %p2696_p0 = scmp.lt.s32.totalorder %s2694_s10, %s2687_s4 }
  0x43   : > { %p2691_p11 = pneg %p2690_p4  ;;  %p2697_p2 = por %p2696_p0, %p2695_p6 }
  0x45   : > { %p2698_p7 = pnand %p2697_p2, %p2691_p11 }
  0x47   : > { %2701 = shalt.err (!%p2698_p7)
}
  0x48   : > { %s2776_s17 = smov 128   ;;  %s2777_s19 = smov 8  }
  0x49   : > { %2532 = dma.hbm_to_vmem [thread:$0]  (!%p2888_p3), %s2900_s20, 1024, %s2902_s11, %s2904_s22, %s2776_s17, %s2776_s17, %s2777_s19  }
  0x4a   : > { %169 = sbr.rel (%p2868_p13) target bundleno = 622 (0x26e), region = 32 }
  0x51   : > { %s2935_s27 = sand.u32 1, %s2764_s13   ;;  %p5988_p6 = scmp.ne.s32.totalorder %s5977_s23, 0 }
  0x52   : > { %5987 = sst [smem:[#allocation21_spill]] %s2935_s27  ;;  %s2243_s28 = sshll.u32 %s2935_s27, 6 }
  0x53   : > { %s172_s29 = scalar_lea.sflag [#allocation4], %s2935_s27  ;;  %s2939_s30 = scalar_lea.vmem [#allocation3], %s2243_s28 }
  0x54   : > { %2747 = dma.done.wait (%p5988_p6), %s172_s29, 1024  }
  0x55   : > { %2749 = vsyncadd (%p5988_p6), %s172_s29, 4294966272  ;;  %p5989_p3 = scmp.eq.s32.totalorder %s2829_s16, 0 }
  0x57   : > { %2751 = dma.done.wait (%p5989_p3), [#allocation6], 32   ;;  %p5990_p13 = pmov %p5989_p3 }
  0x59   : > { %2753 = vsyncadd (%p5990_p13), [#allocation6], 4294967264 }
  0x5a   : > { %184 = sfence }
  0x5b   : > { %v2950_v0 = vld [vmem:[%s2939_s30] sm:$0xff]  ;;  %vm203_vm0 = vcmask 130048   ;;  %v2953_v1 = vld [vmem:[%s2939_s30 + $0x10] sm:$0xff]  ;;  %v242_v2 = vld [vmem:[%s2939_s30 + $0x8] sm:$0xff]  ;;  %s2778_s26 = smov 127   ;;  %v2779_v3 = vmov 0.0  }
  0x5c   : > { %257 = vrot.lane.b32.xlu0 %v2950_v0, %s2778_s26  ;;  %208 = vst.msk [vmem:[#allocation2 + $0x18] sm:$0xff] %vm203_vm0, %v2779_v3  ;;  %209 = vst.msk [vmem:[#allocation2 + $0x20] sm:$0xff] %vm203_vm0, %v2779_v3  ;;  %284 = vrot.lane.b32.xlu1 %v2953_v1, %s2778_s26  ;;  %vm206_vm1 = vcmask 123904   ;;  %v2247_v4 = vld [vmem:[%s2939_s30 + $0x18] sm:$0xff]  ;;  %v2248_v5 = vld [vmem:[%s2939_s30 + $0x20] sm:$0xff]  ;;  %s2780_s23 = smov 1  }
  0x5d   : > { %204 = vst.msk [vmem:[#allocation2] sm:$0xff] %vm203_vm0, %v2779_v3  ;;  %205 = vst.msk [vmem:[#allocation2 + $0x8] sm:$0xff] %vm203_vm0, %v2779_v3  ;;  %v2249_v6 = vld [vmem:[%s2939_s30 + $0x28] sm:$0xff]  ;;  %v2250_v7 = vld [vmem:[%s2939_s30 + $0x30] sm:$0xff]  ;;  %s3019_s5 = sld [smem:[#allocation7 + $0x90]]  ;;  %s3021_s11 = sld [smem:[#allocation7 + $0x91]] }
  0x5e   : > { %211 = vst.msk [vmem:[#allocation2 + $0x30] sm:$0xff] %vm203_vm0, %v2779_v3  ;;  %212 = vst.msk [vmem:[#allocation2 + $0x38] sm:$0xff] %vm203_vm0, %v2779_v3  ;;  %v2251_v8 = vld [vmem:[%s2939_s30 + $0x38] sm:$0xff]  ;;  %s3023_s20 = sld [smem:[#allocation7 + $0x92]]  ;;  %s3025_s22 = sld [smem:[#allocation7 + $0x94]]  ;;  %vm264_vm2 = vcmask 121856  }
  0x5f   : > { %214 = vst.msk [vmem:[#allocation2 + $0x48] sm:$0xff] %vm203_vm0, %v2779_v3  ;;  %215 = vst.msk [vmem:[#allocation2 + $0x50] sm:$0xff] %vm203_vm0, %v2779_v3  ;;  %s3027_s6 = sld [smem:[#allocation7 + $0x93]]  ;;  %s3029_s7 = sld [smem:[#allocation7 + $0x95]]  ;;  %vm251_vm3 = vcmask 130056   ;;  %vm1226_vm4 = vcmask 261120  }
  0x60   : > { %217 = vst.msk [vmem:[#allocation2 + $0x60] sm:$0xff] %vm203_vm0, %v2779_v3  ;;  %218 = vst.msk [vmem:[#allocation2 + $0x68] sm:$0xff] %vm203_vm0, %v2779_v3  ;;  %259 = vrot.lane.b32.xlu0 %v242_v2, %s2778_s26  ;;  %286 = vrot.lane.b32.xlu1 %v2247_v4, %s2778_s26  ;;  %s3031_s4 = sld [smem:[#allocation7 + $0x96]]  ;;  %s3033_s8 = sld [smem:[#allocation7 + $0x97]]  ;;  %vm1229_vm5 = vcmask 523264   ;;  %vm1232_vm6 = vcmask 785408  }
  0x61   : > { %220 = vst.msk [vmem:[#allocation2 + $0x78] sm:$0xff] %vm203_vm0, %v2779_v3  ;;  %221 = vst.msk [vmem:[#allocation2 + $0x80] sm:$0xff] %vm203_vm0, %v2779_v3  ;;  %s3035_s9 = sld [smem:[#allocation7 + $0x98]]  ;;  %s3037_s10 = sld [smem:[#allocation7 + $0x99]] }
  0x62   : > { %223 = vst.msk [vmem:[#allocation2 + $0x90] sm:$0xff] %vm203_vm0, %v2779_v3  ;;  %224 = vst.msk [vmem:[#allocation2 + $0x98] sm:$0xff] %vm203_vm0, %v2779_v3  ;;  %s3039_s17 = sld [smem:[#allocation7 + $0x9a]]  ;;  %s3041_s19 = sld [smem:[#allocation7 + $0xd0]] }
  0x63   : > { %226 = vst.msk [vmem:[#allocation2 + $0xa8] sm:$0xff] %vm203_vm0, %v2779_v3  ;;  %227 = vst.msk [vmem:[#allocation2 + $0xb0] sm:$0xff] %vm203_vm0, %v2779_v3  ;;  %s3043_s28 = sld [smem:[#allocation7 + $0x9b]]  ;;  %s3045_s29 = sld [smem:[#allocation7 + $0xd1]]  ;;  %v405_v11 = vstv %s3019_s5 }
  0x64   : > { %229 = vst.msk [vmem:[#allocation2 + $0xc0] sm:$0xff] %vm203_vm0, %v2779_v3  ;;  %230 = vst.msk [vmem:[#allocation2 + $0xc8] sm:$0xff] %vm203_vm0, %v2779_v3  ;;  %310 = vrot.lane.b32.xlu0 %v2248_v5, %s2778_s26  ;;  %312 = vrot.lane.b32.xlu1 %v2249_v6, %s2778_s26  ;;  %s3047_s30 = sld [smem:[#allocation7 + $0x9c]]  ;;  %s3053_s0 = sld [smem:[#allocation7 + $0xd3]]  ;;  %v507_v12 = vstv %s3023_s20  ;;  %v609_v13 = vstv %s3025_s22 }
  0x65   : > { %232 = vst.msk [vmem:[#allocation2 + $0xd8] sm:$0xff] %vm203_vm0, %v2779_v3  ;;  %233 = vst.msk [vmem:[#allocation2 + $0xe0] sm:$0xff] %vm203_vm0, %v2779_v3  ;;  %s3062_s1 = sld [smem:[#allocation7 + $0xd4]]  ;;  %s3064_s21 = sld [smem:[#allocation7 + $0xd5]] }
  0x66   : > { %235 = vst.msk [vmem:[#allocation2 + $0xf0] sm:$0xff] %vm203_vm0, %v2779_v3  ;;  %236 = vst.msk [vmem:[#allocation2 + $0xf8] sm:$0xff] %vm203_vm0, %v2779_v3  ;;  %s3068_s14 = sld [smem:[#allocation7 + $0x9e]]  ;;  %v711_v18 = vstv %s3031_s4  ;;  %s3078_s5 = sld [smem:[#allocation7 + $0xd7]] }
  0x67   : > { %238 = vst.msk [vmem:[#allocation2 + $0x108] sm:$0xff] %vm203_vm0, %v2779_v3  ;;  %239 = vst.msk [vmem:[#allocation2 + $0x110] sm:$0xff] %vm203_vm0, %v2779_v3  ;;  %5991 = sst [smem:[#allocation22_spill]] %s3037_s10  ;;  %s3070_s13 = sld [smem:[#allocation7 + $0xd6]]  ;;  %v813_v27 = vstv %s3035_s9 }
  0x68   : > { %255 = vst.msk [vmem:[#allocation2 + $0x19] sm:$0xff] %vm203_vm0, %v2950_v0  ;;  %282 = vst.msk [vmem:[#allocation2 + $0x61] sm:$0xff] %vm203_vm0, %v2953_v1  ;;  %336 = vrot.lane.b32.xlu0 %v2250_v7, %s2778_s26  ;;  %338 = vrot.lane.b32.xlu1 %v2251_v8, %s2778_s26  ;;  %s3049_s26 = sld [smem:[#allocation7 + $0xd2]]  ;;  %s3080_s20 = sld [smem:[#allocation7 + $0xd8]]  ;;  %v915_v28 = vstv %s3039_s17  ;;  %v1304_v36 = vstv %s3041_s19 }
  0x69   : > { %210 = vst.msk [vmem:[#allocation2 + $0x28] sm:$0x3] %vm206_vm1, %v2779_v3  ;;  %207 = vst.msk [vmem:[#allocation2 + $0x10] sm:$0x3] %vm206_vm1, %v2779_v3  ;;  %5992 = sst [smem:[#allocation23_spill]] %s3043_s28  ;;  %s3096_s22 = sld [smem:[#allocation7 + $0x9f]] }
  0x6a   : > { %213 = vst.msk [vmem:[#allocation2 + $0x40] sm:$0x3] %vm206_vm1, %v2779_v3  ;;  %216 = vst.msk [vmem:[#allocation2 + $0x58] sm:$0x3] %vm206_vm1, %v2779_v3  ;;  %5994 = sst [smem:[#allocation25_spill]] %s3053_s0  ;;  %s3098_s4 = sld [smem:[#allocation7 + $0xd9]]  ;;  %v1017_v46 = vstv %s3047_s30 }
  0x6b   : > { %219 = vst.msk [vmem:[#allocation2 + $0x70] sm:$0x3] %vm206_vm1, %v2779_v3  ;;  %222 = vst.msk [vmem:[#allocation2 + $0x88] sm:$0x3] %vm206_vm1, %v2779_v3  ;;  %s3110_s18 = sld [smem:[#allocation7 + $0xda]]  ;;  %s3112_s15 = sld [smem:[#allocation7 + $0xdb]]  ;;  %v1508_v51 = vstv %s3062_s1 }
  0x6c   : > { %225 = vst.msk [vmem:[#allocation2 + $0xa0] sm:$0x3] %vm206_vm1, %v2779_v3  ;;  %228 = vst.msk [vmem:[#allocation2 + $0xb8] sm:$0x3] %vm206_vm1, %v2779_v3  ;;  %247 = vrot.lane.b32.xlu1 %v242_v2, %s2780_s23  ;;  %245 = vrot.lane.b32.xlu0 %v2950_v0, %s2780_s23  ;;  %5995 = sst [smem:[#allocation26_spill]] %s3078_s5  ;;  %s3126_s9 = sld [smem:[#allocation7 + $0xdc]]  ;;  %v1119_v52 = vstv %s3068_s14 }
  0x6d   : > { %231 = vst.msk [vmem:[#allocation2 + $0xd0] sm:$0x3] %vm206_vm1, %v2779_v3  ;;  %234 = vst.msk [vmem:[#allocation2 + $0xe8] sm:$0x3] %vm206_vm1, %v2779_v3  ;;  %s3128_s17 = sld [smem:[#allocation7 + $0xdd]]  ;;  %s3142_s19 = sld [smem:[#allocation7 + $0xde]]  ;;  %v1610_v62 = vstv %s3070_s13 }
  0x6e   : > { %237 = vst.msk [vmem:[#allocation2 + $0x100] sm:$0x3] %vm206_vm1, %v2779_v3  ;;  %240 = vst.msk [vmem:[#allocation2 + $0x118] sm:$0x3] %vm206_vm1, %v2779_v3  ;;  %v1406_v42 = vstv %s3049_s26  ;;  %s3144_s25 = sld [smem:[#allocation7 + $0xdf]]  ;;  %s3158_s12 = sld [smem:[#allocation7 + $0xa0]] }
  0x6f   : > { %308 = vst.msk [vmem:[#allocation2 + $0xa9] sm:$0xff] %vm203_vm0, %v2248_v5  ;;  %256 = vst.msk [vmem:[#allocation2 + $0x21] sm:$0xff] %vm203_vm0, %v242_v2  ;;  %v3055_v9 = vld [vmem:[#allocation2 + $0x18] sm:$0xff]  ;;  %v3057_v10 = vld [vmem:[#allocation2 + $0x60] sm:$0xff]  ;;  %5996 = sst [smem:[#allocation27_spill]] %s3096_s22  ;;  %s3160_s26 = sld [smem:[#allocation7 + $0xa1]] }
  0x70   : > { %283 = vst.msk [vmem:[#allocation2 + $0x69] sm:$0xff] %vm203_vm0, %v2247_v4  ;;  %309 = vst.msk [vmem:[#allocation2 + $0xb1] sm:$0xff] %vm203_vm0, %v2249_v6  ;;  %274 = vrot.lane.b32.xlu1 %v2247_v4, %s2780_s23  ;;  %272 = vrot.lane.b32.xlu0 %v2953_v1, %s2780_s23  ;;  %v3072_v15 = vld [vmem:[#allocation2 + $0x19] sm:$0xff]  ;;  %v3074_v16 = vld [vmem:[#allocation2 + $0x61] sm:$0xff]  ;;  %v3087_v21 = vmul.f32 %v405_v11, %v3055_v9  ;;  %v3094_v24 = vmul.f32 %v609_v13, %v3057_v10  ;;  %5997 = sst [smem:[#allocation28_spill]] %s3098_s4  ;;  %s3168_s3 = sld [smem:[#allocation7 + $0xa2]]  ;;  %v1712_v4 = vstv %s3080_s20 }
  0x71   : > { %334 = vst.msk [vmem:[#allocation2 + $0xf1] sm:$0xff] %vm203_vm0, %v2250_v7  ;;  %335 = vst.msk [vmem:[#allocation2 + $0xf9] sm:$0xff] %vm203_vm0, %v2251_v8  ;;  %v3090_v22 = vmul.f32 %v507_v12, %v3072_v15  ;;  %5998 = sst [smem:[#allocation29_spill]] %s3112_s15  ;;  %v3119_v33 = vmul.f32 %v711_v18, %v3074_v16  ;;  %v3164_v49 = vmul.f32 %v1304_v36, %v3072_v15  ;;  %s3170_s24 = sld [smem:[#allocation7 + $0xa3]] }
  0x72   : > { %s3186_s1 = sld [smem:[#allocation7 + $0xa4]]  ;;  %s3188_s30 = sld [smem:[#allocation7 + $0xa5]]  ;;  %v3210_v2 = vmul.f32 %v1508_v51, %v3074_v16 }
  0x73   : > { %5999 = sst [smem:[#allocation30_spill]] %s3128_s17  ;;  %s3200_s14 = sld [smem:[#allocation7 + $0xa6]] }
  0x74   : > { %300 = vrot.lane.b32.xlu1 %v2249_v6, %s2780_s23  ;;  %298 = vrot.lane.b32.xlu0 %v2248_v5, %s2780_s23  ;;  %6000 = sst [smem:[#allocation31_spill]] %s3144_s25  ;;  %s3202_s16 = sld [smem:[#allocation7 + $0xa7]] }
  0x75   : > { %s3214_s2 = sld [smem:[#allocation7 + $0xa8]]  ;;  %s3216_s13 = sld [smem:[#allocation7 + $0xa9]] }
  0x76   : > { %v3066_v14 = vld [vmem:[#allocation2 + $0x20] sm:$0xff]  ;;  %v3101_v26 = vld [vmem:[#allocation2 + $0xa8] sm:$0xff]  ;;  %s3230_s27 = sld [smem:[#allocation7 + $0xaa]]  ;;  %s3232_s20 = sld [smem:[#allocation7 + $0xab]]  ;;  %v513_v34 = vstv %s3168_s3 }
  0x77   : > { %v3082_v19 = vld [vmem:[#allocation2 + $0x21] sm:$0xff]  ;;  %v3106_v29 = vmul.f32 %v405_v11, %v3066_v14  ;;  %v3108_v30 = vld [vmem:[#allocation2 + $0xb0] sm:$0xff]  ;;  %v3147_v43 = vmul.f32 %v813_v27, %v3101_v26  ;;  %6001 = sst [smem:[#allocation32_spill]] %s3170_s24  ;;  %s3256_s22 = sld [smem:[#allocation7 + $0xae]]  ;;  %v3313_v17 = vmul.f32 %v513_v34, %v3072_v15 }
  0x78   : > { %326 = vrot.lane.b32.xlu1 %v2251_v8, %s2780_s23  ;;  %324 = vrot.lane.b32.xlu0 %v2250_v7, %s2780_s23  ;;  %s3051_s23 = sld [smem:[#allocation7 + $0x9d]]  ;;  %v3084_v20 = vld [vmem:[#allocation2 + $0x68] sm:$0xff]  ;;  %v3114_v31 = vld [vmem:[#allocation2 + $0x1a] sm:$0xff]  ;;  %v3123_v35 = vmul.f32 %v507_v12, %v3082_v19  ;;  %v3152_v45 = vld [vmem:[#allocation2 + $0xf0] sm:$0xff]  ;;  %v3156_v47 = vmul.f32 %v813_v27, %v3108_v30  ;;  %v3181_v56 = vmul.f32 %v1304_v36, %v3082_v19  ;;  %v1814_v8 = vstv %s3110_s18  ;;  %s3258_s4 = sld [smem:[#allocation7 + $0xaf]] }
  0x79   : > { %v3116_v32 = vld [vmem:[#allocation2 + $0x69] sm:$0xff]  ;;  %v3136_v40 = vmul.f32 %v609_v13, %v3084_v20  ;;  %v3173_v53 = vld [vmem:[#allocation2 + $0xb1] sm:$0xff]  ;;  %v3178_v55 = vmul.f32 %v1406_v42, %v3114_v31  ;;  %6002 = sst [smem:[#allocation33_spill]] %s3188_s30  ;;  %v3193_v59 = vmul.f32 %v1017_v46, %v3152_v45  ;;  %v3260_v0 = vld [vmem:[#allocation2 + $0xf9] sm:$0xff]  ;;  %s3282_s28 = sld [smem:[#allocation7 + $0xe2]]  ;;  %v615_v25 = vstv %s3186_s1 }
  0x7a   : > { %v3130_v37 = vld [vmem:[#allocation2 + $0x22] sm:$0xff]  ;;  %v3139_v41 = vmul.f32 %v711_v18, %v3116_v32  ;;  %v3175_v54 = vld [vmem:[#allocation2 + $0xf8] sm:$0xff]  ;;  %v3196_v60 = vmul.f32 %v915_v28, %v3173_v53  ;;  %6005 = sst [smem:[#allocation36_spill]] %s3202_s16  ;;  %v3204_v63 = vld [vmem:[#allocation2 + $0x6a] sm:$0xff]  ;;  %v3228_v11 = vmul.f32 %v1508_v51, %v3116_v32  ;;  %s3244_s18 = sld [smem:[#allocation7 + $0xad]]  ;;  %v2018_v51 = vstv %s3142_s19 }
  0x7b   : > { %v3133_v39 = vld [vmem:[#allocation2 + $0xa9] sm:$0xff]  ;;  %v3184_v57 = vmul.f32 %v1406_v42, %v3130_v37  ;;  %6003 = vst [vmem:[#allocation34_spill] sm:$0xff] %v3193_v59  ;;  %v3207_v1 = vld [vmem:[#allocation2 + $0xf1] sm:$0xff]  ;;  %6006 = sst [smem:[#allocation37_spill]] %s3216_s13  ;;  %v3222_v6 = vmul.f32 %v1017_v46, %v3175_v54  ;;  %v1916_v42 = vstv %s3126_s9  ;;  %v3254_v12 = vmul.f32 %v1610_v62, %v3204_v63  ;;  %s3270_s9 = sld [smem:[#allocation7 + $0xe0]] }
  0x7c   : > { %v3150_v44 = vmul.f32 %v915_v28, %v3133_v39  ;;  %v3190_v58 = vld [vmem:[#allocation2 + $0x62] sm:$0xff]  ;;  %6004 = vst [vmem:[#allocation35_spill] sm:$0xff] %v3196_v60  ;;  %v3219_v5 = vmul.f32 %v1119_v52, %v3207_v1  ;;  %v3224_v7 = vld [vmem:[#allocation2 + $0xaa] sm:$0xff]  ;;  %6009 = sst [smem:[#allocation40_spill]] %s3232_s20  ;;  %v3240_v28 = vld [vmem:[#allocation2 + $0xb2] sm:$0xff]  ;;  %v3247_v36 = vmul.f32 %v1712_v4, %v3133_v39  ;;  %v3267_v38 = vmul.f32 %v1712_v4, %v3173_v53  ;;  %s3272_s19 = sld [smem:[#allocation7 + $0xe1]] }
  0x7d   : > { %6008 = vst [vmem:[#allocation39_spill] sm:$0xff] %v3222_v6  ;;  %v3236_v13 = vmul.f32 %v1610_v62, %v3190_v58  ;;  %v3250_v46 = vld [vmem:[#allocation2 + $0xf2] sm:$0xff]  ;;  %v3263_v27 = vmul.f32 %v1814_v8, %v3224_v7  ;;  %v411_v18 = vstv %s3158_s12  ;;  %v3275_v62 = vmul.f32 %v1119_v52, %v3260_v0  ;;  %s3284_s15 = sld [smem:[#allocation7 + $0xe3]]  ;;  %s3294_s12 = sld [smem:[#allocation7 + $0xe4]]  ;;  %v3310_v52 = vld [vmem:[#allocation2 + $0xfa] sm:$0xff] }
  0x7e   : > { %5993 = sst [smem:[#allocation24_spill]] %s3051_s23  ;;  %6007 = vst [vmem:[#allocation38_spill] sm:$0xff] %v3219_v5  ;;  %6012 = vst [vmem:[#allocation43_spill] sm:$0xff] %v3267_v38  ;;  %v3279_v3 = vmul.f32 %v1814_v8, %v3240_v28  ;;  %v3287_v4 = vmul.f32 %v1916_v42, %v3207_v1  ;;  %v3290_v48 = vmul.f32 %v2018_v51, %v3250_v46  ;;  %s3296_s17 = sld [smem:[#allocation7 + $0xe5]]  ;;  %v717_v50 = vstv %s3200_s14 }
  0x7f   : > { %s3242_s23 = sld [smem:[#allocation7 + $0xac]]  ;;  %6011 = sst [smem:[#allocation42_spill]] %s3258_s4  ;;  %6014 = vst [vmem:[#allocation45_spill] sm:$0xff] %v3275_v62  ;;  %v3299_v8 = vmul.f32 %v1916_v42, %v3260_v0  ;;  %v3302_v61 = vmul.f32 %v411_v18, %v3055_v9  ;;  %v819_v42 = vstv %s3214_s2  ;;  %v3323_v23 = vmul.f32 %v615_v25, %v3057_v10 }
  0x80   : > { %6010 = sst [smem:[#allocation41_spill]] %s3244_s18  ;;  %6015 = vst [vmem:[#allocation46_spill] sm:$0xff] %v3279_v3  ;;  %6017 = vst [vmem:[#allocation48_spill] sm:$0xff] %v3287_v4  ;;  %s3306_s3 = sld [smem:[#allocation7 + $0xe6]]  ;;  %v3328_v6 = vmul.f32 %v411_v18, %v3066_v14  ;;  %v3335_v3 = vmul.f32 %v717_v50, %v3074_v16  ;;  %v3340_v38 = vmul.f32 %v513_v34, %v3082_v19  ;;  %v1125_v4 = vstv %s3256_s22 }
  0x81   : > { %6018 = vst [vmem:[#allocation49_spill] sm:$0xff] %v3290_v48  ;;  %6020 = vst [vmem:[#allocation51_spill] sm:$0xff] %v3299_v8  ;;  %s3308_s10 = sld [smem:[#allocation7 + $0xe7]]  ;;  %s3318_s1 = sld [smem:[#allocation7 + $0xe8]]  ;;  %v921_v48 = vstv %s3230_s27  ;;  %v3347_v18 = vmul.f32 %v2018_v51, %v3310_v52  ;;  %v3350_v8 = vmul.f32 %v819_v42, %v3101_v26  ;;  %v3354_v60 = vmul.f32 %v615_v25, %v3084_v20 }
  0x82   : > { %6013 = sst [smem:[#allocation44_spill]] %s3272_s19  ;;  %s3320_s25 = sld [smem:[#allocation7 + $0xe9]]  ;;  %6023 = vst [vmem:[#allocation54_spill] sm:$0xff] %v3340_v38  ;;  %v3361_v34 = vmul.f32 %v921_v48, %v3133_v39  ;;  %v3365_v51 = vmul.f32 %v717_v50, %v3116_v32  ;;  %v3377_v59 = vmul.f32 %v819_v42, %v3108_v30  ;;  %v1412_v38 = vstv %s3282_s28 }
  0x83   : > { %6016 = sst [smem:[#allocation47_spill]] %s3284_s15  ;;  %s3330_s14 = sld [smem:[#allocation7 + $0xea]]  ;;  %6025 = vst [vmem:[#allocation56_spill] sm:$0xff] %v3347_v18  ;;  %6026 = vst [vmem:[#allocation57_spill] sm:$0xff] %v3350_v8  ;;  %v1310_v18 = vstv %s3270_s9  ;;  %v3385_v50 = vmul.f32 %v1125_v4, %v3207_v1  ;;  %v3412_v62 = vmul.f32 %v1412_v38, %v3114_v31 }
  0x84   : > { %6019 = sst [smem:[#allocation50_spill]] %s3296_s17  ;;  %s3332_s5 = sld [smem:[#allocation7 + $0xec]]  ;;  %6027 = vst [vmem:[#allocation58_spill] sm:$0xff] %v3354_v60  ;;  %6029 = vst [vmem:[#allocation60_spill] sm:$0xff] %v3361_v34  ;;  %v1514_v34 = vstv %s3294_s12  ;;  %v3397_v42 = vmul.f32 %v1310_v18, %v3072_v15 }
  0x85   : > { %v1023_v5 = vstv %s3242_s23  ;;  %s3342_s2 = sld [smem:[#allocation7 + $0xeb]]  ;;  %s3344_s27 = sld [smem:[#allocation7 + $0xb0]]  ;;  %6030 = vst [vmem:[#allocation61_spill] sm:$0xff] %v3365_v51  ;;  %6034 = vst [vmem:[#allocation65_spill] sm:$0xff] %v3377_v59  ;;  %v3389_v51 = vmul.f32 %v921_v48, %v3173_v53 }
  0x86   : > { %s3356_s23 = sld [smem:[#allocation7 + $0xb1]]  ;;  %s3358_s13 = sld [smem:[#allocation7 + $0xb2]]  ;;  %v3373_v25 = vmul.f32 %v1023_v5, %v3152_v45  ;;  %6035 = vst [vmem:[#allocation66_spill] sm:$0xff] %v3385_v50  ;;  %6038 = vst [vmem:[#allocation69_spill] sm:$0xff] %v3397_v42  ;;  %v1616_v59 = vstv %s3306_s3  ;;  %v3409_v48 = vmul.f32 %v1023_v5, %v3175_v54 }
  0x87   : > { %6021 = sst [smem:[#allocation52_spill]] %s3308_s10  ;;  %s3368_s16 = sld [smem:[#allocation7 + $0xed]]  ;;  %6036 = vst [vmem:[#allocation67_spill] sm:$0xff] %v3389_v51  ;;  %6042 = vst [vmem:[#allocation73_spill] sm:$0xff] %v3412_v62  ;;  %v1718_v50 = vstv %s3318_s1  ;;  %v3431_v5 = vmul.f32 %v1616_v59, %v3190_v58  ;;  %v3438_v62 = vmul.f32 %v1514_v34, %v3116_v32 }
  0x88   : > { %6022 = sst [smem:[#allocation53_spill]] %s3320_s25  ;;  %s3370_s22 = sld [smem:[#allocation7 + $0xb3]]  ;;  %6033 = vst [vmem:[#allocation64_spill] sm:$0xff] %v3373_v25  ;;  %v3402_v25 = vmul.f32 %v1310_v18, %v3082_v19  ;;  %6041 = vst [vmem:[#allocation72_spill] sm:$0xff] %v3409_v48  ;;  %v3421_v18 = vmul.f32 %v1514_v34, %v3074_v16  ;;  %v3435_v48 = vmul.f32 %v1412_v38, %v3130_v37 }
  0x89   : > { %s3380_s0 = sld [smem:[#allocation7 + $0xee]]  ;;  %s3382_s20 = sld [smem:[#allocation7 + $0xb4]]  ;;  %6046 = vst [vmem:[#allocation77_spill] sm:$0xff] %v3431_v5  ;;  %6048 = vst [vmem:[#allocation79_spill] sm:$0xff] %v3438_v62  ;;  %v3445_v60 = vmul.f32 %v1718_v50, %v3133_v39  ;;  %v3455_v38 = vmul.f32 %v1125_v4, %v3260_v0 }
  0x8a   : > { %s3392_s9 = sld [smem:[#allocation7 + $0xb5]]  ;;  %s3394_s18 = sld [smem:[#allocation7 + $0xb6]]  ;;  %6039 = vst [vmem:[#allocation70_spill] sm:$0xff] %v3402_v25  ;;  %6044 = vst [vmem:[#allocation75_spill] sm:$0xff] %v3421_v18  ;;  %v1820_v25 = vstv %s3330_s14 }
  0x8b   : > { %6024 = sst [smem:[#allocation55_spill]] %s3342_s2  ;;  %s3404_s28 = sld [smem:[#allocation7 + $0xb7]]  ;;  %6047 = vst [vmem:[#allocation78_spill] sm:$0xff] %v3435_v48  ;;  %6050 = vst [vmem:[#allocation81_spill] sm:$0xff] %v3445_v60  ;;  %v417_v18 = vstv %s3344_s27  ;;  %v3458_v34 = vmul.f32 %v1820_v25, %v3224_v7  ;;  %v6053_v48 = vstv %s3332_s5  ;;  %v3472_v60 = vmul.f32 %v1616_v59, %v3204_v63 }
  0x8c   : > { %6028 = sst [smem:[#allocation59_spill]] %s3356_s23  ;;  %s3406_s4 = sld [smem:[#allocation7 + $0xf0]]  ;;  %v519_v51 = vstv %s3358_s13  ;;  %6051 = vst [vmem:[#allocation82_spill] sm:$0xff] %v3455_v38  ;;  %v3464_v5 = vmul.f32 %v6053_v48, %v3207_v1  ;;  %v3482_v48 = vmul.f32 %v417_v18, %v3055_v9  ;;  %v3488_v42 = vmul.f32 %v417_v18, %v3066_v14 }
  0x8d   : > { %6031 = sst [smem:[#allocation62_spill]] %s3368_s16  ;;  %s3416_s12 = sld [smem:[#allocation7 + $0xef]]  ;;  %6052 = vst [vmem:[#allocation83_spill] sm:$0xff] %v3458_v34  ;;  %6057 = vst [vmem:[#allocation87_spill] sm:$0xff] %v3472_v60  ;;  %v3499_v62 = vmul.f32 %v519_v51, %v3082_v19  ;;  %v3505_v18 = vmul.f32 %v1718_v50, %v3173_v53 }
  0x8e   : > { %6032 = sst [smem:[#allocation63_spill]] %s3370_s22  ;;  %s3418_s3 = sld [smem:[#allocation7 + $0xf2]]  ;;  %6054 = vst [vmem:[#allocation84_spill] sm:$0xff] %v3464_v5  ;;  %6059 = vst [vmem:[#allocation89_spill] sm:$0xff] %v3482_v48  ;;  %v3485_v5 = vmul.f32 %v519_v51, %v3072_v15 }
  0x8f   : > { %s3426_s19 = sld [smem:[#allocation7 + $0xb8]]  ;;  %s3428_s30 = sld [smem:[#allocation7 + $0xf1]]  ;;  %v621_v38 = vstv %s3382_s20  ;;  %6061 = vst [vmem:[#allocation91_spill] sm:$0xff] %v3488_v42  ;;  %6063 = vst [vmem:[#allocation93_spill] sm:$0xff] %v3499_v62  ;;  %v6067_v51 = vstv %s3380_s0 }
  0x90   : > { %6037 = sst [smem:[#allocation68_spill]] %s3392_s9  ;;  %s3440_s1 = sld [smem:[#allocation7 + $0xf3]]  ;;  %6060 = vst [vmem:[#allocation90_spill] sm:$0xff] %v3485_v5  ;;  %v723_v4 = vstv %s3394_s18  ;;  %6064 = vst [vmem:[#allocation94_spill] sm:$0xff] %v3505_v18  ;;  %v3508_v42 = vmul.f32 %v621_v38, %v3057_v10  ;;  %v3519_v62 = vmul.f32 %v6067_v51, %v3250_v46  ;;  %v3526_v50 = vmul.f32 %v621_v38, %v3084_v20 }
  0x91   : > { %6040 = sst [smem:[#allocation71_spill]] %s3404_s28  ;;  %s3442_s14 = sld [smem:[#allocation7 + $0xf4]]  ;;  %v3532_v18 = vmul.f32 %v723_v4, %v3074_v16  ;;  %v3543_v38 = vmul.f32 %v1820_v25, %v3240_v28  ;;  %v3560_v25 = vmul.f32 %v723_v4, %v3116_v32  ;;  %v6081_v4 = vstv %s3332_s5 }
  0x92   : > { %s3450_s10 = sld [smem:[#allocation7 + $0xb9]]  ;;  %s3452_s15 = sld [smem:[#allocation7 + $0x80]]  ;;  %v1316_v60 = vstv %s3406_s4  ;;  %6065 = vst [vmem:[#allocation95_spill] sm:$0xff] %v3508_v42  ;;  %6068 = vst [vmem:[#allocation97_spill] sm:$0xff] %v3519_v62 }
  0x93   : > { %6043 = sst [smem:[#allocation74_spill]] %s3416_s12  ;;  %s3466_s27 = sld [smem:[#allocation7 + $0xf5]]  ;;  %6070 = vst [vmem:[#allocation99_spill] sm:$0xff] %v3526_v50  ;;  %6071 = vst [vmem:[#allocation100_spill] sm:$0xff] %v3532_v18  ;;  %v3537_v51 = vmul.f32 %v1316_v60, %v3072_v15  ;;  %v3565_v62 = vmul.f32 %v1316_v60, %v3082_v19 }
  0x94   : > { %s3468_s13 = sld [smem:[#allocation7 + $0x81]]  ;;  %s3476_s25 = sld [smem:[#allocation7 + $0xba]]  ;;  %v1418_v59 = vstv %s3418_s3  ;;  %6074 = vst [vmem:[#allocation103_spill] sm:$0xff] %v3543_v38  ;;  %6078 = vst [vmem:[#allocation107_spill] sm:$0xff] %v3560_v25  ;;  %v3581_v25 = vmul.f32 %v6081_v4, %v3260_v0 }
  0x95   : > { %6045 = sst [smem:[#allocation76_spill]] %s3428_s30  ;;  %s3490_s16 = sld [smem:[#allocation7 + $0xf6]]  ;;  %v825_v48 = vstv %s3426_s19  ;;  %6072 = vst [vmem:[#allocation101_spill] sm:$0xff] %v3537_v51  ;;  %v3547_v34 = vmul.f32 %v1418_v59, %v3114_v31  ;;  %6079 = vst [vmem:[#allocation108_spill] sm:$0xff] %v3565_v62 }
  0x96   : > { %6049 = sst [smem:[#allocation80_spill]] %s3440_s1  ;;  %s3478_s2 = sld [smem:[#allocation7 + $0xf7]]  ;;  %v3555_v51 = vmul.f32 %v825_v48, %v3101_v26  ;;  %6082 = vst [vmem:[#allocation110_spill] sm:$0xff] %v3581_v25  ;;  %v3606_v60 = vmul.f32 %v825_v48, %v3108_v30 }
  0x97   : > { %s3492_s20 = sld [smem:[#allocation7 + $0x83]]  ;;  %s3496_s23 = sld [smem:[#allocation7 + $0xbc]]  ;;  %v1520_v5 = vstv %s3442_s14  ;;  %6075 = vst [vmem:[#allocation104_spill] sm:$0xff] %v3547_v34 }
  0x98   : > { %s3502_s17 = sld [smem:[#allocation7 + $0x82]]  ;;  %s3511_s24 = sld [smem:[#allocation7 + $0xbb]]  ;;  %6077 = vst [vmem:[#allocation106_spill] sm:$0xff] %v3555_v51  ;;  %v399_v50 = vstv %s3452_s15  ;;  %v3571_v18 = vmul.f32 %v1520_v5, %v3074_v16  ;;  %v3592_v51 = vmul.f32 %v1418_v59, %v3130_v37  ;;  %6087 = vst [vmem:[#allocation115_spill] sm:$0xff] %v3606_v60 }
  0x99   : > { %6055 = sst [smem:[#allocation85_spill]] %s3466_s27  ;;  %s3514_s18 = sld [smem:[#allocation7 + $0xf8]] }
  0x9a   : > { %6056 = sst [smem:[#allocation86_spill]] %s3468_s13  ;;  %s3523_s4 = sld [smem:[#allocation7 + $0xbd]]  ;;  %v927_v34 = vstv %s3476_s25  ;;  %6080 = vst [vmem:[#allocation109_spill] sm:$0xff] %v3571_v18  ;;  %6083 = vst [vmem:[#allocation111_spill] sm:$0xff] %v3592_v51  ;;  %v3595_v18 = vmul.f32 %v399_v50, %v3055_v9  ;;  %v6088_v9 = vstv %s3380_s0 }
  0x9b   : > { %s3528_s22 = sld [smem:[#allocation7 + $0xc0]]  ;;  %s3534_s3 = sld [smem:[#allocation7 + $0xbe]]  ;;  %v1622_v62 = vstv %s3490_s16  ;;  %v3603_v42 = vmul.f32 %v927_v34, %v3133_v39  ;;  %v3642_v48 = vmul.f32 %v927_v34, %v3173_v53 }
  0x9c   : > { %6058 = sst [smem:[#allocation88_spill]] %s3478_s2  ;;  %s3540_s19 = sld [smem:[#allocation7 + $0xc1]]  ;;  %6084 = vst [vmem:[#allocation112_spill] sm:$0xff] %v3595_v18  ;;  %v3617_v18 = vmul.f32 %v6088_v9, %v3310_v52  ;;  %v3621_v8 = vmul.f32 %v1622_v62, %v3190_v58 }
  0x9d   : > { %6062 = sst [smem:[#allocation92_spill]] %s3492_s20  ;;  %s3550_s28 = sld [smem:[#allocation7 + $0xf9]]  ;;  %v1029_v38 = vstv %s3496_s23  ;;  %6086 = vst [vmem:[#allocation114_spill] sm:$0xff] %v3603_v42  ;;  %v3631_v42 = vmul.f32 %v1520_v5, %v3116_v32  ;;  %6094 = vst [vmem:[#allocation121_spill] sm:$0xff] %v3642_v48  ;;  %v3671_v5 = vmul.f32 %v1622_v62, %v3204_v63 }
  0x9e   : > { %6066 = sst [smem:[#allocation96_spill]] %s3511_s24  ;;  %s3552_s9 = sld [smem:[#allocation7 + $0x84]]  ;;  %v501_v4 = vstv %s3502_s17  ;;  %6089 = vst [vmem:[#allocation116_spill] sm:$0xff] %v3617_v18  ;;  %6090 = vst [vmem:[#allocation117_spill] sm:$0xff] %v3621_v8  ;;  %v3627_v60 = vmul.f32 %v1029_v38, %v3152_v45 }
  0x9f   : > { %s3557_s14 = sld [smem:[#allocation7 + $0xbf]]  ;;  %s3562_s30 = sld [smem:[#allocation7 + $0xfa]]  ;;  %v1724_v25 = vstv %s3514_s18  ;;  %6092 = vst [vmem:[#allocation119_spill] sm:$0xff] %v3631_v42  ;;  %v3634_v9 = vmul.f32 %v501_v4, %v3072_v15  ;;  %v3668_v42 = vmul.f32 %v1029_v38, %v3175_v54  ;;  %6100 = vst [vmem:[#allocation126_spill] sm:$0xff] %v3671_v5 }
  0xa0   : > { %6069 = sst [smem:[#allocation98_spill]] %s3523_s4  ;;  %s3573_s1 = sld [smem:[#allocation7 + $0xfb]]  ;;  %6091 = vst [vmem:[#allocation118_spill] sm:$0xff] %v3627_v60  ;;  %v3645_v18 = vmul.f32 %v1724_v25, %v3133_v39  ;;  %v3676_v60 = vmul.f32 %v399_v50, %v3066_v14  ;;  %v3713_v14 = vmul.f32 %v1724_v25, %v3173_v53 }
  0xa1   : > { %s3576_s12 = sld [smem:[#allocation7 + $0x85]]  ;;  %s3586_s15 = sld [smem:[#allocation7 + $0xfc]]  ;;  %v1131_v59 = vstv %s3534_s3  ;;  %6093 = vst [vmem:[#allocation120_spill] sm:$0xff] %v3634_v9  ;;  %v6096_v34 = vstv %s3528_s22  ;;  %6099 = vst [vmem:[#allocation125_spill] sm:$0xff] %v3668_v42 }
  0xa2   : > { %6073 = sst [smem:[#allocation102_spill]] %s3540_s19  ;;  %s3588_s25 = sld [smem:[#allocation7 + $0x86]]  ;;  %6095 = vst [vmem:[#allocation122_spill] sm:$0xff] %v3645_v18  ;;  %v3661_v51 = vmul.f32 %v6096_v34, %v3072_v15  ;;  %v3665_v48 = vmul.f32 %v1131_v59, %v3207_v1  ;;  %6101 = vst [vmem:[#allocation127_spill] sm:$0xff] %v3676_v60 }
  0xa3   : > { %6076 = sst [smem:[#allocation105_spill]] %s3550_s28  ;;  %s3598_s5 = sld [smem:[#allocation7 + $0x87]]  ;;  %6107 = vst [vmem:[#allocation133_spill] sm:$0xff] %v3713_v14 }
  0xa4   : > { %s3600_s16 = sld [smem:[#allocation7 + $0x88]]  ;;  %s3609_s23 = sld [smem:[#allocation7 + $0xfe]]  ;;  %v603_v8 = vstv %s3552_s9  ;;  %6097 = vst [vmem:[#allocation123_spill] sm:$0xff] %v3661_v51  ;;  %6098 = vst [vmem:[#allocation124_spill] sm:$0xff] %v3665_v48 }
  0xa5   : > { %s3612_s13 = sld [smem:[#allocation7 + $0xc2]]  ;;  %s3623_s17 = sld [smem:[#allocation7 + $0xfd]]  ;;  %v1826_v9 = vstv %s3562_s30  ;;  %v3683_v18 = vmul.f32 %v603_v8, %v3057_v10  ;;  %v3703_v10 = vmul.f32 %v501_v4, %v3082_v19  ;;  %v3732_v25 = vmul.f32 %v603_v8, %v3084_v20 }
  0xa6   : > { %s3636_s0 = sld [smem:[#allocation7 + $0x89]]  ;;  %s3638_s18 = sld [smem:[#allocation7 + $0xc3]]  ;;  %v3691_v62 = vmul.f32 %v1826_v9, %v3224_v7 }
  0xa7   : > { %s3648_s3 = sld [smem:[#allocation7 + $0x8a]]  ;;  %s3650_s20 = sld [smem:[#allocation7 + $0xc4]]  ;;  %v1928_v34 = vstv %s3586_s15  ;;  %6102 = vst [vmem:[#allocation128_spill] sm:$0xff] %v3683_v18  ;;  %6104 = vst [vmem:[#allocation130_spill] sm:$0xff] %v3703_v10  ;;  %v3707_v18 = vmul.f32 %v1131_v59, %v3260_v0  ;;  %v3724_v59 = vmul.f32 %v1826_v9, %v3240_v28 }
  0xa8   : > { %s3654_s2 = sld [smem:[#allocation7 + $0xff]]  ;;  %s3656_s27 = sld [smem:[#allocation7 + $0x8b]]  ;;  %v705_v38 = vstv %s3588_s25  ;;  %6103 = vst [vmem:[#allocation129_spill] sm:$0xff] %v3691_v62  ;;  %v3710_v62 = vmul.f32 %v1928_v34, %v3207_v1  ;;  %6111 = vst [vmem:[#allocation137_spill] sm:$0xff] %v3732_v25  ;;  %v3761_v25 = vmul.f32 %v1928_v34, %v3260_v0 }
  0xa9   : > { %6085 = sst [smem:[#allocation113_spill]] %s3598_s5  ;;  %s3673_s30 = sld [smem:[#allocation7 + $0x8c]]  ;;  %6105 = vst [vmem:[#allocation131_spill] sm:$0xff] %v3707_v18  ;;  %v3716_v51 = vmul.f32 %v705_v38, %v3074_v16  ;;  %6109 = vst [vmem:[#allocation135_spill] sm:$0xff] %v3724_v59  ;;  %v3765_v8 = vmul.f32 %v705_v38, %v3116_v32 }
  0xaa   : > { %s3678_s9 = sld [smem:[#allocation7 + $0xc6]]  ;;  %s3686_s19 = sld [smem:[#allocation7 + $0xc5]]  ;;  %v807_v50 = vstv %s3600_s16  ;;  %v2030_v15 = vstv %s3609_s23  ;;  %6106 = vst [vmem:[#allocation132_spill] sm:$0xff] %v3710_v62  ;;  %6116 = vst [vmem:[#allocation141_spill] sm:$0xff] %v3761_v25 }
  0xab   : > { %s3688_s28 = sld [smem:[#allocation7 + $0xc7]]  ;;  %s3696_s4 = sld [smem:[#allocation7 + $0x8e]]  ;;  %v1400_v42 = vstv %s3612_s13  ;;  %6108 = vst [vmem:[#allocation134_spill] sm:$0xff] %v3716_v51  ;;  %v3727_v60 = vmul.f32 %v807_v50, %v3101_v26  ;;  %v3737_v62 = vmul.f32 %v2030_v15, %v3250_v46  ;;  %6117 = vst [vmem:[#allocation142_spill] sm:$0xff] %v3765_v8 }
  0xac   : > { %s3698_s24 = sld [smem:[#allocation7 + $0xc8]]  ;;  %s3718_s15 = sld [smem:[#allocation7 + $0x8d]]  ;;  %v3741_v18 = vmul.f32 %v1400_v42, %v3114_v31  ;;  %v6114_v31 = vstv %s3528_s22  ;;  %v3782_v38 = vmul.f32 %v1400_v42, %v3130_v37 }
  0xad   : > { %s3720_s25 = sld [smem:[#allocation7 + $0xca]]  ;;  %6110 = vst [vmem:[#allocation136_spill] sm:$0xff] %v3727_v60  ;;  %s3729_s13 = sld [smem:[#allocation7 + $0x8f]]  ;;  %6112 = vst [vmem:[#allocation138_spill] sm:$0xff] %v3737_v62  ;;  %v909_v4 = vstv %s3648_s3  ;;  %v1502_v9 = vstv %s3650_s20 }
  0xae   : > { %s3734_s16 = sld [smem:[#allocation7 + $0xcc]]  ;;  %6113 = vst [vmem:[#allocation139_spill] sm:$0xff] %v3741_v18  ;;  %s3744_s23 = sld [smem:[#allocation7 + $0xc9]]  ;;  %v3756_v18 = vmul.f32 %v6114_v31, %v3082_v19  ;;  %v3771_v62 = vmul.f32 %v909_v4, %v3133_v39  ;;  %v3775_v31 = vmul.f32 %v1502_v9, %v3074_v16  ;;  %6120 = vst [vmem:[#allocation145_spill] sm:$0xff] %v3782_v38 }
  0xaf   : > { %s3746_s5 = sld [smem:[#allocation7 + $0xce]]  ;;  %s3751_s3 = sld [smem:[#allocation7 + $0xcb]]  ;;  %v1011_v59 = vstv %s3673_s30  ;;  %v3800_v42 = vmul.f32 %v909_v4, %v3173_v53 }
  0xb0   : > { %6115 = vst [vmem:[#allocation140_spill] sm:$0xff] %v3756_v18  ;;  %v1604_v60 = vstv %s3678_s9  ;;  %s3768_s20 = sld [smem:[#allocation7 + $0xcd]]  ;;  %6118 = vst [vmem:[#allocation143_spill] sm:$0xff] %v3771_v62  ;;  %v3785_v62 = vmul.f32 %v2030_v15, %v3310_v52  ;;  %v3788_v16 = vmul.f32 %v1011_v59, %v3152_v45  ;;  %v3804_v15 = vmul.f32 %v1502_v9, %v3116_v32  ;;  %s6150_s30 = sld [smem:[#allocation36_spill]] }
  0xb1   : > { %6119 = vst [vmem:[#allocation144_spill] sm:$0xff] %v3775_v31  ;;  %v3794_v34 = vmul.f32 %v1604_v60, %v3190_v58  ;;  %6125 = vst [vmem:[#allocation150_spill] sm:$0xff] %v3800_v42  ;;  %v3820_v37 = vmul.f32 %v1604_v60, %v3204_v63  ;;  %v6135_v60 = vstv %s3021_s11  ;;  %s6147_s22 = sld [smem:[#allocation33_spill]]  ;;  %s6152_s9 = sld [smem:[#allocation44_spill]]  ;;  %v6164_v42 = vstv %s3027_s6 }
  0xb2   : > { %v1706_v18 = vstv %s3698_s24  ;;  %6121 = vst [vmem:[#allocation146_spill] sm:$0xff] %v3785_v62  ;;  %6122 = vst [vmem:[#allocation147_spill] sm:$0xff] %v3788_v16  ;;  %s6146_s24 = sld [smem:[#allocation32_spill]]  ;;  %v6174_v62 = vstv %s3064_s21 }
  0xb3   : > { %6124 = vst [vmem:[#allocation149_spill] sm:$0xff] %v3794_v34  ;;  %v1808_v52 = vstv %s3720_s25  ;;  %6126 = vst [vmem:[#allocation151_spill] sm:$0xff] %v3804_v15  ;;  %v3811_v58 = vmul.f32 %v1706_v18, %v3133_v39  ;;  %v3834_v63 = vmul.f32 %v1706_v18, %v3173_v53  ;;  %v6140_v18 = vstv %s3160_s26  ;;  %s6155_s25 = sld [smem:[#allocation50_spill]] }
  0xb4   : > { %6130 = vst [vmem:[#allocation155_spill] sm:$0xff] %v3820_v37 }
  0xb5   : > { %6128 = vst [vmem:[#allocation153_spill] sm:$0xff] %v3811_v58  ;;  %6134 = vst [vmem:[#allocation159_spill] sm:$0xff] %v3834_v63  ;;  %v3861_v63 = vmul.f32 %v1808_v52, %v3240_v28 }
  0xb7   : > { %6143 = vst [vmem:[#allocation164_spill] sm:$0xff] %v3861_v63 }
  0xce   : > { %v258_v26 = vpop.permute.xlu0 %257  ;;  %v285_v20 = vpop.permute.xlu1 %284 }
  0xcf   : > { %265 = vst.msk [vmem:[#allocation2 + $0x31] sm:$0xff] %vm264_vm2, %v258_v26  ;;  %291 = vst.msk [vmem:[#allocation2 + $0x79] sm:$0xff] %vm264_vm2, %v285_v20  ;;  %v1113_v20 = vstv %s3696_s4  ;;  %v3791_v26 = vmul.f32 %v807_v50, %v3108_v30  ;;  %v1910_v50 = vstv %s3734_s16  ;;  %s6148_s4 = sld [smem:[#allocation25_spill]]  ;;  %s6158_s16 = sld [smem:[#allocation59_spill]] }
  0xd0   : > { %v3807_v45 = vmul.f32 %v1113_v20, %v3207_v1  ;;  %v3827_v19 = vmul.f32 %v1113_v20, %v3260_v0  ;;  %v6138_v20 = vstv %s3045_s29 }
  0xd1   : > { %6123 = vst [vmem:[#allocation148_spill] sm:$0xff] %v3791_v26  ;;  %v6169_v26 = vstv %s3033_s8 }
  0xd2   : > { %v260_v8 = vpop.permute.xlu0 %259  ;;  %v287_v25 = vpop.permute.xlu1 %286  ;;  %6127 = vst [vmem:[#allocation152_spill] sm:$0xff] %v3807_v45  ;;  %6132 = vst [vmem:[#allocation157_spill] sm:$0xff] %v3827_v19  ;;  %v3864_v19 = vmul.f32 %v1910_v50, %v3260_v0  ;;  %v6149_v0 = vstv %s3029_s7 }
  0xd3   : > { %266 = vst.msk [vmem:[#allocation2 + $0x39] sm:$0xff] %vm264_vm2, %v260_v8  ;;  %292 = vst.msk [vmem:[#allocation2 + $0x81] sm:$0xff] %vm264_vm2, %v287_v25  ;;  %v3815_v25 = vmul.f32 %v1011_v59, %v3175_v54  ;;  %v3830_v54 = vmul.f32 %v1808_v52, %v3224_v7  ;;  %v3849_v59 = vmul.f32 %v1910_v50, %v3207_v1  ;;  %v6145_v1 = vstv %s3027_s6  ;;  %s6170_s6 = sld [smem:[#allocation22_spill]] }
  0xd4   : > { %6144 = vst [vmem:[#allocation165_spill] sm:$0xff] %v3864_v19  ;;  %v6154_v19 = vstv %s3021_s11  ;;  %s6165_s11 = sld [smem:[#allocation26_spill]] }
  0xd5   : > { %6129 = vst [vmem:[#allocation154_spill] sm:$0xff] %v3815_v25  ;;  %6133 = vst [vmem:[#allocation158_spill] sm:$0xff] %v3830_v54 }
  0xd6   : > { %v3822_v32 = vld [vmem:[#allocation2 + $0x30] sm:$0xff]  ;;  %v311_v39 = vpop.permute.xlu0 %310  ;;  %v313_v30 = vpop.permute.xlu1 %312  ;;  %v3841_v4 = vld [vmem:[#allocation2 + $0x78] sm:$0xff]  ;;  %6139 = vst [vmem:[#allocation162_spill] sm:$0xff] %v3849_v59 }
  0xd7   : > { %6131 = vst [vmem:[#allocation156_spill] sm:$0xff] %v3822_v32  ;;  %v3824_v9 = vld [vmem:[#allocation2 + $0x31] sm:$0xff]  ;;  %317 = vst.msk [vmem:[#allocation2 + $0xc1] sm:$0xff] %vm264_vm2, %v311_v39  ;;  %v432_v8 = vmul.f32 %v6135_v60, %v3822_v32  ;;  %v3843_v37 = vld [vmem:[#allocation2 + $0x79] sm:$0xff]  ;;  %v6141_v39 = vstv %s3746_s5  ;;  %v636_v50 = vmul.f32 %v6149_v0, %v3841_v4 }
  0xd8   : > { %318 = vst.msk [vmem:[#allocation2 + $0xc9] sm:$0xff] %vm264_vm2, %v313_v30  ;;  %6136 = vst [vmem:[#allocation160_spill] sm:$0xff] %v3841_v4  ;;  %v1331_v7 = vmul.f32 %v6138_v20, %v3824_v9  ;;  %v438_v30 = vmul.f32 %v6140_v18, %v3822_v32  ;;  %v3858_v60 = vmul.f32 %v6141_v39, %v3250_v46 }
  0xd9   : > { %6137 = vst [vmem:[#allocation161_spill] sm:$0xff] %v3843_v37  ;;  %v434_v20 = vadd.f32 %v432_v8, %v3087_v21  ;;  %v534_v59 = vmul.f32 %v3824_v9, %v6145_v1  ;;  %v6151_v21 = vstv %s3033_s8  ;;  %s6181_s8 = sld [smem:[#allocation24_spill]] }
  0xda   : > { %6142 = vst [vmem:[#allocation163_spill] sm:$0xff] %v3858_v60  ;;  %v1333_v53 = vadd.f32 %v1331_v7, %v3164_v49  ;;  %v3871_v18 = vld [vmem:[#allocation2 + $0x38] sm:$0xff]  ;;  %v337_v28 = vpop.permute.xlu0 %336  ;;  %v339_v52 = vpop.permute.xlu1 %338  ;;  %v3881_v8 = vmul.f32 %v6151_v21, %v3843_v37  ;;  %v6153_v49 = vstv %s3064_s21  ;;  %v440_v39 = vadd.f32 %v438_v30, %v3302_v61  ;;  %v3903_v30 = vld [vmem:[#allocation2 + $0x80] sm:$0xff]  ;;  %s6178_s21 = sld [smem:[#allocation28_spill]] }
  0xdb   : > { %v3873_v46 = vld [vmem:[#allocation2 + $0x39] sm:$0xff]  ;;  %v1535_v7 = vmul.f32 %v6153_v49, %v3843_v37  ;;  %343 = vst.msk [vmem:[#allocation2 + $0x109] sm:$0xff] %vm264_vm2, %v337_v28  ;;  %344 = vst.msk [vmem:[#allocation2 + $0x111] sm:$0xff] %vm264_vm2, %v339_v52  ;;  %v510_v1 = vadd.f32 %v3090_v22, %v434_v20  ;;  %v433_v0 = vmul.f32 %v6154_v19, %v3871_v18  ;;  %v6156_v21 = vstv %s6146_s24  ;;  %v3905_v28 = vld [vmem:[#allocation2 + $0x81] sm:$0xff] }
  0xdc   : > { %v3893_v60 = vld [vmem:[#allocation2 + $0x32] sm:$0xff]  ;;  %v540_v63 = vmul.f32 %v3824_v9, %v6156_v21  ;;  %v6157_v49 = vstv %s6147_s22  ;;  %v1409_v22 = vadd.f32 %v3178_v55, %v1333_v53  ;;  %v6159_v20 = vstv %s6148_s4  ;;  %v3922_v45 = vld [vmem:[#allocation2 + $0x7a] sm:$0xff] }
  0xdd   : > { %v3901_v61 = vmul.f32 %v6157_v49, %v3841_v4  ;;  %v1433_v19 = vmul.f32 %v6159_v20, %v3893_v60  ;;  %v6160_v52 = vstv %s6150_s30  ;;  %v6161_v21 = vstv %s6152_s9  ;;  %v3927_v15 = vld [vmem:[#allocation2 + $0x3a] sm:$0xff] }
  0xde   : > { %v3914_v54 = vmul.f32 %v6160_v52, %v3843_v37  ;;  %v3919_v25 = vmul.f32 %v6161_v21, %v3824_v9  ;;  %v536_v49 = vadd.f32 %v534_v59, %v510_v1  ;;  %v435_v58 = vadd.f32 %v433_v0, %v3106_v29  ;;  %v3937_v59 = vld [vmem:[#allocation2 + $0x82] sm:$0xff]  ;;  %v246_v16 = vpop.permute.xlu0 %245 }
  0xdf   : > { %v6162_v55 = vstv %s3045_s29  ;;  %v6163_v20 = vstv %s6155_s25  ;;  %v535_v21 = vmul.f32 %v3873_v46, %v6164_v42  ;;  %v1435_v34 = vadd.f32 %v1433_v19, %v1409_v22  ;;  %6166 = vst [vmem:[#allocation166_spill] sm:$0xff] %v3937_v59  ;;  %v3946_v38 = vld [vmem:[#allocation2 + $0xc0] sm:$0xff]  ;;  %s6171_s29 = sld [smem:[#allocation23_spill]]  ;;  %252 = vst.msk [vmem:[#allocation2 + $0x1] sm:$0xff] %vm251_vm3, %v246_v16 }
  0xe0   : > { %v1332_v53 = vmul.f32 %v6162_v55, %v3873_v46  ;;  %v3932_v52 = vmul.f32 %v6163_v20, %v3843_v37  ;;  %v516_v29 = vadd.f32 %v3313_v17, %v440_v39  ;;  %v6167_v1 = vstv %s6158_s16  ;;  %v248_v55 = vpop.permute.xlu1 %247  ;;  %v3957_v39 = vld [vmem:[#allocation2 + $0xc8] sm:$0xff] }
  0xe1   : > { %v3943_v0 = vmul.f32 %v6167_v1, %v3822_v32  ;;  %v612_v20 = vadd.f32 %v3094_v24, %v536_v49  ;;  %v511_v42 = vadd.f32 %v3123_v35, %v435_v58  ;;  %v6168_v22 = vstv %s3029_s7  ;;  %253 = vst.msk [vmem:[#allocation2 + $0x9] sm:$0xff] %vm251_vm3, %v248_v55  ;;  %v3959_v24 = vld [vmem:[#allocation2 + $0xc9] sm:$0xff]  ;;  %v3971_v55 = vld [vmem:[#allocation2 + $0xc1] sm:$0xff]  ;;  %s6179_s7 = sld [smem:[#allocation29_spill]] }
  0xe2   : > { %v637_v19 = vmul.f32 %v6168_v22, %v3903_v30  ;;  %v739_v17 = vmul.f32 %v6169_v26, %v3905_v28  ;;  %v1511_v49 = vadd.f32 %v3210_v2, %v1435_v34  ;;  %v6172_v35 = vstv %s6165_s11  ;;  %v3973_v51 = vld [vmem:[#allocation2 + $0xc2] sm:$0xff]  ;;  %v273_v5 = vpop.permute.xlu0 %272  ;;  %v4020_v32 = vld [vmem:[#allocation2 + $0x111] sm:$0xff]  ;;  %s6188_s11 = sld [smem:[#allocation30_spill]] }
  0xe3   : > { %v1637_v58 = vmul.f32 %v6172_v35, %v3922_v45  ;;  %v6173_v1 = vstv %s6148_s4  ;;  %v1536_v26 = vmul.f32 %v6174_v62, %v3905_v28  ;;  %v638_v31 = vadd.f32 %v636_v50, %v612_v20  ;;  %v3987_v20 = vld [vmem:[#allocation2 + $0xca] sm:$0xff]  ;;  %s6182_s4 = sld [smem:[#allocation27_spill]]  ;;  %279 = vst.msk [vmem:[#allocation2 + $0x49] sm:$0xff] %vm251_vm3, %v273_v5 }
  0xe4   : > { %v1434_v22 = vmul.f32 %v6173_v1, %v3927_v15  ;;  %v537_v16 = vadd.f32 %v535_v21, %v511_v42  ;;  %v1334_v10 = vadd.f32 %v1332_v53, %v3181_v56  ;;  %v6175_v2 = vmov %v6172_v35  ;;  %6180 = vst [vmem:[#allocation167_spill] sm:$0xff] %v3987_v20  ;;  %v275_v42 = vpop.permute.xlu1 %274  ;;  %v3990_v53 = vld [vmem:[#allocation2 + $0x108] sm:$0xff] }
  0xe5   : > { %v3979_v34 = vmul.f32 %v6175_v2, %v3937_v59  ;;  %v6176_v35 = vstv %s6170_s6  ;;  %v6177_v14 = vstv %s6171_s29  ;;  %v1537_v50 = vadd.f32 %v1535_v7, %v1511_v49  ;;  %280 = vst.msk [vmem:[#allocation2 + $0x51] sm:$0xff] %vm251_vm3, %v275_v42  ;;  %v4018_v42 = vld [vmem:[#allocation2 + $0x109] sm:$0xff]  ;;  %s6190_s6 = sld [smem:[#allocation31_spill]]  ;;  %s6195_s29 = sld [smem:[#allocation37_spill]] }
  0xe6   : > { %v840_v1 = vmul.f32 %v6176_v35, %v3946_v38  ;;  %v942_v62 = vmul.f32 %v6177_v14, %v3971_v55  ;;  %v542_v21 = vadd.f32 %v540_v63, %v516_v29  ;;  %v714_v56 = vadd.f32 %v3119_v33, %v638_v31  ;;  %v4003_v63 = vld [vmem:[#allocation2 + $0x110] sm:$0xff] }
  0xe7   : > { %v613_v2 = vadd.f32 %v3136_v40, %v537_v16  ;;  %v841_v48 = vmul.f32 %v6176_v35, %v3957_v39  ;;  %v3999_v7 = vmul.f32 %v6177_v14, %v3959_v24  ;;  %v1613_v33 = vadd.f32 %v3236_v13, %v1537_v50 }
  0xe8   : > { %v6183_v31 = vstv %s6178_s21  ;;  %v6184_v29 = vstv %s6179_s7  ;;  %v740_v14 = vadd.f32 %v3881_v8, %v714_v56  ;;  %v1410_v13 = vadd.f32 %v3184_v57, %v1334_v10  ;;  %v4036_v56 = vld [vmem:[#allocation2 + $0x10a] sm:$0xff]  ;;  %v299_v57 = vpop.permute.xlu0 %298  ;;  %s6198_s21 = sld [smem:[#allocation40_spill]]  ;;  %s6207_s7 = sld [smem:[#allocation47_spill]] }
  0xe9   : > { %v1739_v40 = vmul.f32 %v6183_v31, %v3971_v55  ;;  %v1841_v49 = vmul.f32 %v6184_v29, %v3973_v51  ;;  %v6185_v16 = vmov %v6183_v31  ;;  %v639_v5 = vadd.f32 %v637_v19, %v613_v2  ;;  %v301_v2 = vpop.permute.xlu1 %300  ;;  %305 = vst.msk [vmem:[#allocation2 + $0x91] sm:$0xff] %vm251_vm3, %v299_v57 }
  0xea   : > { %v4015_v35 = vmul.f32 %v6185_v16, %v3959_v24  ;;  %v6186_v50 = vmov %v6184_v29  ;;  %v6187_v29 = vstv %s6181_s8  ;;  %v6189_v37 = vstv %s6182_s4  ;;  %306 = vst.msk [vmem:[#allocation2 + $0x99] sm:$0xff] %vm251_vm3, %v301_v2  ;;  %s2781_s8 = smov 16  }
  0xeb   : > { %v4026_v31 = vmul.f32 %v6186_v50, %v3987_v20  ;;  %v1044_v16 = vmul.f32 %v6187_v29, %v3990_v53  ;;  %v4034_v4 = vmul.f32 %v6189_v37, %v4018_v42  ;;  %v1639_v8 = vadd.f32 %v1637_v58, %v1613_v33 }
  0xec   : > { %v618_v19 = vadd.f32 %v3323_v23, %v542_v21  ;;  %v816_v10 = vadd.f32 %v3147_v43, %v740_v14  ;;  %v715_v50 = vadd.f32 %v3139_v41, %v639_v5  ;;  %v6191_v20 = vmov %v6187_v29  ;;  %v4057_v41 = vld [vmem:[#allocation2 + $0x112] sm:$0xff] }
  0xed   : > { %v4044_v29 = vmul.f32 %v6191_v20, %v4003_v63  ;;  %v1436_v37 = vadd.f32 %v1434_v22, %v1410_v13  ;;  %v6192_v23 = vstv %s6182_s4  ;;  %v1715_v21 = vadd.f32 %v3247_v36, %v1639_v8  ;;  %s6229_s4 = sld [smem:[#allocation52_spill]] }
  0xee   : > { %v4051_v58 = vmul.f32 %v6192_v23, %v4020_v32  ;;  %v6193_v43 = vstv %s6188_s11  ;;  %v644_v20 = vadd.f32 %v3901_v61, %v618_v19  ;;  %v842_v14 = vadd.f32 %v840_v1, %v816_v10  ;;  %v327_v61 = vpop.permute.xlu1 %326  ;;  %s6233_s11 = sld [smem:[#allocation53_spill]] }
  0xef   : > { %v1943_v33 = vmul.f32 %v6193_v43, %v4018_v42  ;;  %v741_v22 = vadd.f32 %v739_v17, %v715_v50  ;;  %v6194_v5 = vstv %s6190_s6  ;;  %v1512_v2 = vadd.f32 %v3228_v11, %v1436_v37  ;;  %v325_v17 = vpop.permute.xlu0 %324  ;;  %332 = vst.msk [vmem:[#allocation2 + $0xe1] sm:$0xff] %vm251_vm3, %v327_v61  ;;  %s6235_s6 = sld [smem:[#allocation55_spill]] }
  0xf0   : > { %v4063_v13 = vmul.f32 %v6194_v5, %v4036_v56  ;;  %v1741_v57 = vadd.f32 %v1739_v40, %v1715_v21  ;;  %v6196_v36 = vmov %v6193_v43  ;;  %v720_v23 = vadd.f32 %v3335_v3, %v644_v20  ;;  %331 = vst.msk [vmem:[#allocation2 + $0xd9] sm:$0xff] %vm251_vm3, %v325_v17  ;;  %v6210_v17 = vld [vmem:[#allocation48_spill] sm:$0xff] }
  0xf1   : > { %v4069_v8 = vmul.f32 %v6196_v36, %v4020_v32  ;;  %v6197_v43 = vstv %s3160_s26  ;;  %v918_v1 = vadd.f32 %v3150_v44, %v842_v14  ;;  %v817_v19 = vadd.f32 %v3156_v47, %v741_v22  ;;  %s6200_s26 = sld [smem:[#allocation41_spill]] }
  0xf2   : > { %v439_v59 = vmul.f32 %v6197_v43, %v3871_v18  ;;  %v1538_v10 = vadd.f32 %v1536_v26, %v1512_v2  ;;  %v6199_v11 = vmov %v6194_v5  ;;  %v1817_v3 = vadd.f32 %v3263_v27, %v1741_v57  ;;  %v6203_v2 = vld [vmem:[#allocation57_spill] sm:$0xff]  ;;  %v6204_v43 = vld [vmem:[#allocation54_spill] sm:$0xff] }
  0xf3   : > { %v4080_v40 = vmul.f32 %v6199_v11, %v4057_v41  ;;  %v746_v50 = vadd.f32 %v3914_v54, %v720_v23  ;;  %v6201_v37 = vstv %s6195_s29  ;;  %v944_v26 = vadd.f32 %v942_v62, %v918_v1  ;;  %v6206_v23 = vld [vmem:[#allocation34_spill] sm:$0xff] }
  0xf4   : > { %v846_v44 = vmul.f32 %v6201_v37, %v3946_v38  ;;  %v441_v47 = vadd.f32 %v439_v59, %v3328_v6  ;;  %v843_v21 = vadd.f32 %v841_v48, %v817_v19  ;;  %v1614_v20 = vadd.f32 %v3254_v12, %v1538_v10  ;;  %v6208_v6 = vld [vmem:[#allocation35_spill] sm:$0xff]  ;;  %v6213_v37 = vld [vmem:[#allocation43_spill] sm:$0xff] }
  0xf5   : > { %v6202_v14 = vstv %s6198_s21  ;;  %v1843_v5 = vadd.f32 %v1841_v49, %v1817_v3  ;;  %v822_v36 = vadd.f32 %v6203_v2, %v746_v50  ;;  %v6205_v57 = vstv %s6146_s24  ;;  %s6212_s24 = sld [smem:[#allocation42_spill]]  ;;  %v6216_v2 = vld [vmem:[#allocation58_spill] sm:$0xff] }
  0xf6   : > { %v948_v22 = vmul.f32 %v6202_v14, %v3971_v55  ;;  %v517_v27 = vadd.f32 %v6204_v43, %v441_v47  ;;  %v541_v54 = vmul.f32 %v3873_v46, %v6205_v57  ;;  %v1020_v61 = vadd.f32 %v6206_v23, %v944_v26  ;;  %v6214_v26 = vld [vmem:[#allocation69_spill] sm:$0xff]  ;;  %v6219_v57 = vld [vmem:[#allocation39_spill] sm:$0xff] }
  0xf7   : > { %v919_v59 = vadd.f32 %v6208_v6, %v843_v21  ;;  %v1640_v48 = vadd.f32 %v3979_v34, %v1614_v20  ;;  %v6209_v12 = vstv %s6200_s26  ;;  %v1919_v1 = vadd.f32 %v6210_v17, %v1843_v5  ;;  %v6215_v20 = vld [vmem:[#allocation60_spill] sm:$0xff] }
  0xf8   : > { %v1050_v62 = vmul.f32 %v6209_v12, %v3990_v53  ;;  %v848_v49 = vadd.f32 %v846_v44, %v822_v36  ;;  %v543_v19 = vadd.f32 %v541_v54, %v517_v27  ;;  %v6211_v10 = vstv %s6147_s22  ;;  %v6218_v36 = vld [vmem:[#allocation38_spill] sm:$0xff]  ;;  %v6220_v54 = vld [vmem:[#allocation73_spill] sm:$0xff]  ;;  %s4122_s22 = sld [smem:[#allocation7 + $0xcf]] }
  0xf9   : > { %v643_v11 = vmul.f32 %v6211_v10, %v3903_v30  ;;  %v1046_v3 = vadd.f32 %v1044_v16, %v1020_v61  ;;  %v945_v50 = vadd.f32 %v3999_v7, %v919_v59  ;;  %v1716_v47 = vadd.f32 %v6213_v37, %v1640_v48 }
  0xfa   : > { %v1339_v21 = vadd.f32 %v3919_v25, %v6214_v26  ;;  %v1945_v34 = vadd.f32 %v1943_v33, %v1919_v1  ;;  %v924_v14 = vadd.f32 %v6215_v20, %v848_v49  ;;  %v619_v43 = vadd.f32 %v6216_v2, %v543_v19  ;;  %v6221_v25 = vld [vmem:[#allocation49_spill] sm:$0xff]  ;;  %v6223_v1 = vld [vmem:[#allocation46_spill] sm:$0xff] }
  0xfb   : > { %v6217_v44 = vstv %s6207_s7  ;;  %v1122_v27 = vadd.f32 %v6218_v36, %v1046_v3  ;;  %v1021_v16 = vadd.f32 %v6219_v57, %v945_v50  ;;  %v1742_v7 = vadd.f32 %v4015_v35, %v1716_v47  ;;  %v6224_v19 = vld [vmem:[#allocation64_spill] sm:$0xff]  ;;  %v6225_v3 = vld [vmem:[#allocation61_spill] sm:$0xff]  ;;  %v6234_v57 = vld [vmem:[#allocation51_spill] sm:$0xff] }
  0xfc   : > { %v1439_v5 = vmul.f32 %v6217_v44, %v3893_v60  ;;  %v1415_v23 = vadd.f32 %v6220_v54, %v1339_v21  ;;  %v2021_v33 = vadd.f32 %v6221_v25, %v1945_v34  ;;  %v950_v61 = vadd.f32 %v948_v22, %v924_v14  ;;  %v6231_v20 = vld [vmem:[#allocation75_spill] sm:$0xff] }
  0xfd   : > { %v6222_v6 = vstv %s6212_s24  ;;  %v645_v48 = vadd.f32 %v643_v11, %v619_v43  ;;  %v1148_v12 = vadd.f32 %v4034_v4, %v1122_v27  ;;  %v1047_v17 = vadd.f32 %v4044_v29, %v1021_v16  ;;  %v6228_v4 = vld [vmem:[#allocation45_spill] sm:$0xff]  ;;  %s6271_s24 = sld [smem:[#allocation98_spill]] }
  0xfe   : > { %v1152_v59 = vmul.f32 %v6222_v6, %v4018_v42  ;;  %v1818_v49 = vadd.f32 %v6223_v1, %v1742_v7  ;;  %v1441_v35 = vadd.f32 %v1439_v5, %v1415_v23  ;;  %v1026_v10 = vadd.f32 %v6224_v19, %v950_v61  ;;  %v6238_v23 = vld [vmem:[#allocation65_spill] sm:$0xff] }
  0xff   : > { %v721_v50 = vadd.f32 %v6225_v3, %v645_v48  ;;  %v6226_v37 = vstv %s6150_s30  ;;  %v6227_v22 = vstv %s6195_s29  ;;  %1174 = vrot.lane.b32.xlu0 %v1148_v12, %s2781_s8  ;;  %v1123_v29 = vadd.f32 %v6228_v4, %v1047_v17  ;;  %s4150_s30 = sld [smem:[#allocation7 + $0x10]]  ;;  %s6241_s29 = sld [smem:[#allocation62_spill]]  ;;  %v6244_v17 = vld [vmem:[#allocation70_spill] sm:$0xff] }
 0x100   : > { %v745_v47 = vmul.f32 %v6226_v37, %v3905_v28  ;;  %v847_v26 = vmul.f32 %v6227_v22, %v3957_v39  ;;  %v1844_v11 = vadd.f32 %v4026_v31, %v1818_v49  ;;  %v6230_v21 = vstv %s6198_s21  ;;  %s6242_s21 = sld [smem:[#allocation74_spill]]  ;;  %v6248_v22 = vld [vmem:[#allocation56_spill] sm:$0xff] }
 0x101   : > { %v949_v34 = vmul.f32 %v6230_v21, %v3959_v24  ;;  %v1517_v14 = vadd.f32 %v6231_v20, %v1441_v35  ;;  %v2047_v2 = vadd.f32 %v4063_v13, %v2021_v33  ;;  %v1052_v43 = vadd.f32 %v1050_v62, %v1026_v10  ;;  %v6237_v62 = vld [vmem:[#allocation66_spill] sm:$0xff]  ;;  %v6251_v20 = vld [vmem:[#allocation67_spill] sm:$0xff] }
 0x102   : > { %v747_v44 = vadd.f32 %v745_v47, %v721_v50  ;;  %v6232_v5 = vstv %s6200_s26  ;;  %v1149_v27 = vadd.f32 %v4051_v58, %v1123_v29  ;;  %v1920_v31 = vadd.f32 %v6234_v57, %v1844_v11  ;;  %v6243_v58 = vld [vmem:[#allocation77_spill] sm:$0xff]  ;;  %v6250_v11 = vld [vmem:[#allocation78_spill] sm:$0xff]  ;;  %s6256_s26 = sld [smem:[#allocation68_spill]] }
 0x103   : > { %v1051_v36 = vmul.f32 %v6232_v5, %v4003_v63  ;;  %v1543_v16 = vadd.f32 %v3932_v52, %v1517_v14  ;;  %v6236_v7 = vstv %s6152_s9  ;;  %v1128_v54 = vadd.f32 %v6237_v62, %v1052_v43  ;;  %2073 = vrot.lane.b32.xlu0 %v2047_v2, %s2781_s8  ;;  %s6249_s9 = sld [smem:[#allocation63_spill]]  ;;  %v6254_v5 = vld [vmem:[#allocation89_spill] sm:$0xff] }
 0x104   : > { %v1338_v13 = vmul.f32 %v6236_v7, %v3873_v46  ;;  %v823_v25 = vadd.f32 %v6238_v23, %v747_v44  ;;  %v6239_v33 = vmov %v6222_v6  ;;  %v6240_v6 = vstv %s6229_s4  ;;  %1176 = vrot.lane.b32.xlu1 %v1149_v27, %s2781_s8 }
 0x105   : > { %v1153_v61 = vmul.f32 %v6239_v33, %v4020_v32  ;;  %v1643_v48 = vmul.f32 %v6240_v6, %v3922_v45  ;;  %v1946_v52 = vadd.f32 %v4069_v8, %v1920_v31  ;;  %v1619_v12 = vadd.f32 %v6243_v58, %v1543_v16  ;;  %v6261_v6 = vld [vmem:[#allocation79_spill] sm:$0xff] }
 0x106   : > { %v1340_v1 = vadd.f32 %v1338_v13, %v6244_v17  ;;  %v2038_v49 = vstv %s4122_s22  ;;  %v849_v35 = vadd.f32 %v847_v26, %v823_v25  ;;  %v6245_v19 = vstv %s6233_s11  ;;  %s6298_s11 = sld [smem:[#allocation85_spill]]  ;;  %s4704_s22 = sld [smem:[#allocation7 + $0x56]] }
 0x107   : > { %v1745_v10 = vmul.f32 %v6245_v19, %v3971_v55  ;;  %v6246_v3 = vstv %s6235_s6  ;;  %v6247_v37 = vstv %s6207_s7  ;;  %v2022_v4 = vadd.f32 %v6248_v22, %v1946_v52  ;;  %s6260_s7 = sld [smem:[#allocation71_spill]]  ;;  %v6262_v52 = vld [vmem:[#allocation166_spill] sm:$0xff]  ;;  %v6267_v22 = vld [vmem:[#allocation160_spill] sm:$0xff]  ;;  %s6302_s6 = sld [smem:[#allocation88_spill]] }
 0x108   : > { %v1847_v50 = vmul.f32 %v6246_v3, %v3973_v51  ;;  %v1440_v47 = vmul.f32 %v6247_v37, %v3927_v15  ;;  %v1154_v8 = vadd.f32 %v1152_v59, %v1128_v54  ;;  %v1645_v29 = vadd.f32 %v1643_v48, %v1619_v12  ;;  %v6255_v59 = vld [vmem:[#allocation81_spill] sm:$0xff]  ;;  %v6258_v54 = vld [vmem:[#allocation90_spill] sm:$0xff] }
 0x109   : > { %v1416_v21 = vadd.f32 %v6250_v11, %v1340_v1  ;;  %v925_v26 = vadd.f32 %v6251_v20, %v849_v35  ;;  %v6252_v14 = vstv %s6241_s29  ;;  %v6253_v43 = vstv %s6242_s21  ;;  %v6265_v1 = vld [vmem:[#allocation72_spill] sm:$0xff]  ;;  %s6306_s29 = sld [smem:[#allocation105_spill]] }
 0x10a   : > { %v1949_v2 = vmul.f32 %v6252_v14, %v4018_v42  ;;  %v2051_v44 = vmul.f32 %v6253_v43, %v4036_v56  ;;  %v446_v27 = vadd.f32 %v3943_v0, %v6254_v5  ;;  %v2048_v57 = vadd.f32 %v4080_v40, %v2022_v4  ;;  %1184 = vrot.lane.b32.xlu0 %v1154_v8, %s2781_s8 }
 0x10b   : > { %v1721_v31 = vadd.f32 %v6255_v59, %v1645_v29  ;;  %v1442_v16 = vadd.f32 %v1440_v47, %v1416_v21  ;;  %v6257_v7 = vstv %s6155_s25  ;;  %v951_v62 = vadd.f32 %v949_v34, %v925_v26  ;;  %s6269_s25 = sld [smem:[#allocation96_spill]] }
 0x10c   : > { %v1542_v13 = vmul.f32 %v6257_v7, %v3905_v28  ;;  %v522_v23 = vadd.f32 %v6258_v54, %v446_v27  ;;  %v6259_v25 = vstv %s6249_s9  ;;  %v355_v33 = vstv %s4150_s30  ;;  %2075 = vrot.lane.b32.xlu1 %v2048_v57, %s2781_s8  ;;  %v6275_v57 = vld [vmem:[#allocation95_spill] sm:$0xff]  ;;  %s4657_s30 = sld [smem:[#allocation7 + $0x53]] }
 0x10d   : > { %v546_v0 = vmul.f32 %v3824_v9, %v6259_v25  ;;  %v1747_v40 = vadd.f32 %v1745_v10, %v1721_v31  ;;  %v1518_v48 = vadd.f32 %v6261_v6, %v1442_v16  ;;  %v6263_v58 = vstv %s6229_s4  ;;  %v6270_v10 = vld [vmem:[#allocation83_spill] sm:$0xff]  ;;  %v6276_v31 = vld [vmem:[#allocation161_spill] sm:$0xff]  ;;  %s6278_s4 = sld [smem:[#allocation76_spill]] }
 0x10e   : > { %v1644_v12 = vmul.f32 %v6263_v58, %v6262_v52  ;;  %v6264_v17 = vmov %v6245_v19  ;;  %v1027_v35 = vadd.f32 %v6265_v1, %v951_v62  ;;  %v6266_v19 = vld [vmem:[#allocation167_spill] sm:$0xff]  ;;  %v6268_v4 = vstv %s6256_s26  ;;  %v6279_v62 = vld [vmem:[#allocation87_spill] sm:$0xff] }
 0x10f   : > { %v1746_v34 = vmul.f32 %v6264_v17, %v3959_v24  ;;  %v1848_v37 = vmul.f32 %v6246_v3, %v6266_v19  ;;  %v548_v47 = vadd.f32 %v546_v0, %v522_v23  ;;  %v648_v8 = vmul.f32 %v6268_v4, %v6267_v22  ;;  %v6281_v0 = vld [vmem:[#allocation91_spill] sm:$0xff]  ;;  %v6287_v4 = vld [vmem:[#allocation93_spill] sm:$0xff] }
 0x110   : > { %v1823_v29 = vadd.f32 %v6270_v10, %v1747_v40  ;;  %v1544_v11 = vadd.f32 %v1542_v13, %v1518_v48  ;;  %v6272_v21 = vmov %v6252_v14  ;;  %v6273_v26 = vstv %s6158_s16  ;;  %s6286_s16 = sld [smem:[#allocation80_spill]] }
 0x111   : > { %v4222_v20 = vmul.f32 %v6272_v21, %v4020_v32  ;;  %v445_v14 = vmul.f32 %v6273_v26, %v3871_v18  ;;  %v1053_v43 = vadd.f32 %v1051_v36, %v1027_v35  ;;  %v6274_v5 = vstv %s6242_s21  ;;  %v6282_v36 = vld [vmem:[#allocation82_spill] sm:$0xff]  ;;  %s6342_s21 = sld [smem:[#allocation113_spill]] }
 0x112   : > { %v4230_v27 = vmul.f32 %v6274_v5, %v4057_v41  ;;  %v624_v59 = vadd.f32 %v6275_v57, %v548_v47  ;;  %v6277_v16 = vstv %s6260_s7  ;;  %v1849_v13 = vadd.f32 %v1847_v50, %v1823_v29  ;;  %v6285_v50 = vld [vmem:[#allocation84_spill] sm:$0xff]  ;;  %v6289_v26 = vld [vmem:[#allocation100_spill] sm:$0xff] }
 0x113   : > { %v750_v7 = vmul.f32 %v6277_v16, %v6276_v31  ;;  %v1620_v54 = vadd.f32 %v6279_v62, %v1544_v11  ;;  %v6280_v23 = vstv %s3450_s10  ;;  %v447_v40 = vadd.f32 %v445_v14, %v6281_v0 }
 0x114   : > { %v852_v25 = vmul.f32 %v6280_v23, %v3946_v38  ;;  %v1129_v6 = vadd.f32 %v6282_v36, %v1053_v43  ;;  %v650_v48 = vadd.f32 %v648_v8, %v624_v59  ;;  %v6283_v58 = vstv %s6269_s25 }
 0x115   : > { %v954_v17 = vmul.f32 %v6283_v58, %v3971_v55  ;;  %v6284_v1 = vstv %s6271_s24  ;;  %v1925_v3 = vadd.f32 %v6285_v50, %v1849_v13  ;;  %v1646_v47 = vadd.f32 %v1644_v12, %v1620_v54  ;;  %v6292_v12 = vld [vmem:[#allocation94_spill] sm:$0xff]  ;;  %v6299_v50 = vld [vmem:[#allocation99_spill] sm:$0xff] }
 0x116   : > { %v4248_v35 = vmul.f32 %v6284_v1, %v3990_v53  ;;  %v523_v10 = vadd.f32 %v6287_v4, %v447_v40  ;;  %v6288_v29 = vstv %s6249_s9  ;;  %v1155_v21 = vadd.f32 %v1153_v61, %v1129_v6  ;;  %v6295_v40 = vld [vmem:[#allocation101_spill] sm:$0xff]  ;;  %s4533_s9 = sld [smem:[#allocation7 + $0x1a]] }
 0x117   : > { %v547_v11 = vmul.f32 %v3873_v46, %v6288_v29  ;;  %v726_v8 = vadd.f32 %v6289_v26, %v650_v48  ;;  %v6290_v14 = vstv %s3557_s14  ;;  %v6291_v5 = vstv %s6278_s4 }
 0x118   : > { %v4259_v43 = vmul.f32 %v6290_v14, %v4018_v42  ;;  %v1343_v57 = vmul.f32 %v6291_v5, %v3824_v9  ;;  %v1951_v59 = vadd.f32 %v1949_v2, %v1925_v3  ;;  %v1722_v16 = vadd.f32 %v6292_v12, %v1646_v47  ;;  %1186 = vrot.lane.b32.xlu1 %v1155_v21, %s2781_s8  ;;  %v6297_v2 = vld [vmem:[#allocation97_spill] sm:$0xff] }
 0x119   : > { %v549_v13 = vadd.f32 %v547_v11, %v523_v10  ;;  %v6293_v62 = vstv %s6256_s26  ;;  %v752_v61 = vadd.f32 %v750_v7, %v726_v8  ;;  %v6294_v23 = vstv %s6260_s7  ;;  %v6301_v10 = vld [vmem:[#allocation106_spill] sm:$0xff]  ;;  %v6305_v8 = vld [vmem:[#allocation104_spill] sm:$0xff]  ;;  %s4557_s26 = sld [smem:[#allocation7 + $0x1b]]  ;;  %s4559_s7 = sld [smem:[#allocation7 + $0x1c]] }
 0x11a   : > { %v649_v54 = vmul.f32 %v6293_v62, %v3903_v30  ;;  %v751_v0 = vmul.f32 %v6294_v23, %v3905_v28  ;;  %v1345_v36 = vadd.f32 %v1343_v57, %v6295_v40  ;;  %v6296_v6 = vstv %s6286_s16 }
 0x11b   : > { %v1445_v48 = vmul.f32 %v6296_v6, %v3893_v60  ;;  %v2027_v58 = vadd.f32 %v6297_v2, %v1951_v59  ;;  %v1748_v1 = vadd.f32 %v1746_v34, %v1722_v16  ;;  %v625_v3 = vadd.f32 %v6299_v50, %v549_v13  ;;  %v6307_v34 = vld [vmem:[#allocation103_spill] sm:$0xff]  ;;  %v6315_v50 = vld [vmem:[#allocation114_spill] sm:$0xff] }
 0x11c   : > { %v6300_v47 = vstv %s3450_s10  ;;  %v828_v7 = vadd.f32 %v6301_v10, %v752_v61  ;;  %v6303_v29 = vstv %s6269_s25  ;;  %v6304_v21 = vstv %s6271_s24  ;;  %s6311_s10 = sld [smem:[#allocation86_spill]]  ;;  %s4582_s25 = sld [smem:[#allocation7 + $0x1f]] }
 0x11d   : > { %v853_v4 = vmul.f32 %v6300_v47, %v3957_v39  ;;  %v955_v11 = vmul.f32 %v6303_v29, %v3959_v24  ;;  %v4288_v26 = vmul.f32 %v6304_v21, %v4003_v63  ;;  %v1421_v14 = vadd.f32 %v6305_v8, %v1345_v36  ;;  %v6312_v36 = vld [vmem:[#allocation107_spill] sm:$0xff]  ;;  %v6316_v47 = vld [vmem:[#allocation109_spill] sm:$0xff]  ;;  %s4659_s24 = sld [smem:[#allocation7 + $0x54]] }
 0x11e   : > { %v2053_v5 = vadd.f32 %v2051_v44, %v2027_v58  ;;  %v1824_v57 = vadd.f32 %v6307_v34, %v1748_v1  ;;  %v651_v59 = vadd.f32 %v649_v54, %v625_v3  ;;  %v6308_v12 = vstv %s6278_s4  ;;  %s4674_s4 = sld [smem:[#allocation7 + $0x55]] }
 0x11f   : > { %v1344_v16 = vmul.f32 %v6308_v12, %v3873_v46  ;;  %v854_v13 = vadd.f32 %v852_v25, %v828_v7  ;;  %v6309_v62 = vstv %s3557_s14  ;;  %v1447_v23 = vadd.f32 %v1445_v48, %v1421_v14  ;;  %v6314_v25 = vld [vmem:[#allocation108_spill] sm:$0xff]  ;;  %s6325_s14 = sld [smem:[#allocation92_spill]] }
 0x120   : > { %v4298_v61 = vmul.f32 %v6309_v62, %v4020_v32  ;;  %v6310_v40 = vstv %s6298_s11  ;;  %2083 = vrot.lane.b32.xlu0 %v2053_v5, %s2781_s8  ;;  %v1850_v44 = vadd.f32 %v1848_v37, %v1824_v57  ;;  %v727_v54 = vadd.f32 %v6312_v36, %v651_v59  ;;  %v6319_v37 = vld [vmem:[#allocation110_spill] sm:$0xff]  ;;  %v6320_v5 = vld [vmem:[#allocation111_spill] sm:$0xff] }
 0x121   : > { %v1547_v6 = vmul.f32 %v6310_v40, %v6276_v31  ;;  %v6313_v2 = vstv %s6302_s6  ;;  %v1346_v1 = vadd.f32 %v1344_v16, %v6314_v25  ;;  %v930_v3 = vadd.f32 %v6315_v50, %v854_v13  ;;  %v6328_v50 = vld [vmem:[#allocation118_spill] sm:$0xff] }
 0x122   : > { %v1649_v58 = vmul.f32 %v6313_v2, %v3922_v45  ;;  %v1523_v48 = vadd.f32 %v6316_v47, %v1447_v23  ;;  %v6317_v10 = vstv %s6306_s29  ;;  %v6318_v29 = vstv %s3573_s1  ;;  %v6323_v23 = vld [vmem:[#allocation156_spill] sm:$0xff] }
 0x123   : > { %v1751_v7 = vmul.f32 %v6317_v10, %v3971_v55  ;;  %v1853_v21 = vmul.f32 %v6318_v29, %v3973_v51  ;;  %v1926_v8 = vadd.f32 %v6319_v37, %v1850_v44  ;;  %v753_v14 = vadd.f32 %v751_v0, %v727_v54  ;;  %v6326_v44 = vld [vmem:[#allocation115_spill] sm:$0xff]  ;;  %v6331_v10 = vld [vmem:[#allocation112_spill] sm:$0xff]  ;;  %v6332_v37 = vld [vmem:[#allocation116_spill] sm:$0xff] }
 0x124   : > { %v1422_v34 = vadd.f32 %v6320_v5, %v1346_v1  ;;  %v6321_v57 = vstv %s6286_s16  ;;  %v956_v12 = vadd.f32 %v954_v17, %v930_v3  ;;  %v1549_v16 = vadd.f32 %v1547_v6, %v1523_v48  ;;  %v6329_v6 = vld [vmem:[#allocation117_spill] sm:$0xff]  ;;  %s4706_s16 = sld [smem:[#allocation7 + $0x57]] }
 0x125   : > { %v1446_v59 = vmul.f32 %v6321_v57, %v3927_v15  ;;  %v6322_v13 = vstv %s3623_s17  ;;  %v6324_v40 = vstv %s6311_s10  ;;  %v1952_v2 = vadd.f32 %v4222_v20, %v1926_v8 }
 0x126   : > { %v4325_v62 = vmul.f32 %v6322_v13, %v4018_v42  ;;  %v426_v36 = vmul.f32 %v6324_v40, %v6323_v23  ;;  %v829_v0 = vadd.f32 %v6326_v44, %v753_v14  ;;  %v6327_v25 = vstv %s6298_s11  ;;  %v6333_v14 = vld [vmem:[#allocation119_spill] sm:$0xff]  ;;  %s4719_s11 = sld [smem:[#allocation7 + $0x58]] }
 0x127   : > { %v1448_v54 = vadd.f32 %v1446_v59, %v1422_v34  ;;  %v1548_v1 = vmul.f32 %v6327_v25, %v3905_v28  ;;  %v1032_v17 = vadd.f32 %v6328_v50, %v956_v12  ;;  %v1625_v3 = vadd.f32 %v6329_v6, %v1549_v16  ;;  %v6335_v16 = vld [vmem:[#allocation120_spill] sm:$0xff] }
 0x128   : > { %v6330_v47 = vstv %s3654_s2  ;;  %v428_v29 = vadd.f32 %v426_v36, %v6331_v10  ;;  %v2028_v20 = vadd.f32 %v6332_v37, %v1952_v2  ;;  %v855_v8 = vadd.f32 %v853_v4, %v829_v0  ;;  %v6337_v2 = vld [vmem:[#allocation121_spill] sm:$0xff]  ;;  %v6339_v25 = vld [vmem:[#allocation124_spill] sm:$0xff] }
 0x129   : > { %v4340_v48 = vmul.f32 %v6330_v47, %v4036_v56  ;;  %v1524_v5 = vadd.f32 %v6333_v14, %v1448_v54  ;;  %v6334_v34 = vstv %s6302_s6  ;;  %v1058_v59 = vadd.f32 %v4248_v35, %v1032_v17  ;;  %v6340_v35 = vld [vmem:[#allocation122_spill] sm:$0xff]  ;;  %s4721_s6 = sld [smem:[#allocation7 + $0x59]] }
 0x12a   : > { %v1650_v57 = vmul.f32 %v6334_v34, %v6262_v52  ;;  %v1651_v12 = vadd.f32 %v1649_v58, %v1625_v3  ;;  %v504_v13 = vadd.f32 %v6335_v16, %v428_v29  ;;  %v6336_v23 = vstv %s6325_s14  ;;  %v6347_v34 = vld [vmem:[#allocation128_spill] sm:$0xff] }
 0x12b   : > { %v528_v40 = vmul.f32 %v3824_v9, %v6336_v23  ;;  %v2054_v36 = vadd.f32 %v4230_v27, %v2028_v20  ;;  %v931_v4 = vadd.f32 %v6337_v2, %v855_v8  ;;  %v1550_v44 = vadd.f32 %v1548_v1, %v1524_v5  ;;  %v6343_v27 = vld [vmem:[#allocation126_spill] sm:$0xff] }
 0x12c   : > { %v6338_v0 = vstv %s6306_s29  ;;  %v1134_v50 = vadd.f32 %v6339_v25, %v1058_v59  ;;  %v1727_v17 = vadd.f32 %v6340_v35, %v1651_v12  ;;  %v6341_v6 = vstv %s3576_s12  ;;  %v6348_v12 = vld [vmem:[#allocation125_spill] sm:$0xff]  ;;  %v6356_v35 = vld [vmem:[#allocation130_spill] sm:$0xff]  ;;  %s4739_s29 = sld [smem:[#allocation7 + $0x5a]] }
 0x12d   : > { %v1752_v54 = vmul.f32 %v6338_v0, %v3959_v24  ;;  %v530_v58 = vadd.f32 %v528_v40, %v504_v13  ;;  %v630_v3 = vmul.f32 %v6341_v6, %v6267_v22  ;;  %2085 = vrot.lane.b32.xlu1 %v2054_v36, %s2781_s8  ;;  %v957_v47 = vadd.f32 %v955_v11, %v931_v4  ;;  %v6350_v40 = vld [vmem:[#allocation127_spill] sm:$0xff]  ;;  %v6355_v25 = vld [vmem:[#allocation133_spill] sm:$0xff] }
 0x12e   : > { %v1626_v10 = vadd.f32 %v6343_v27, %v1550_v44  ;;  %v6344_v1 = vstv %s3573_s1  ;;  %v6345_v37 = vstv %s6311_s10  ;;  %v1160_v8 = vadd.f32 %v4259_v43, %v1134_v50  ;;  %v6351_v43 = vld [vmem:[#allocation129_spill] sm:$0xff]  ;;  %s6352_s1 = sld [smem:[#allocation102_spill]]  ;;  %v6358_v27 = vld [vmem:[#allocation134_spill] sm:$0xff]  ;;  %s4752_s10 = sld [smem:[#allocation7 + $0x5b]] }
 0x12f   : > { %v1854_v29 = vmul.f32 %v6344_v1, %v6266_v19  ;;  %v427_v20 = vmul.f32 %v6345_v37, %v3871_v18  ;;  %v1753_v14 = vadd.f32 %v1751_v7, %v1727_v17  ;;  %v6346_v5 = vstv %s3623_s17  ;;  %s4447_s17 = sld [smem:[#allocation7 + $0x13]] }
 0x130   : > { %v1956_v22 = vmul.f32 %v6346_v5, %v4020_v32  ;;  %v606_v59 = vadd.f32 %v6347_v34, %v530_v58  ;;  %v1033_v11 = vadd.f32 %v6348_v12, %v957_v47  ;;  %v1652_v16 = vadd.f32 %v1650_v57, %v1626_v10  ;;  %1194 = vrot.lane.b32.xlu0 %v1160_v8, %s2781_s8 }
 0x131   : > { %v6349_v13 = vstv %s3654_s2  ;;  %v429_v18 = vadd.f32 %v427_v20, %v6350_v40  ;;  %v1829_v7 = vadd.f32 %v6351_v43, %v1753_v14  ;;  %v6353_v2 = vstv %s6342_s21  ;;  %v6361_v20 = vld [vmem:[#allocation131_spill] sm:$0xff]  ;;  %s4436_s2 = sld [smem:[#allocation7 + $0x11]] }
 0x132   : > { %v4380_v23 = vmul.f32 %v6349_v13, %v4057_v41  ;;  %v632_v36 = vadd.f32 %v630_v3, %v606_v59  ;;  %v732_v4 = vmul.f32 %v6353_v2, %v6276_v31  ;;  %v6354_v44 = vstv %s3636_s0  ;;  %v6363_v59 = vld [vmem:[#allocation132_spill] sm:$0xff] }
 0x133   : > { %v834_v0 = vmul.f32 %v6354_v44, %v3946_v38  ;;  %v1059_v57 = vadd.f32 %v4288_v26, %v1033_v11  ;;  %v1728_v50 = vadd.f32 %v6355_v25, %v1652_v16  ;;  %v505_v17 = vadd.f32 %v6356_v35, %v429_v18  ;;  %v6366_v18 = vld [vmem:[#allocation135_spill] sm:$0xff]  ;;  %v6369_v44 = vld [vmem:[#allocation136_spill] sm:$0xff] }
 0x134   : > { %v6357_v58 = vstv %s6325_s14  ;;  %v1855_v47 = vadd.f32 %v1853_v21, %v1829_v7  ;;  %v708_v3 = vadd.f32 %v6358_v27, %v632_v36  ;;  %v6359_v10 = vstv %s3656_s27  ;;  %v6368_v36 = vld [vmem:[#allocation123_spill] sm:$0xff]  ;;  %s4464_s27 = sld [smem:[#allocation7 + $0x14]] }
 0x135   : > { %v529_v6 = vmul.f32 %v3873_v46, %v6357_v58  ;;  %v936_v1 = vmul.f32 %v6359_v10, %v3971_v55  ;;  %v6360_v37 = vstv %s3718_s15  ;;  %v1135_v26 = vadd.f32 %v6361_v20, %v1059_v57  ;;  %v6373_v58 = vld [vmem:[#allocation139_spill] sm:$0xff]  ;;  %s4754_s14 = sld [smem:[#allocation7 + $0x5c]] }
 0x136   : > { %v4404_v38 = vmul.f32 %v6360_v37, %v3990_v53  ;;  %v1754_v8 = vadd.f32 %v1752_v54, %v1728_v50  ;;  %v6362_v5 = vstv %s6352_s1  ;;  %v1931_v21 = vadd.f32 %v6363_v59, %v1855_v47  ;;  %v6367_v54 = vld [vmem:[#allocation137_spill] sm:$0xff]  ;;  %v6379_v59 = vld [vmem:[#allocation143_spill] sm:$0xff]  ;;  %s4786_s1 = sld [smem:[#allocation7 + $0x5f]] }
 0x137   : > { %v531_v14 = vadd.f32 %v529_v6, %v505_v17  ;;  %v1325_v34 = vmul.f32 %v6362_v5, %v3824_v9  ;;  %v734_v12 = vadd.f32 %v732_v4, %v708_v3  ;;  %v6364_v11 = vstv %s3576_s12  ;;  %v6374_v6 = vld [vmem:[#allocation138_spill] sm:$0xff]  ;;  %s4445_s12 = sld [smem:[#allocation7 + $0x12]] }
 0x138   : > { %v631_v16 = vmul.f32 %v6364_v11, %v3903_v30  ;;  %v6365_v13 = vstv %s3638_s18  ;;  %v1161_v53 = vadd.f32 %v4298_v61, %v1135_v26  ;;  %v1830_v43 = vadd.f32 %v6366_v18, %v1754_v8  ;;  %v6378_v26 = vld [vmem:[#allocation142_spill] sm:$0xff] }
 0x139   : > { %v1427_v40 = vmul.f32 %v6365_v13, %v3893_v60  ;;  %v607_v7 = vadd.f32 %v6367_v54, %v531_v14  ;;  %v1327_v9 = vadd.f32 %v1325_v34, %v6368_v36  ;;  %v1957_v2 = vadd.f32 %v4325_v62, %v1931_v21 }
 0x13a   : > { %v810_v4 = vadd.f32 %v6369_v44, %v734_v12  ;;  %v6370_v57 = vstv %s3729_s13  ;;  %v6371_v60 = vstv %s6342_s21  ;;  %1196 = vrot.lane.b32.xlu1 %v1161_v53, %s2781_s8  ;;  %v1856_v61 = vadd.f32 %v1854_v29, %v1830_v43  ;;  %v6377_v29 = vld [vmem:[#allocation141_spill] sm:$0xff]  ;;  %v6383_v43 = vld [vmem:[#allocation140_spill] sm:$0xff]  ;;  %s4777_s21 = sld [smem:[#allocation7 + $0x5e]] }
 0x13b   : > { %v4426_v30 = vmul.f32 %v6370_v57, %v4018_v42  ;;  %v733_v25 = vmul.f32 %v6371_v60, %v3905_v28  ;;  %v633_v50 = vadd.f32 %v631_v16, %v607_v7  ;;  %v6372_v35 = vstv %s3636_s0  ;;  %s4482_s0 = sld [smem:[#allocation7 + $0x15]] }
 0x13c   : > { %v835_v17 = vmul.f32 %v6372_v35, %v3957_v39  ;;  %v1403_v62 = vadd.f32 %v6373_v58, %v1327_v9  ;;  %v2033_v47 = vadd.f32 %v6374_v6, %v1957_v2  ;;  %v836_v27 = vadd.f32 %v834_v0, %v810_v4  ;;  %v6388_v2 = vld [vmem:[#allocation146_spill] sm:$0xff]  ;;  %v6389_v4 = vld [vmem:[#allocation148_spill] sm:$0xff] }
 0x13d   : > { %v6375_v3 = vmov %v6359_v10  ;;  %v6376_v37 = vstv %s3686_s19  ;;  %v1932_v39 = vadd.f32 %v6377_v29, %v1856_v61  ;;  %v709_v8 = vadd.f32 %v6378_v26, %v633_v50  ;;  %s4509_s19 = sld [smem:[#allocation7 + $0x19]] }
 0x13e   : > { %v937_v10 = vmul.f32 %v6375_v3, %v3959_v24  ;;  %v1529_v20 = vmul.f32 %v6376_v37, %v6276_v31  ;;  %v1429_v14 = vadd.f32 %v1427_v40, %v1403_v62  ;;  %v1326_v0 = vmul.f32 %v6362_v5, %v3873_v46  ;;  %v6382_v40 = vld [vmem:[#allocation144_spill] sm:$0xff]  ;;  %v4521_v5 = vld [vmem:[#allocation2 + $0x48] sm:$0xff] }
 0x13f   : > { %v2059_v34 = vadd.f32 %v4340_v48, %v2033_v47  ;;  %v912_v21 = vadd.f32 %v6379_v59, %v836_v27  ;;  %v6380_v31 = vstv %s3718_s15  ;;  %v6381_v11 = vstv %s3688_s28  ;;  %v4468_v48 = vld [vmem:[#allocation2] sm:$0xff]  ;;  %s4484_s15 = sld [smem:[#allocation7 + $0x16]]  ;;  %v6394_v47 = vld [vmem:[#allocation149_spill] sm:$0xff]  ;;  %s4507_s28 = sld [smem:[#allocation7 + $0x18]] }
 0x140   : > { %v4459_v12 = vmul.f32 %v6380_v31, %v4003_v63  ;;  %v1631_v16 = vmul.f32 %v6381_v11, %v3922_v45  ;;  %v1958_v13 = vadd.f32 %v1956_v22, %v1932_v39  ;;  %v735_v53 = vadd.f32 %v733_v25, %v709_v8  ;;  %6384 = vst [vmem:[#allocation57_spill] sm:$0xff] %v4468_v48  ;;  %v6391_v25 = vld [vmem:[#allocation147_spill] sm:$0xff] }
 0x141   : > { %v1505_v18 = vadd.f32 %v6382_v40, %v1429_v14  ;;  %v1328_v46 = vadd.f32 %v1326_v0, %v6383_v43  ;;  %2093 = vrot.lane.b32.xlu0 %v2059_v34, %s2781_s8  ;;  %v938_v63 = vadd.f32 %v936_v1, %v912_v21  ;;  %v6385_v54 = vstv %s3744_s23  ;;  %v6396_v39 = vld [vmem:[#allocation151_spill] sm:$0xff]  ;;  %v6398_v0 = vld [vmem:[#allocation152_spill] sm:$0xff]  ;;  %v4527_v21 = vld [vmem:[#allocation2 + $0x19] sm:$0xff] }
 0x142   : > { %v1733_v7 = vmul.f32 %v6385_v54, %v3971_v55  ;;  %v6386_v45 = vstv %s3751_s3  ;;  %v6387_v22 = vstv %s3638_s18  ;;  %v2034_v44 = vadd.f32 %v6388_v2, %v1958_v13  ;;  %v6390_v55 = vld [vmem:[#allocation145_spill] sm:$0xff]  ;;  %s4499_s18 = sld [smem:[#allocation7 + $0x17]]  ;;  %v4514_v8 = vld [vmem:[#allocation2 + $0x1] sm:$0xff] }
 0x143   : > { %v4477_v36 = vmul.f32 %v6386_v45, %v3973_v51  ;;  %v1428_v9 = vmul.f32 %v6387_v22, %v3927_v15  ;;  %v811_v1 = vadd.f32 %v6389_v4, %v735_v53  ;;  %v1531_v57 = vadd.f32 %v1529_v20, %v1505_v18  ;;  %v6399_v13 = vld [vmem:[#allocation153_spill] sm:$0xff]  ;;  %v6400_v45 = vld [vmem:[#allocation154_spill] sm:$0xff]  ;;  %v6401_v2 = vld [vmem:[#allocation155_spill] sm:$0xff] }
 0x144   : > { %v1404_v60 = vadd.f32 %v6390_v55, %v1328_v46  ;;  %v1014_v51 = vadd.f32 %v6391_v25, %v938_v63  ;;  %v6392_v61 = vmov %v6376_v37  ;;  %v6393_v15 = vmov %v6381_v11  ;;  %v4551_v55 = vld [vmem:[#allocation2 + $0x60] sm:$0xff] }
 0x145   : > { %v1530_v50 = vmul.f32 %v6392_v61, %v3905_v28  ;;  %v1632_v35 = vmul.f32 %v6393_v15, %v6262_v52  ;;  %v356_v58 = vmul.f32 %v355_v33, %v4468_v48  ;;  %v2060_v62 = vadd.f32 %v4380_v23, %v2034_v44  ;;  %v6395_v23 = vld [vmem:[#allocation150_spill] sm:$0xff]  ;;  %6404 = vst [vmem:[#allocation34_spill] sm:$0xff] %v4551_v55 }
 0x146   : > { %v837_v6 = vadd.f32 %v835_v17, %v811_v1  ;;  %v1607_v27 = vadd.f32 %v6394_v47, %v1531_v57  ;;  %v1430_v3 = vadd.f32 %v1428_v9, %v1404_v60  ;;  %v1040_v37 = vadd.f32 %v4404_v38, %v1014_v51  ;;  %v4516_v38 = vld [vmem:[#allocation2 + $0x18] sm:$0xff]  ;;  %v6405_v51 = vld [vmem:[#allocation158_spill] sm:$0xff] }
 0x147   : > { %v381_v20 = vstv %s4436_s2  ;;  %v457_v28 = vstv %s4445_s12  ;;  %v483_v52 = vstv %s4447_s17  ;;  %2095 = vrot.lane.b32.xlu1 %v2060_v62, %s2781_s8  ;;  %6397 = vst [vmem:[#allocation54_spill] sm:$0xff] %v4516_v38  ;;  %s4833_s2 = sld [smem:[#allocation7 + $0x20]]  ;;  %s4840_s12 = sld [smem:[#allocation7 + $0x21]] }
 0x148   : > { %v913_v29 = vadd.f32 %v6395_v23, %v837_v6  ;;  %v1633_v17 = vadd.f32 %v1631_v16, %v1607_v27  ;;  %v1506_v26 = vadd.f32 %v6396_v39, %v1430_v3  ;;  %v382_v14 = vmul.f32 %v4516_v38, %v381_v20  ;;  %v6407_v27 = vld [vmem:[#allocation157_spill] sm:$0xff]  ;;  %s4842_s17 = sld [smem:[#allocation7 + $0x22]] }
 0x149   : > { %v1116_v34 = vadd.f32 %v6398_v0, %v1040_v37  ;;  %v458_v59 = vmul.f32 %v457_v28, %v4514_v8  ;;  %v484_v31 = vmul.f32 %v4527_v21, %v483_v52  ;;  %v559_v11 = vstv %s4464_s27  ;;  %v6408_v37 = vld [vmem:[#allocation159_spill] sm:$0xff]  ;;  %v4587_v39 = vld [vmem:[#allocation2 + $0xfa] sm:$0xff]  ;;  %s4860_s27 = sld [smem:[#allocation7 + $0x23]] }
 0x14a   : > { %v939_v16 = vadd.f32 %v937_v10, %v913_v29  ;;  %v1709_v53 = vadd.f32 %v6399_v13, %v1633_v17  ;;  %v1532_v40 = vadd.f32 %v1530_v50, %v1506_v26  ;;  %v384_v18 = vadd.f32 %v382_v14, %v356_v58  ;;  %v4563_v58 = vld [vmem:[#allocation2 + $0x49] sm:$0xff]  ;;  %6409 = vst [vmem:[#allocation35_spill] sm:$0xff] %v4587_v39 }
 0x14b   : > { %v1142_v43 = vadd.f32 %v4426_v30, %v1116_v34  ;;  %v560_v46 = vmul.f32 %v559_v11, %v4521_v5  ;;  %v585_v63 = vstv %s4482_s0  ;;  %v661_v54 = vstv %s4484_s15  ;;  %v4580_v17 = vld [vmem:[#allocation2 + $0x90] sm:$0xff]  ;;  %s4862_s0 = sld [smem:[#allocation7 + $0x24]]  ;;  %s4872_s15 = sld [smem:[#allocation7 + $0x25]] }
 0x14c   : > { %v1015_v22 = vadd.f32 %v6400_v45, %v939_v16  ;;  %v1735_v9 = vadd.f32 %v1733_v7, %v1709_v53  ;;  %v1608_v44 = vadd.f32 %v6401_v2, %v1532_v40  ;;  %v460_v10 = vadd.f32 %v458_v59, %v384_v18  ;;  %v4617_v2 = vld [vmem:[#allocation2 + $0x91] sm:$0xff] }
 0x14d   : > { %1164 = vrot.lane.b32.xlu0 %v1142_v43, %s2781_s8  ;;  %v6402_v4 = vstv %s3729_s13  ;;  %v6403_v30 = vstv %s3744_s23  ;;  %v586_v7 = vmul.f32 %v4551_v55, %v585_v63  ;;  %v687_v60 = vstv %s4499_s18  ;;  %s4565_s13 = sld [smem:[#allocation7 + $0x1d]]  ;;  %s4575_s23 = sld [smem:[#allocation7 + $0x1e]] }
 0x14e   : > { %v1141_v1 = vmul.f32 %v6402_v4, %v4020_v32  ;;  %v1734_v57 = vmul.f32 %v6403_v30, %v3959_v24  ;;  %v1041_v25 = vadd.f32 %v4459_v12, %v1015_v22  ;;  %v1811_v61 = vadd.f32 %v6405_v51, %v1735_v9  ;;  %v4612_v22 = vld [vmem:[#allocation2 + $0xa8] sm:$0xff]  ;;  %s4906_s18 = sld [smem:[#allocation7 + $0x26]] }
 0x14f   : > { %v1634_v50 = vadd.f32 %v1632_v35, %v1608_v44  ;;  %v486_v15 = vadd.f32 %v484_v31, %v460_v10  ;;  %v6406_v24 = vstv %s3768_s20  ;;  %v662_v6 = vmul.f32 %v661_v54, %v4563_v58  ;;  %v6411_v31 = vld [vmem:[#allocation162_spill] sm:$0xff]  ;;  %v6414_v10 = vld [vmem:[#allocation164_spill] sm:$0xff]  ;;  %s4638_s20 = sld [smem:[#allocation7 + $0x52]]  ;;  %v6415_v51 = vld [vmem:[#allocation163_spill] sm:$0xff] }
 0x150   : > { %v1937_v62 = vmul.f32 %v6406_v24, %v4018_v42  ;;  %v763_v47 = vstv %s4507_s28  ;;  %v789_v12 = vstv %s4509_s19  ;;  %v1117_v35 = vadd.f32 %v6407_v27, %v1041_v25  ;;  %s4908_s28 = sld [smem:[#allocation7 + $0x27]]  ;;  %s4919_s19 = sld [smem:[#allocation7 + $0x28]] }
 0x151   : > { %v1837_v3 = vadd.f32 %v4477_v36, %v1811_v61  ;;  %v1710_v23 = vadd.f32 %v6408_v37, %v1634_v50  ;;  %v562_v29 = vadd.f32 %v560_v46, %v486_v15  ;;  %v2039_v42 = vmul.f32 %v2038_v49, %v4036_v56  ;;  %v4594_v36 = vld [vmem:[#allocation2 + $0x61] sm:$0xff]  ;;  %v4641_v15 = vld [vmem:[#allocation2 + $0x9] sm:$0xff] }
 0x152   : > { %v6410_v26 = vstv %s3746_s5  ;;  %v688_v0 = vmul.f32 %v4594_v36, %v687_v60  ;;  %v865_v34 = vstv %s4533_s9  ;;  %v1143_v59 = vadd.f32 %v1141_v1, %v1117_v35  ;;  %v4601_v56 = vld [vmem:[#allocation2 + $0x8] sm:$0xff]  ;;  %s4624_s5 = sld [smem:[#allocation7 + $0x50]]  ;;  %s4921_s9 = sld [smem:[#allocation7 + $0x29]] }
 0x153   : > { %v4592_v14 = vmul.f32 %v4587_v39, %v6410_v26  ;;  %v1913_v16 = vadd.f32 %v6411_v31, %v1837_v3  ;;  %v1736_v13 = vadd.f32 %v1734_v57, %v1710_v23  ;;  %v588_v53 = vadd.f32 %v586_v7, %v562_v29  ;;  %v4631_v7 = vld [vmem:[#allocation2 + $0x20] sm:$0xff]  ;;  %v6416_v29 = vld [vmem:[#allocation165_spill] sm:$0xff]  ;;  %v4666_v31 = vld [vmem:[#allocation2 + $0xa9] sm:$0xff] }
 0x154   : > { %v6412_v40 = vstv %s3751_s3  ;;  %v6413_v43 = vmov %v6406_v24  ;;  %v764_v45 = vmul.f32 %v763_v47, %v4580_v17  ;;  %v790_v9 = vmul.f32 %v4612_v22, %v789_v12  ;;  %1166 = vrot.lane.b32.xlu1 %v1143_v59, %s2781_s8  ;;  %s4636_s3 = sld [smem:[#allocation7 + $0x51]]  ;;  %v4652_v3 = vld [vmem:[#allocation2 + $0x21] sm:$0xff] }
 0x155   : > { %v1836_v18 = vmul.f32 %v6412_v40, %v6266_v19  ;;  %v1938_v46 = vmul.f32 %v6413_v43, %v4020_v32  ;;  %v1939_v44 = vadd.f32 %v1937_v62, %v1913_v16  ;;  %v1812_v19 = vadd.f32 %v6414_v10, %v1736_v13  ;;  %v4690_v43 = vld [vmem:[#allocation2 + $0xf1] sm:$0xff] }
 0x156   : > { %v664_v4 = vadd.f32 %v662_v6, %v588_v53  ;;  %v866_v32 = vmul.f32 %v865_v34, %v4617_v2  ;;  %v891_v1 = vstv %s4557_s26  ;;  %v967_v30 = vstv %s4559_s7  ;;  %v4646_v6 = vld [vmem:[#allocation2 + $0xd8] sm:$0xff]  ;;  %s4940_s26 = sld [smem:[#allocation7 + $0x2a]]  ;;  %s4944_s7 = sld [smem:[#allocation7 + $0x2b]] }
 0x157   : > { %v357_v57 = vmul.f32 %v355_v33, %v4601_v56  ;;  %v383_v25 = vmul.f32 %v4631_v7, %v381_v20  ;;  %v2015_v61 = vadd.f32 %v6415_v51, %v1939_v44  ;;  %v1838_v50 = vadd.f32 %v1836_v18, %v1812_v19  ;;  %v4644_v33 = vld [vmem:[#allocation2 + $0x50] sm:$0xff]  ;;  %v4685_v18 = vld [vmem:[#allocation2 + $0xd9] sm:$0xff] }
 0x158   : > { %v690_v24 = vadd.f32 %v688_v0, %v664_v4  ;;  %v993_v62 = vstv %s4565_s13  ;;  %v1069_v20 = vstv %s4575_s23  ;;  %v459_v35 = vmul.f32 %v457_v28, %v4641_v15  ;;  %v4702_v10 = vld [vmem:[#allocation2 + $0x51] sm:$0xff]  ;;  %v4709_v4 = vld [vmem:[#allocation2 + $0x2] sm:$0xff]  ;;  %s4946_s13 = sld [smem:[#allocation7 + $0x2c]]  ;;  %s4959_s23 = sld [smem:[#allocation7 + $0x2d]] }
 0x159   : > { %v385_v27 = vadd.f32 %v383_v25, %v357_v57  ;;  %v485_v37 = vmul.f32 %v4652_v3, %v483_v52  ;;  %v2041_v23 = vadd.f32 %v2039_v42, %v2015_v61  ;;  %v1914_v26 = vadd.f32 %v6416_v29, %v1838_v50  ;;  %v4723_v61 = vld [vmem:[#allocation2 + $0x98] sm:$0xff] }
 0x15a   : > { %v766_v0 = vadd.f32 %v764_v45, %v690_v24  ;;  %v1095_v59 = vstv %s4582_s25  ;;  %v2040_v28 = vmul.f32 %v2038_v49, %v4057_v41  ;;  %v892_v52 = vmul.f32 %v4666_v31, %v891_v1  ;;  %v4680_v41 = vld [vmem:[#allocation2 + $0xf0] sm:$0xff]  ;;  %s4967_s25 = sld [smem:[#allocation7 + $0x2e]] }
 0x15b   : > { %v461_v16 = vadd.f32 %v459_v35, %v385_v27  ;;  %v561_v13 = vmul.f32 %v559_v11, %v4644_v33  ;;  %2063 = vrot.lane.b32.xlu0 %v2041_v23, %s2781_s8  ;;  %v1940_v42 = vadd.f32 %v1938_v46, %v1914_v26  ;;  %v968_v40 = vmul.f32 %v967_v30, %v4646_v6 }
 0x15c   : > { %v792_v53 = vadd.f32 %v790_v9, %v766_v0  ;;  %v994_v49 = vmul.f32 %v4680_v41, %v993_v62  ;;  %v1070_v11 = vmul.f32 %v1069_v20, %v4685_v18  ;;  %v4695_v46 = vmul.f32 %v4690_v43, %v1095_v59  ;;  %v4697_v9 = vld [vmem:[#allocation2 + $0x68] sm:$0xff] }
 0x15d   : > { %v487_v45 = vadd.f32 %v485_v37, %v461_v16  ;;  %v587_v44 = vmul.f32 %v4697_v9, %v585_v63  ;;  %v2016_v19 = vadd.f32 %v4592_v14, %v1940_v42  ;;  %v663_v25 = vmul.f32 %v661_v54, %v4702_v10  ;;  %v4714_v63 = vld [vmem:[#allocation2 + $0x69] sm:$0xff] }
 0x15e   : > { %v868_v57 = vadd.f32 %v866_v32, %v792_v53  ;;  %v689_v51 = vmul.f32 %v4714_v63, %v687_v60  ;;  %v1254_v32 = vstv %s4624_s5  ;;  %v1280_v50 = vstv %s4636_s3  ;;  %s4974_s5 = sld [smem:[#allocation7 + $0x2f]]  ;;  %s5005_s3 = sld [smem:[#allocation7 + $0x60]] }
 0x15f   : > { %v563_v14 = vadd.f32 %v561_v13, %v487_v45  ;;  %v5906_v24 = vstv %s4638_s20  ;;  %v2042_v54 = vadd.f32 %v2040_v28, %v2016_v19  ;;  %v1255_v35 = vmul.f32 %v1254_v32, %v4514_v8  ;;  %v4747_v13 = vld [vmem:[#allocation2 + $0x1a] sm:$0xff] }
 0x160   : > { %v894_v27 = vadd.f32 %v892_v52, %v868_v57  ;;  %v1281_v60 = vmul.f32 %v4527_v21, %v1280_v50  ;;  %v1357_v23 = vmul.f32 %v5906_v24, %v4709_v4  ;;  %v5903_v29 = vstv %s4657_s30  ;;  %v4745_v52 = vld [vmem:[#allocation2 + $0x99] sm:$0xff]  ;;  %v4767_v57 = vld [vmem:[#allocation2 + $0xb1] sm:$0xff] }
 0x161   : > { %v589_v37 = vadd.f32 %v587_v44, %v563_v14  ;;  %v5902_v26 = vstv %s4659_s24  ;;  %2065 = vrot.lane.b32.xlu1 %v2042_v54, %s2781_s8  ;;  %v765_v28 = vmul.f32 %v763_v47, %v4723_v61  ;;  %v1383_v42 = vmul.f32 %v4747_v13, %v5903_v29  ;;  %s4765_s8 = sld [smem:[#allocation7 + $0x5d]]  ;;  %v4772_v14 = vld [vmem:[#allocation2 + $0xe0] sm:$0xff] }
 0x162   : > { %v970_v0 = vadd.f32 %v968_v40, %v894_v27  ;;  %v1283_v16 = vadd.f32 %v1281_v60, %v1255_v35  ;;  %v4756_v40 = vld [vmem:[#allocation2 + $0xb0] sm:$0xff]  ;;  %v867_v45 = vmul.f32 %v865_v34, %v4745_v52  ;;  %v5901_v44 = vstv %s4674_s4  ;;  %6417 = vst [vmem:[#allocation48_spill] sm:$0xff] %v4772_v14 }
 0x163   : > { %v665_v53 = vadd.f32 %v663_v25, %v589_v37  ;;  %v791_v47 = vmul.f32 %v4756_v40, %v789_v12  ;;  %v893_v25 = vmul.f32 %v4767_v57, %v891_v1  ;;  %v1459_v12 = vmul.f32 %v5902_v26, %v4563_v58  ;;  %v4782_v27 = vld [vmem:[#allocation2 + $0x4a] sm:$0xff]  ;;  %v4788_v37 = vld [vmem:[#allocation2 + $0xe1] sm:$0xff] }
 0x164   : > { %v996_v19 = vadd.f32 %v994_v49, %v970_v0  ;;  %v1359_v54 = vadd.f32 %v1357_v23, %v1283_v16  ;;  %v1485_v49 = vmul.f32 %v4594_v36, %v5901_v44  ;;  %v5905_v35 = vstv %s4704_s22  ;;  %6418 = vst [vmem:[#allocation43_spill] sm:$0xff] %v4788_v37  ;;  %v4795_v44 = vld [vmem:[#allocation2 + $0xf8] sm:$0xff] }
 0x165   : > { %v691_v34 = vadd.f32 %v689_v51, %v665_v53  ;;  %v5904_v1 = vstv %s4706_s16  ;;  %v5908_v0 = vstv %s4719_s11  ;;  %v5907_v51 = vstv %s4721_s6  ;;  %6419 = vst [vmem:[#allocation69_spill] sm:$0xff] %v4795_v44 }
 0x166   : > { %v1072_v60 = vadd.f32 %v1070_v11, %v996_v19  ;;  %v1385_v23 = vadd.f32 %v1383_v42, %v1359_v54  ;;  %v969_v53 = vmul.f32 %v967_v30, %v4772_v14  ;;  %v4800_v26 = vmul.f32 %v4795_v44, %v993_v62  ;;  %v4807_v42 = vld [vmem:[#allocation2 + $0xf9] sm:$0xff]  ;;  %v4817_v54 = vld [vmem:[#allocation2 + $0x62] sm:$0xff] }
 0x167   : > { %v767_v16 = vadd.f32 %v765_v28, %v691_v34  ;;  %v4805_v11 = vmul.f32 %v1069_v20, %v4788_v37  ;;  %v4812_v28 = vmul.f32 %v4807_v42, %v1095_v59  ;;  %v1561_v30 = vmul.f32 %v5905_v35, %v4782_v27  ;;  %6420 = vst [vmem:[#allocation60_spill] sm:$0xff] %v4817_v54  ;;  %v4822_v20 = vld [vmem:[#allocation2 + $0xa] sm:$0xff] }
 0x168   : > { %v1461_v19 = vadd.f32 %v1459_v12, %v1385_v23  ;;  %v1587_v62 = vmul.f32 %v4817_v54, %v5904_v1  ;;  %6421 = vst [vmem:[#allocation58_spill] sm:$0xff] %v4822_v20  ;;  %v1663_v29 = vmul.f32 %v5908_v0, %v4617_v2  ;;  %v1689_v59 = vmul.f32 %v4666_v31, %v5907_v51  ;;  %v4830_v12 = vld [vmem:[#allocation2 + $0x92] sm:$0xff]  ;;  %v4874_v51 = vld [vmem:[#allocation2 + $0xaa] sm:$0xff] }
 0x169   : > { %v793_v34 = vadd.f32 %v791_v47, %v767_v16  ;;  %6422 = vst [vmem:[#allocation38_spill] sm:$0xff] %v4830_v12  ;;  %v4836_v1 = vadd.f32 %v4695_v46, %v1072_v60  ;;  %v5917_v24 = vstv %s4752_s10  ;;  %v1256_v0 = vmul.f32 %v1254_v32, %v4641_v15  ;;  %v4854_v60 = vld [vmem:[#allocation2 + $0xda] sm:$0xff]  ;;  %6429 = vst [vmem:[#allocation46_spill] sm:$0xff] %v4874_v51 }
 0x16a   : > { %v1487_v35 = vadd.f32 %v1485_v49, %v1461_v19  ;;  %v1282_v23 = vmul.f32 %v4652_v3, %v1280_v50  ;;  %v6423_v46 = vstv %s4739_s29  ;;  %6424 = vst [vmem:[#allocation39_spill] sm:$0xff] %v4854_v60  ;;  %v6425_v47 = vstv %s4638_s20  ;;  %v4870_v19 = vld [vmem:[#allocation2 + $0x52] sm:$0xff]  ;;  %s5007_s20 = sld [smem:[#allocation7 + $0x61]] }
 0x16b   : > { %v869_v16 = vadd.f32 %v867_v45, %v793_v34  ;;  %v1765_v49 = vmul.f32 %v6423_v46, %v4830_v12  ;;  %v1358_v45 = vmul.f32 %v6425_v47, %v4822_v20  ;;  %v6427_v34 = vstv %s4657_s30  ;;  %6428 = vst [vmem:[#allocation49_spill] sm:$0xff] %v4870_v19  ;;  %s5015_s30 = sld [smem:[#allocation7 + $0x62]] }
 0x16c   : > { %v1563_v54 = vadd.f32 %v1561_v30, %v1487_v35  ;;  %v1284_v35 = vadd.f32 %v1282_v23, %v1256_v0  ;;  %v4865_v30 = vld [vmem:[#allocation2 + $0x22] sm:$0xff]  ;;  %v6430_v0 = vstv %s4754_s14  ;;  %v6445_v14 = vstv %s4752_s10  ;;  %s2782_s10 = smov 32  }
 0x16d   : > { %v895_v32 = vadd.f32 %v893_v25, %v869_v16  ;;  %6426 = vst [vmem:[#allocation73_spill] sm:$0xff] %v4865_v30  ;;  %v1384_v46 = vmul.f32 %v4865_v30, %v6427_v34  ;;  %v1791_v25 = vmul.f32 %v4874_v51, %v5917_v24  ;;  %v1867_v23 = vmul.f32 %v6430_v0, %v4685_v18  ;;  %v4893_v51 = vld [vmem:[#allocation2 + $0xf2] sm:$0xff] }
 0x16e   : > { %v1589_v47 = vadd.f32 %v1587_v62, %v1563_v54  ;;  %v6431_v16 = vstv %s4765_s8  ;;  %v6432_v30 = vstv %s4777_s21  ;;  %v1360_v54 = vadd.f32 %v1358_v45, %v1284_v35  ;;  %6434 = vst [vmem:[#allocation64_spill] sm:$0xff] %v4893_v51  ;;  %v4910_v45 = vld [vmem:[#allocation2 + $0x6a] sm:$0xff] }
 0x16f   : > { %v1893_v50 = vmul.f32 %v4690_v43, %v6431_v16  ;;  %v971_v34 = vadd.f32 %v969_v53, %v895_v32  ;;  %v4888_v20 = vmul.f32 %v6432_v30, %v4854_v60  ;;  %v6433_v62 = vstv %s4659_s24  ;;  %6438 = vst [vmem:[#allocation61_spill] sm:$0xff] %v4910_v45  ;;  %s5026_s24 = sld [smem:[#allocation7 + $0x63]] }
 0x170   : > { %v1460_v12 = vmul.f32 %v6433_v62, %v4702_v10  ;;  %v1665_v24 = vadd.f32 %v1663_v29, %v1589_v47  ;;  %v6435_v0 = vstv %s4786_s1  ;;  %v6436_v16 = vstv %s4674_s4  ;;  %s5028_s4 = sld [smem:[#allocation7 + $0x64]] }
 0x171   : > { %v4898_v44 = vmul.f32 %v4893_v51, %v6435_v0  ;;  %v1486_v53 = vmul.f32 %v4714_v63, %v6436_v16  ;;  %v6437_v32 = vstv %s4704_s22  ;;  %v1386_v29 = vadd.f32 %v1384_v46, %v1360_v54  ;;  %s5047_s22 = sld [smem:[#allocation7 + $0x65]] }
 0x172   : > { %v1562_v30 = vmul.f32 %v6437_v32, %v4870_v19  ;;  %v6439_v35 = vstv %s4706_s16  ;;  %v6440_v62 = vstv %s4719_s11  ;;  %v5930_v16 = vstv %s4833_s2  ;;  %s5049_s16 = sld [smem:[#allocation7 + $0x66]]  ;;  %s5065_s11 = sld [smem:[#allocation7 + $0x67]] }
 0x173   : > { %v1588_v47 = vmul.f32 %v4910_v45, %v6439_v35  ;;  %v1664_v0 = vmul.f32 %v6440_v62, %v4745_v52  ;;  %v1691_v32 = vadd.f32 %v1689_v59, %v1665_v24  ;;  %v362_v46 = vmul.f32 %v5930_v16, %v4468_v48  ;;  %v4929_v45 = vld [vmem:[#allocation2 + $0x9a] sm:$0xff] }
 0x174   : > { %v387_v54 = vstv %s4840_s12  ;;  %v5934_v51 = vstv %s4842_s17  ;;  %v997_v19 = vadd.f32 %v4800_v26, %v971_v34  ;;  %v1462_v35 = vadd.f32 %v1460_v12, %v1386_v29  ;;  %6441 = vst [vmem:[#allocation45_spill] sm:$0xff] %v4929_v45  ;;  %s5146_s12 = sld [smem:[#allocation7 + $0x6f]] }
 0x175   : > { %v388_v62 = vmul.f32 %v4516_v38, %v387_v54  ;;  %v464_v60 = vmul.f32 %v5934_v51, %v4514_v8  ;;  %v1767_v24 = vadd.f32 %v1765_v49, %v1691_v32  ;;  %v6442_v59 = vstv %s4721_s6  ;;  %v4951_v51 = vld [vmem:[#allocation2 + $0xb2] sm:$0xff]  ;;  %s5074_s6 = sld [smem:[#allocation7 + $0x68]] }
 0x176   : > { %v1690_v16 = vmul.f32 %v4767_v57, %v6442_v59  ;;  %v489_v48 = vstv %s4860_s27  ;;  %v1488_v26 = vadd.f32 %v1486_v53, %v1462_v35  ;;  %v6443_v32 = vstv %s4739_s29  ;;  %6444 = vst [vmem:[#allocation75_spill] sm:$0xff] %v4951_v51  ;;  %s5076_s29 = sld [smem:[#allocation7 + $0x69]] }
 0x177   : > { %v390_v12 = vadd.f32 %v388_v62, %v362_v46  ;;  %v490_v34 = vmul.f32 %v4527_v21, %v489_v48  ;;  %v1793_v49 = vadd.f32 %v1791_v25, %v1767_v24  ;;  %v1766_v59 = vmul.f32 %v6443_v32, %v4929_v45  ;;  %v4962_v25 = vld [vmem:[#allocation2 + $0xe2] sm:$0xff]  ;;  %s5153_s27 = sld [smem:[#allocation7 + $0x31]] }
 0x178   : > { %v1792_v53 = vmul.f32 %v4951_v51, %v6445_v14  ;;  %v6446_v46 = vstv %s4754_s14  ;;  %v1073_v62 = vadd.f32 %v4805_v11, %v997_v19  ;;  %v1564_v29 = vadd.f32 %v1562_v30, %v1488_v26  ;;  %s5098_s14 = sld [smem:[#allocation7 + $0x6a]] }
 0x179   : > { %v1868_v35 = vmul.f32 %v6446_v46, %v4788_v37  ;;  %v466_v24 = vadd.f32 %v464_v60, %v390_v12  ;;  %v6447_v32 = vstv %s4862_s0  ;;  %v1869_v14 = vadd.f32 %v1867_v23, %v1793_v49 }
 0x17a   : > { %v566_v45 = vmul.f32 %v6447_v32, %v4521_v5  ;;  %v6448_v51 = vstv %s4872_s15  ;;  %v667_v38 = vstv %s4906_s18  ;;  %v693_v37 = vstv %s4908_s28  ;;  %s2783_s18 = smov 64   ;;  %s5182_s28 = sld [smem:[#allocation7 + $0x34]] }
 0x17b   : > { %v592_v46 = vmul.f32 %v4551_v55, %v6448_v51  ;;  %v1590_v11 = vadd.f32 %v1588_v47, %v1564_v29  ;;  %v492_v19 = vadd.f32 %v490_v34, %v466_v24  ;;  %v769_v30 = vstv %s4919_s19  ;;  %s5184_s19 = sld [smem:[#allocation7 + $0x35]] }
 0x17c   : > { %v5944_v60 = vstv %s4921_s9  ;;  %v1895_v26 = vadd.f32 %v1893_v50, %v1869_v14  ;;  %v6449_v12 = vstv %s4765_s8  ;;  %v6450_v23 = vstv %s4777_s21  ;;  %s5100_s8 = sld [smem:[#allocation7 + $0x6b]]  ;;  %s5106_s21 = sld [smem:[#allocation7 + $0x6c]] }
 0x17d   : > { %v4981_v32 = vmul.f32 %v4807_v42, %v6449_v12  ;;  %v4986_v51 = vmul.f32 %v6450_v23, %v4962_v25  ;;  %v6451_v49 = vstv %s4786_s1  ;;  %v4994_v47 = vadd.f32 %v4812_v28, %v1073_v62  ;;  %s5108_s1 = sld [smem:[#allocation7 + $0x6d]] }
 0x17e   : > { %v4991_v55 = vmul.f32 %v4587_v39, %v6451_v49  ;;  %v1666_v34 = vadd.f32 %v1664_v0, %v1590_v11  ;;  %v568_v29 = vadd.f32 %v566_v45, %v492_v19  ;;  %v668_v50 = vmul.f32 %v667_v38, %v4563_v58 }
 0x17f   : > { %v694_v24 = vmul.f32 %v4594_v36, %v693_v37  ;;  %v770_v14 = vmul.f32 %v769_v30, %v4580_v17  ;;  %v796_v12 = vmul.f32 %v4612_v22, %v5944_v60  ;;  %v5945_v23 = vstv %s4940_s26 }
 0x180   : > { %v1692_v49 = vadd.f32 %v1690_v16, %v1666_v34  ;;  %v594_v28 = vadd.f32 %v592_v46, %v568_v29  ;;  %v5947_v62 = vstv %s4944_s7  ;;  %v1971_v45 = vadd.f32 %v4888_v20, %v1895_v26 }
 0x181   : > { %v6452_v11 = vstv %s4833_s2  ;;  %v389_v60 = vmul.f32 %v4631_v7, %v387_v54  ;;  %v5946_v34 = vstv %s4967_s25  ;;  %v6453_v29 = vstv %s4842_s17  ;;  %s5115_s2 = sld [smem:[#allocation7 + $0x6e]]  ;;  %s5151_s17 = sld [smem:[#allocation7 + $0x30]] }
 0x182   : > { %v363_v19 = vmul.f32 %v6452_v11, %v4601_v56  ;;  %v1768_v16 = vadd.f32 %v1766_v59, %v1692_v49  ;;  %v670_v46 = vadd.f32 %v668_v50, %v594_v28  ;;  %v465_v39 = vmul.f32 %v6453_v29, %v4641_v15 }
 0x183   : > { %v872_v20 = vmul.f32 %v5945_v23, %v4617_v2  ;;  %v5948_v26 = vstv %s4974_s5  ;;  %v491_v11 = vmul.f32 %v4652_v3, %v489_v48  ;;  %v898_v50 = vmul.f32 %v4666_v31, %v5947_v62 }
 0x184   : > { %v391_v0 = vadd.f32 %v389_v60, %v363_v19  ;;  %v1794_v54 = vadd.f32 %v1792_v53, %v1768_v16  ;;  %v696_v59 = vadd.f32 %v694_v24, %v670_v46  ;;  %v6454_v49 = vstv %s4946_s13 }
 0x185   : > { %v974_v28 = vmul.f32 %v6454_v49, %v4646_v6  ;;  %v6455_v29 = vstv %s4959_s23  ;;  %v5042_v48 = vmul.f32 %v5946_v34, %v4685_v18  ;;  %v6456_v19 = vstv %s4862_s0  ;;  %s5161_s0 = sld [smem:[#allocation7 + $0x32]] }
 0x186   : > { %v1000_v23 = vmul.f32 %v4680_v41, %v6455_v29  ;;  %v467_v60 = vadd.f32 %v465_v39, %v391_v0  ;;  %v567_v53 = vmul.f32 %v6456_v19, %v4644_v33  ;;  %v1997_v24 = vadd.f32 %v4898_v44, %v1971_v45 }
 0x187   : > { %v1870_v16 = vadd.f32 %v1868_v35, %v1794_v54  ;;  %v772_v46 = vadd.f32 %v770_v14, %v696_v59  ;;  %v5055_v49 = vmul.f32 %v4690_v43, %v5948_v26  ;;  %v6457_v39 = vstv %s4872_s15  ;;  %v1175_v14 = vpop.permute.xlu0 %1174  ;;  %s5163_s15 = sld [smem:[#allocation7 + $0x33]] }
 0x188   : > { %v493_v29 = vadd.f32 %v491_v11, %v467_v60  ;;  %v593_v0 = vmul.f32 %v4697_v9, %v6457_v39  ;;  %v669_v19 = vmul.f32 %v667_v38, %v4702_v10  ;;  %v695_v34 = vmul.f32 %v4714_v63, %v693_v37 }
 0x189   : > { %v798_v62 = vadd.f32 %v796_v12, %v772_v46  ;;  %v771_v44 = vmul.f32 %v769_v30, %v4723_v61  ;;  %v5950_v45 = vstv %s5005_s3  ;;  %v5949_v35 = vstv %s5007_s20 }
 0x18a   : > { %v569_v54 = vadd.f32 %v567_v53, %v493_v29  ;;  %v1261_v11 = vmul.f32 %v5950_v45, %v4514_v8  ;;  %v1287_v38 = vmul.f32 %v4527_v21, %v5949_v35  ;;  %v1362_v37 = vstv %s5015_s30  ;;  %s5276_s30 = sld [smem:[#allocation7 + $0x3f]] }
 0x18b   : > { %v1180_v30 = vsel %vm203_vm0, %v4836_v1, %v1175_v14  ;;  %v1896_v12 = vadd.f32 %v4981_v32, %v1870_v16  ;;  %v874_v59 = vadd.f32 %v872_v20, %v798_v62  ;;  %v1363_v60 = vmul.f32 %v1362_v37, %v4709_v4  ;;  %v1177_v62 = vpop.permute.xlu1 %1176  ;;  %v2074_v20 = vpop.permute.xlu0 %2073 }
 0x18c   : > { %1204 = vrot.lane.b32.xlu0 %v1180_v30, %s2782_s10  ;;  %v595_v53 = vadd.f32 %v593_v0, %v569_v54  ;;  %v1289_v46 = vadd.f32 %v1287_v38, %v1261_v11  ;;  %v1388_v29 = vstv %s5026_s24  ;;  %v5956_v39 = vstv %s5028_s4  ;;  %s5288_s24 = sld [smem:[#allocation7 + $0x70]] }
 0x18d   : > { %v900_v26 = vadd.f32 %v898_v50, %v874_v59  ;;  %v6458_v35 = vstv %s4921_s9  ;;  %v1389_v1 = vmul.f32 %v4747_v13, %v1388_v29  ;;  %v1465_v32 = vmul.f32 %v5956_v39, %v4563_v58  ;;  %v6475_v39 = vld [vmem:[#allocation39_spill] sm:$0xff]  ;;  %s5204_s9 = sld [smem:[#allocation7 + $0x36]] }
 0x18e   : > { %v797_v45 = vmul.f32 %v4756_v40, %v6458_v35  ;;  %v671_v16 = vadd.f32 %v669_v19, %v595_v53  ;;  %v1365_v14 = vadd.f32 %v1363_v60, %v1289_v46  ;;  %v5954_v30 = vstv %s5047_s22 }
 0x18f   : > { %v5953_v0 = vstv %s5049_s16  ;;  %v1181_v50 = vsel %vm203_vm0, %v4994_v47, %v1177_v62  ;;  %v2079_v35 = vsel %vm203_vm0, %v1997_v24, %v2074_v20  ;;  %v1972_v54 = vadd.f32 %v4986_v51, %v1896_v12  ;;  %v6461_v20 = vld [vmem:[#allocation48_spill] sm:$0xff] }
 0x190   : > { %v976_v19 = vadd.f32 %v974_v28, %v900_v26  ;;  %1206 = vrot.lane.b32.xlu1 %v1181_v50, %s2782_s10  ;;  %2103 = vrot.lane.b32.xlu0 %v2079_v35, %s2782_s10  ;;  %v697_v11 = vadd.f32 %v695_v34, %v671_v16  ;;  %v1391_v38 = vadd.f32 %v1389_v1, %v1365_v14  ;;  %v6459_v26 = vstv %s4940_s26  ;;  %v2076_v50 = vpop.permute.xlu1 %2075  ;;  %v1185_v35 = vpop.permute.xlu0 %1184  ;;  %s5215_s26 = sld [smem:[#allocation7 + $0x37]] }
 0x191   : > { %v1491_v47 = vmul.f32 %v4594_v36, %v5954_v30  ;;  %v873_v28 = vmul.f32 %v6459_v26, %v4745_v52  ;;  %v1567_v24 = vmul.f32 %v5953_v0, %v4782_v27  ;;  %v1592_v12 = vstv %s5065_s11  ;;  %v6465_v26 = vld [vmem:[#allocation60_spill] sm:$0xff]  ;;  %s5320_s11 = sld [smem:[#allocation7 + $0x74]] }
 0x192   : > { %v1002_v51 = vadd.f32 %v1000_v23, %v976_v19  ;;  %v773_v59 = vadd.f32 %v771_v44, %v697_v11  ;;  %v1467_v60 = vadd.f32 %v1465_v32, %v1391_v38  ;;  %v5952_v34 = vstv %s5074_s6  ;;  %v6464_v32 = vld [vmem:[#allocation69_spill] sm:$0xff] }
 0x193   : > { %v5951_v53 = vstv %s5076_s29  ;;  %v1998_v46 = vadd.f32 %v4991_v55, %v1972_v54  ;;  %v6460_v62 = vstv %s4944_s7  ;;  %v6462_v16 = vstv %s4946_s13  ;;  %s5224_s7 = sld [smem:[#allocation7 + $0x38]]  ;;  %s5234_s13 = sld [smem:[#allocation7 + $0x39]] }
 0x194   : > { %v1078_v1 = vadd.f32 %v5042_v48, %v1002_v51  ;;  %v899_v23 = vmul.f32 %v4767_v57, %v6460_v62  ;;  %v975_v14 = vmul.f32 %v6462_v16, %v6461_v20  ;;  %v799_v44 = vadd.f32 %v797_v45, %v773_v59 }
 0x195   : > { %v6463_v19 = vstv %s4959_s23  ;;  %v1493_v38 = vadd.f32 %v1491_v47, %v1467_v60  ;;  %v1593_v55 = vmul.f32 %v6465_v26, %v1592_v12  ;;  %v2080_v48 = vsel %vm203_vm0, %v1998_v46, %v2076_v50  ;;  %s5237_s23 = sld [smem:[#allocation7 + $0x3a]] }
 0x196   : > { %v1001_v11 = vmul.f32 %v6464_v32, %v6463_v19  ;;  %v1104_v54 = vadd.f32 %v5055_v49, %v1078_v1  ;;  %v1669_v51 = vmul.f32 %v5952_v34, %v4617_v2  ;;  %v1695_v62 = vmul.f32 %v4666_v31, %v5951_v53  ;;  %2105 = vrot.lane.b32.xlu1 %v2080_v48, %s2782_s10  ;;  %v6471_v34 = vld [vmem:[#allocation38_spill] sm:$0xff]  ;;  %s5352_s10 = sld [smem:[#allocation7 + $0x77]] }
 0x197   : > { %v875_v45 = vadd.f32 %v873_v28, %v799_v44  ;;  %v1569_v47 = vadd.f32 %v1567_v24, %v1493_v38  ;;  %v5955_v59 = vstv %s5098_s14  ;;  %v5959_v60 = vstv %s5100_s8  ;;  %v6468_v38 = vld [vmem:[#allocation43_spill] sm:$0xff] }
 0x198   : > { %v1190_v49 = vsel %vm203_vm0, %v1104_v54, %v1185_v35  ;;  %v5957_v46 = vstv %s5106_s21  ;;  %v5958_v1 = vstv %s5108_s1  ;;  %v6466_v16 = vstv %s5005_s3  ;;  %s5271_s3 = sld [smem:[#allocation7 + $0x3d]] }
 0x199   : > { %v1262_v28 = vmul.f32 %v6466_v16, %v4641_v15  ;;  %1212 = vrot.lane.b32.xlu0 %v1190_v49, %s2783_s18  ;;  %v901_v24 = vadd.f32 %v899_v23, %v875_v45  ;;  %v1595_v50 = vadd.f32 %v1593_v55, %v1569_v47  ;;  %v5960_v35 = vstv %s5115_s2  ;;  %v6472_v49 = vld [vmem:[#allocation58_spill] sm:$0xff] }
 0x19a   : > { %v6467_v44 = vstv %s5007_s20  ;;  %v6469_v48 = vstv %s4967_s25  ;;  %v6470_v16 = vstv %s4974_s5  ;;  %v1771_v0 = vmul.f32 %v5955_v59, %v6471_v34  ;;  %s5249_s25 = sld [smem:[#allocation7 + $0x3b]]  ;;  %s5252_s5 = sld [smem:[#allocation7 + $0x3c]] }
 0x19b   : > { %v1288_v19 = vmul.f32 %v4652_v3, %v6467_v44  ;;  %v1077_v54 = vmul.f32 %v6469_v48, %v6468_v38  ;;  %v1103_v53 = vmul.f32 %v4807_v42, %v6470_v16  ;;  %v1364_v23 = vmul.f32 %v1362_v37, %v6472_v49  ;;  %v6473_v44 = vld [vmem:[#allocation73_spill] sm:$0xff]  ;;  %v6474_v16 = vld [vmem:[#allocation46_spill] sm:$0xff]  ;;  %s5274_s20 = sld [smem:[#allocation7 + $0x3e]] }
 0x19c   : > { %v977_v55 = vadd.f32 %v975_v14, %v901_v24  ;;  %v1671_v45 = vadd.f32 %v1669_v51, %v1595_v50  ;;  %v1390_v48 = vmul.f32 %v6473_v44, %v1388_v29  ;;  %v1797_v30 = vmul.f32 %v6474_v16, %v5959_v60 }
 0x19d   : > { %v1290_v47 = vadd.f32 %v1288_v19, %v1262_v28  ;;  %v1873_v37 = vmul.f32 %v5957_v46, %v4685_v18  ;;  %v1899_v59 = vmul.f32 %v4690_v43, %v5958_v1  ;;  %v1975_v49 = vmul.f32 %v5960_v35, %v6475_v39  ;;  %v6478_v1 = vld [vmem:[#allocation49_spill] sm:$0xff]  ;;  %v6480_v35 = vld [vmem:[#allocation61_spill] sm:$0xff] }
 0x19e   : > { %v1003_v14 = vadd.f32 %v1001_v11, %v977_v55  ;;  %v1697_v51 = vadd.f32 %v1695_v62, %v1671_v45  ;;  %v6476_v29 = vstv %s5028_s4  ;;  %v6477_v19 = vstv %s5047_s22  ;;  %v1187_v45 = vpop.permute.xlu1 %1186  ;;  %s5292_s4 = sld [smem:[#allocation7 + $0x71]]  ;;  %s5303_s22 = sld [smem:[#allocation7 + $0x72]] }
 0x19f   : > { %v1366_v28 = vadd.f32 %v1364_v23, %v1290_v47  ;;  %v1466_v24 = vmul.f32 %v6476_v29, %v4702_v10  ;;  %v1492_v46 = vmul.f32 %v4714_v63, %v6477_v19  ;;  %v6479_v60 = vstv %s5049_s16  ;;  %v6481_v47 = vld [vmem:[#allocation57_spill] sm:$0xff]  ;;  %s5305_s16 = sld [smem:[#allocation7 + $0x73]] }
 0x1a0   : > { %v1568_v44 = vmul.f32 %v6479_v60, %v6478_v1  ;;  %v1594_v39 = vmul.f32 %v6480_v35, %v1592_v12  ;;  %v1079_v11 = vadd.f32 %v1077_v54, %v1003_v14  ;;  %v1773_v62 = vadd.f32 %v1771_v0, %v1697_v51  ;;  %v6482_v14 = vld [vmem:[#allocation54_spill] sm:$0xff] }
 0x1a1   : > { %v1392_v23 = vadd.f32 %v1390_v48, %v1366_v28  ;;  %v367_v55 = vstv %s5151_s17  ;;  %v393_v19 = vstv %s5153_s27  ;;  %v5963_v50 = vstv %s5161_s0  ;;  %s5433_s17 = sld [smem:[#allocation7 + $0x7e]]  ;;  %s2784_s27 = smov 96  }
 0x1a2   : > { %v368_v29 = vmul.f32 %v367_v55, %v6481_v47  ;;  %v5962_v16 = vstv %s5163_s15  ;;  %v1105_v60 = vadd.f32 %v1103_v53, %v1079_v11  ;;  %v1799_v12 = vadd.f32 %v1797_v30, %v1773_v62  ;;  %v6484_v62 = vld [vmem:[#allocation64_spill] sm:$0xff] }
 0x1a3   : > { %v1468_v54 = vadd.f32 %v1466_v24, %v1392_v23  ;;  %v394_v0 = vmul.f32 %v6482_v14, %v393_v19  ;;  %v470_v48 = vmul.f32 %v5963_v50, %v4514_v8  ;;  %v496_v51 = vmul.f32 %v4527_v21, %v5962_v16 }
 0x1a4   : > { %v5961_v28 = vstv %s5182_s28  ;;  %v597_v47 = vstv %s5184_s19  ;;  %v1191_v30 = vsel %vm203_vm0, %v1105_v60, %v1187_v45  ;;  %v1875_v53 = vadd.f32 %v1873_v37, %v1799_v12  ;;  %s5513_s19 = sld [smem:[#allocation7 + $0x3]] }
 0x1a5   : > { %v1494_v24 = vadd.f32 %v1492_v46, %v1468_v54  ;;  %v396_v11 = vadd.f32 %v394_v0, %v368_v29  ;;  %1214 = vrot.lane.b32.xlu1 %v1191_v30, %s2783_s18  ;;  %v6483_v8 = vstv %s5146_s12  ;;  %v6485_v23 = vstv %s5074_s6  ;;  %v6487_v0 = vld [vmem:[#allocation34_spill] sm:$0xff]  ;;  %s5328_s6 = sld [smem:[#allocation7 + $0x75]] }
 0x1a6   : > { %v2001_v21 = vmul.f32 %v6484_v62, %v6483_v8  ;;  %v1670_v14 = vmul.f32 %v6485_v23, %v4745_v52  ;;  %v572_v45 = vmul.f32 %v5961_v28, %v4521_v5  ;;  %v1901_v46 = vadd.f32 %v1899_v59, %v1875_v53  ;;  %v2084_v59 = vpop.permute.xlu0 %2083 }
 0x1a7   : > { %v1570_v37 = vadd.f32 %v1568_v44, %v1494_v24  ;;  %v472_v29 = vadd.f32 %v470_v48, %v396_v11  ;;  %v673_v60 = vstv %s5204_s9  ;;  %v6486_v12 = vstv %s5076_s29  ;;  %v6488_v44 = vld [vmem:[#allocation45_spill] sm:$0xff]  ;;  %v6491_v11 = vld [vmem:[#allocation75_spill] sm:$0xff]  ;;  %s5339_s29 = sld [smem:[#allocation7 + $0x76]]  ;;  %s5516_s9 = sld [smem:[#allocation7 + $0x4]] }
 0x1a8   : > { %v1696_v54 = vmul.f32 %v4767_v57, %v6486_v12  ;;  %v598_v30 = vmul.f32 %v6487_v0, %v597_v47  ;;  %v1977_v8 = vadd.f32 %v1975_v49, %v1901_v46  ;;  %v699_v28 = vstv %s5215_s26  ;;  %s5520_s26 = sld [smem:[#allocation7 + $0x5]] }
 0x1a9   : > { %v1596_v23 = vadd.f32 %v1594_v39, %v1570_v37  ;;  %v498_v5 = vadd.f32 %v496_v51, %v472_v29  ;;  %v6489_v48 = vstv %s5098_s14  ;;  %v6490_v24 = vstv %s5100_s8  ;;  %s5367_s14 = sld [smem:[#allocation7 + $0x78]]  ;;  %s5377_s8 = sld [smem:[#allocation7 + $0x79]] }
 0x1aa   : > { %v1772_v53 = vmul.f32 %v6489_v48, %v6488_v44  ;;  %v1798_v16 = vmul.f32 %v6491_v11, %v6490_v24  ;;  %v6492_v12 = vstv %s5106_s21  ;;  %v674_v0 = vmul.f32 %v673_v60, %v4563_v58  ;;  %s5390_s21 = sld [smem:[#allocation7 + $0x7a]] }
 0x1ab   : > { %v1874_v50 = vmul.f32 %v6492_v12, %v6468_v38  ;;  %v2003_v39 = vadd.f32 %v2001_v21, %v1977_v8  ;;  %v1672_v49 = vadd.f32 %v1670_v14, %v1596_v23  ;;  %v574_v51 = vadd.f32 %v572_v45, %v498_v5 }
 0x1ac   : > { %v5964_v46 = vstv %s5224_s7  ;;  %v6493_v37 = vstv %s5108_s1  ;;  %v6494_v48 = vstv %s5115_s2  ;;  %v700_v12 = vmul.f32 %v4594_v36, %v699_v28  ;;  %s5403_s1 = sld [smem:[#allocation7 + $0x7b]]  ;;  %s5412_s2 = sld [smem:[#allocation7 + $0x7c]] }
 0x1ad   : > { %v1900_v29 = vmul.f32 %v4807_v42, %v6493_v37  ;;  %v1976_v24 = vmul.f32 %v6494_v48, %v4962_v25  ;;  %v801_v21 = vstv %s5234_s13  ;;  %v2089_v14 = vsel %vm203_vm0, %v2003_v39, %v2084_v59  ;;  %s5525_s13 = sld [smem:[#allocation7 + $0x41]] }
 0x1ae   : > { %v1698_v45 = vadd.f32 %v1696_v54, %v1672_v49  ;;  %v600_v8 = vadd.f32 %v598_v30, %v574_v51  ;;  %v877_v23 = vstv %s5237_s23  ;;  %2111 = vrot.lane.b32.xlu0 %v2089_v14, %s2783_s18  ;;  %v776_v5 = vmul.f32 %v5964_v46, %v4580_v17  ;;  %v6497_v14 = vld [vmem:[#allocation35_spill] sm:$0xff]  ;;  %s5528_s23 = sld [smem:[#allocation7 + $0x6]] }
 0x1af   : > { %v903_v37 = vstv %s5249_s25  ;;  %v369_v48 = vmul.f32 %v367_v55, %v4601_v56  ;;  %v395_v59 = vmul.f32 %v4631_v7, %v393_v19  ;;  %v979_v39 = vstv %s5252_s5  ;;  %s5530_s25 = sld [smem:[#allocation7 + $0x42]]  ;;  %s5533_s5 = sld [smem:[#allocation7 + $0x7]] }
 0x1b0   : > { %v1774_v54 = vadd.f32 %v1772_v53, %v1698_v45  ;;  %v676_v30 = vadd.f32 %v674_v0, %v600_v8  ;;  %v6495_v17 = vstv %s5161_s0  ;;  %v6496_v51 = vstv %s5146_s12  ;;  %s5421_s12 = sld [smem:[#allocation7 + $0x7d]]  ;;  %s5443_s0 = sld [smem:[#allocation7 + $0x7f]] }
 0x1b1   : > { %v471_v49 = vmul.f32 %v6495_v17, %v4641_v15  ;;  %v2002_v46 = vmul.f32 %v6497_v14, %v6496_v51  ;;  %v802_v56 = vmul.f32 %v4612_v22, %v801_v21  ;;  %v397_v7 = vadd.f32 %v395_v59, %v369_v48 }
 0x1b2   : > { %v6498_v55 = vstv %s5163_s15  ;;  %v1800_v53 = vadd.f32 %v1798_v16, %v1774_v54  ;;  %v702_v0 = vadd.f32 %v700_v12, %v676_v30  ;;  %v878_v15 = vmul.f32 %v877_v23, %v4617_v2  ;;  %s348_s15 = sld [smem:[#allocation7]] }
 0x1b3   : > { %v497_v19 = vmul.f32 %v4652_v3, %v6498_v55  ;;  %v904_v45 = vmul.f32 %v4666_v31, %v903_v37  ;;  %v980_v22 = vmul.f32 %v979_v39, %v4646_v6  ;;  %v1005_v8 = vstv %s5271_s3  ;;  %v5354_v55 = vld [vmem:[#allocation2 + $0x19] sm:$0xff]  ;;  %s5538_s3 = sld [smem:[#allocation7 + $0x43]] }
 0x1b4   : > { %v473_v3 = vadd.f32 %v471_v49, %v397_v7  ;;  %v6499_v48 = vstv %s5182_s28  ;;  %v1876_v12 = vadd.f32 %v1874_v50, %v1800_v53  ;;  %v778_v59 = vadd.f32 %v776_v5, %v702_v0  ;;  %v5346_v50 = vld [vmem:[#allocation2 + $0x1] sm:$0xff]  ;;  %v2086_v53 = vpop.permute.xlu1 %2085  ;;  %s5511_s28 = sld [smem:[#allocation7 + $0x2]] }
 0x1b5   : > { %v573_v16 = vmul.f32 %v6499_v48, %v4644_v33  ;;  %v1081_v54 = vstv %s5274_s20  ;;  %v1107_v2 = vstv %s5276_s30  ;;  %v599_v6 = vmul.f32 %v4697_v9, %v597_v47  ;;  %s5541_s20 = sld [smem:[#allocation7 + $0x8]]  ;;  %s5551_s30 = sld [smem:[#allocation7 + $0x44]] }
 0x1b6   : > { %v499_v30 = vadd.f32 %v497_v19, %v473_v3  ;;  %v675_v17 = vmul.f32 %v673_v60, %v4702_v10  ;;  %v1266_v49 = vstv %s5288_s24  ;;  %v1902_v51 = vadd.f32 %v1900_v29, %v1876_v12  ;;  %s5554_s24 = sld [smem:[#allocation7 + $0x9]] }
 0x1b7   : > { %v804_v33 = vadd.f32 %v802_v56, %v778_v59  ;;  %v1267_v5 = vmul.f32 %v5346_v50, %v1266_v49  ;;  %v1292_v14 = vstv %s5292_s4  ;;  %v1368_v10 = vstv %s5303_s22  ;;  %s5559_s4 = sld [smem:[#allocation7 + $0x45]]  ;;  %s5562_s22 = sld [smem:[#allocation7 + $0xa]] }
 0x1b8   : > { %v575_v7 = vadd.f32 %v573_v16, %v499_v30  ;;  %v1293_v9 = vmul.f32 %v5354_v55, %v1292_v14  ;;  %v1394_v47 = vstv %s5305_s16  ;;  %v1978_v60 = vadd.f32 %v1976_v24, %v1902_v51  ;;  %s5567_s16 = sld [smem:[#allocation7 + $0x46]] }
 0x1b9   : > { %v880_v29 = vadd.f32 %v878_v15, %v804_v33  ;;  %v701_v56 = vmul.f32 %v4714_v63, %v699_v28  ;;  %v1369_v19 = vmul.f32 %v1368_v10, %v4709_v4  ;;  %v1395_v48 = vmul.f32 %v4747_v13, %v1394_v47 }
 0x1ba   : > { %v601_v0 = vadd.f32 %v599_v6, %v575_v7  ;;  %v1295_v3 = vadd.f32 %v1293_v9, %v1267_v5  ;;  %v1470_v24 = vstv %s5320_s11  ;;  %v2004_v16 = vadd.f32 %v2002_v46, %v1978_v60  ;;  %s5570_s11 = sld [smem:[#allocation7 + $0xb]] }
 0x1bb   : > { %v906_v15 = vadd.f32 %v904_v45, %v880_v29  ;;  %v1006_v28 = vmul.f32 %v4680_v41, %v1005_v8  ;;  %v1496_v12 = vstv %s5328_s6  ;;  %v6500_v59 = vstv %s5224_s7  ;;  %s5523_s7 = sld [smem:[#allocation7 + $0x40]]  ;;  %s5578_s6 = sld [smem:[#allocation7 + $0x47]] }
 0x1bc   : > { %v677_v4 = vadd.f32 %v675_v17, %v601_v0  ;;  %v777_v30 = vmul.f32 %v6500_v59, %v4723_v61  ;;  %v1371_v6 = vadd.f32 %v1369_v19, %v1295_v3  ;;  %v1471_v13 = vmul.f32 %v1470_v24, %v4563_v58 }
 0x1bd   : > { %v2090_v46 = vsel %vm203_vm0, %v2004_v16, %v2086_v53  ;;  %v982_v45 = vadd.f32 %v980_v22, %v906_v15  ;;  %v1082_v41 = vmul.f32 %v1081_v54, %v4685_v18  ;;  %v1572_v51 = vstv %s5339_s29  ;;  %s5581_s29 = sld [smem:[#allocation7 + $0xc]] }
 0x1be   : > { %2113 = vrot.lane.b32.xlu1 %v2090_v46, %s2783_s18  ;;  %v703_v17 = vadd.f32 %v701_v56, %v677_v4  ;;  %v803_v61 = vmul.f32 %v4756_v40, %v801_v21  ;;  %v1397_v58 = vadd.f32 %v1395_v48, %v1371_v6  ;;  %v1497_v33 = vmul.f32 %v4594_v36, %v1496_v12  ;;  %v1195_v56 = vpop.permute.xlu0 %1194  ;;  %s2255_s18 = sld [smem:[#allocation7 + $0x1]] }
 0x1bf   : > { %v1008_v22 = vadd.f32 %v1006_v28, %v982_v45  ;;  %v1108_v5 = vmul.f32 %v4690_v43, %v1107_v2  ;;  %v1598_v7 = vstv %s5352_s10  ;;  %v879_v60 = vmul.f32 %v877_v23, %v4745_v52  ;;  %v5426_v28 = vld [vmem:[#allocation2 + $0x91] sm:$0xff]  ;;  %s5590_s10 = sld [smem:[#allocation7 + $0x48]] }
 0x1c0   : > { %v779_v9 = vadd.f32 %v777_v30, %v703_v17  ;;  %v1473_v40 = vadd.f32 %v1471_v13, %v1397_v58  ;;  %v1573_v21 = vmul.f32 %v1572_v51, %v4782_v27  ;;  %v1674_v29 = vstv %s5367_s14  ;;  %s5595_s14 = sld [smem:[#allocation7 + $0xd]] }
 0x1c1   : > { %v1084_v36 = vadd.f32 %v1082_v41, %v1008_v22  ;;  %v905_v53 = vmul.f32 %v4767_v57, %v903_v37  ;;  %v1599_v23 = vmul.f32 %v6465_v26, %v1598_v7  ;;  %v1700_v48 = vstv %s5377_s8  ;;  %s5600_s8 = sld [smem:[#allocation7 + $0x49]] }
 0x1c2   : > { %v805_v19 = vadd.f32 %v803_v61, %v779_v9  ;;  %v1499_v0 = vadd.f32 %v1497_v33, %v1473_v40  ;;  %v981_v16 = vmul.f32 %v979_v39, %v6461_v20  ;;  %v1675_v37 = vmul.f32 %v5426_v28, %v1674_v29  ;;  %v1197_v9 = vpop.permute.xlu1 %1196 }
 0x1c3   : > { %v1110_v3 = vadd.f32 %v1108_v5, %v1084_v36  ;;  %v1776_v4 = vstv %s5390_s21  ;;  %v1007_v20 = vmul.f32 %v6464_v32, %v1005_v8  ;;  %v1701_v30 = vmul.f32 %v4666_v31, %v1700_v48  ;;  %v6501_v8 = vld [vmem:[#allocation46_spill] sm:$0xff]  ;;  %s5605_s21 = sld [smem:[#allocation7 + $0xe]] }
 0x1c4   : > { %v881_v27 = vadd.f32 %v879_v60, %v805_v19  ;;  %v1575_v15 = vadd.f32 %v1573_v21, %v1499_v0  ;;  %v1802_v6 = vstv %s5403_s1  ;;  %v1083_v46 = vmul.f32 %v1081_v54, %v6468_v38  ;;  %v5464_v19 = vld [vmem:[#allocation2 + $0x21] sm:$0xff]  ;;  %s5618_s1 = sld [smem:[#allocation7 + $0x4a]] }
 0x1c5   : > { %v1200_v26 = vsel %vm203_vm0, %v1110_v3, %v1195_v56  ;;  %v1777_v41 = vmul.f32 %v1776_v4, %v6471_v34  ;;  %v1878_v17 = vstv %s5412_s2  ;;  %v1109_v32 = vmul.f32 %v4807_v42, %v1107_v2  ;;  %v5459_v2 = vld [vmem:[#allocation2 + $0x9] sm:$0xff]  ;;  %s5621_s2 = sld [smem:[#allocation7 + $0xf]] }
 0x1c6   : > { %1220 = vrot.lane.b32.xlu0 %v1200_v26, %s2784_s27  ;;  %v907_v59 = vadd.f32 %v905_v53, %v881_v27  ;;  %v1601_v39 = vadd.f32 %v1599_v23, %v1575_v15  ;;  %v1803_v58 = vmul.f32 %v6501_v8, %v1802_v6  ;;  %v1904_v33 = vstv %s5421_s12  ;;  %v6502_v23 = vld [vmem:[#allocation39_spill] sm:$0xff]  ;;  %v6503_v27 = vld [vmem:[#allocation58_spill] sm:$0xff]  ;;  %s5636_s12 = sld [smem:[#allocation7 + $0x4b]] }
 0x1c7   : > { %v1879_v54 = vmul.f32 %v1878_v17, %v4685_v18  ;;  %v1980_v60 = vstv %s5433_s17  ;;  %v1905_v21 = vmul.f32 %v4690_v43, %v1904_v33  ;;  %v2006_v36 = vstv %s5443_s0  ;;  %s5649_s17 = sld [smem:[#allocation7 + $0x4c]]  ;;  %s6505_s0 = sld [smem:[#allocation21_spill]] }
 0x1c8   : > { %v983_v13 = vadd.f32 %v981_v16, %v907_v59  ;;  %v1677_v45 = vadd.f32 %v1675_v37, %v1601_v39  ;;  %v1268_v56 = vmul.f32 %v5459_v2, %v1266_v49  ;;  %v1294_v53 = vmul.f32 %v5464_v19, %v1292_v14  ;;  %v6504_v49 = vld [vmem:[#allocation73_spill] sm:$0xff] }
 0x1c9   : > { %v1981_v3 = vmul.f32 %v1980_v60, %v6502_v23  ;;  %v1370_v43 = vmul.f32 %v1368_v10, %v6503_v27  ;;  %v1396_v15 = vmul.f32 %v6504_v49, %v1394_v47  ;;  %v2007_v14 = vmul.f32 %v6484_v62, %v2006_v36  ;;  %v5479_v59 = vld [vmem:[#allocation2 + $0x51] sm:$0xff]  ;;  %v2094_v10 = vpop.permute.xlu0 %2093 }
 0x1ca   : > { %v1009_v61 = vadd.f32 %v1007_v20, %v983_v13  ;;  %v1703_v31 = vadd.f32 %v1701_v30, %v1677_v45  ;;  %v1296_v16 = vadd.f32 %v1294_v53, %v1268_v56  ;;  %v1472_v20 = vmul.f32 %v5479_v59, %v1470_v24  ;;  %v2618_v53 = vld [vmem:[#allocation2 + $0x8] sm:$0xff] }
 0x1cb   : > { %v1498_v13 = vmul.f32 %v4714_v63, %v1496_v12  ;;  %v1574_v45 = vmul.f32 %v1572_v51, %v6478_v1  ;;  %v1702_v63 = vmul.f32 %v4767_v57, %v1700_v48  ;;  %v1778_v8 = vmul.f32 %v1776_v4, %v6488_v44 }
 0x1cc   : > { %v1085_v22 = vadd.f32 %v1083_v46, %v1009_v61  ;;  %v1779_v5 = vadd.f32 %v1777_v41, %v1703_v31  ;;  %v1372_v26 = vadd.f32 %v1370_v43, %v1296_v16  ;;  %v1600_v61 = vmul.f32 %v6480_v35, %v1598_v7 }
 0x1cd   : > { %v1804_v51 = vmul.f32 %v6491_v11, %v1802_v6  ;;  %v1906_v35 = vmul.f32 %v4807_v42, %v1904_v33  ;;  %v349_v42 = vstv %s348_s15  ;;  %v2617_v6 = vld [vmem:[#allocation2 + $0x18] sm:$0xff]  ;;  %v451_v33 = vstv %s5511_s28  ;;  %s5670_s15 = sld [smem:[#allocation7 + $0x4e]] }
 0x1ce   : > { %v1111_v34 = vadd.f32 %v1109_v32, %v1085_v22  ;;  %v1805_v40 = vadd.f32 %v1803_v58, %v1779_v5  ;;  %v1398_v30 = vadd.f32 %v1396_v15, %v1372_v26  ;;  %v1676_v32 = vmul.f32 %v1674_v29, %v4745_v52  ;;  %v5506_v29 = vld [vmem:[#allocation2 + $0xfa] sm:$0xff] }
 0x1cf   : > { %v1880_v22 = vmul.f32 %v1878_v17, %v6468_v38  ;;  %v2008_v57 = vmul.f32 %v5506_v29, %v2006_v36  ;;  %v375_v38 = vstv %s2255_s18  ;;  %v553_v56 = vstv %s5516_s9  ;;  %s2245_s18 = sshll.u32 %s6505_s0, 5  ;;  %s6506_s9 = sld [smem:[#allocation170_spill]] }
 0x1d0   : > { %v1201_v18 = vsel %vm203_vm0, %v1111_v34, %v1197_v9  ;;  %v1881_v0 = vadd.f32 %v1879_v54, %v1805_v40  ;;  %v1474_v47 = vadd.f32 %v1472_v20, %v1398_v30  ;;  %v1982_v54 = vmul.f32 %v1980_v60, %v4962_v25  ;;  %v2096_v9 = vpop.permute.xlu1 %2095  ;;  %v2616_v25 = vld [vmem:[#allocation2] sm:$0xff] }
 0x1d1   : > { %1222 = vrot.lane.b32.xlu1 %v1201_v18, %s2784_s27  ;;  %v350_v4 = vmul.f32 %v2616_v25, %v349_v42  ;;  %v376_v17 = vmul.f32 %v2617_v6, %v375_v38  ;;  %v452_v34 = vmul.f32 %v5346_v50, %v451_v33  ;;  %v477_v40 = vstv %s5513_s19 }
 0x1d2   : > { %v1907_v37 = vadd.f32 %v1905_v21, %v1881_v0  ;;  %v1500_v41 = vadd.f32 %v1498_v13, %v1474_v47  ;;  %v478_v21 = vmul.f32 %v5354_v55, %v477_v40  ;;  %v351_v18 = vmul.f32 %v2618_v53, %v349_v42  ;;  %v2619_v0 = vld [vmem:[#allocation2 + $0x20] sm:$0xff] }
 0x1d3   : > { %v378_v60 = vadd.f32 %v376_v17, %v350_v4  ;;  %v377_v23 = vmul.f32 %v2619_v0, %v375_v38  ;;  %v579_v16 = vstv %s5520_s26  ;;  %v453_v15 = vmul.f32 %v5459_v2, %v451_v33  ;;  %v5572_v38 = vpop.permute.xlu0 %1164  ;;  %v2629_v33 = vld [vmem:[#allocation2 + $0xa8] sm:$0xff]  ;;  %s5690_s26 = sld [smem:[#allocation7 + $0x4f]] }
 0x1d4   : > { %v1983_v39 = vadd.f32 %v1981_v3, %v1907_v37  ;;  %v1576_v24 = vadd.f32 %v1574_v45, %v1500_v41  ;;  %v2620_v3 = vld [vmem:[#allocation2 + $0x48] sm:$0xff]  ;;  %v2621_v37 = vld [vmem:[#allocation2 + $0x60] sm:$0xff]  ;;  %v1248_v20 = vstv %s5523_s7  ;;  %v479_v30 = vmul.f32 %v5464_v19, %v477_v40  ;;  %s5698_s7 = scalar_lea.vmem [#allocation8], %s2245_s18 }
 0x1d5   : > { %v454_v36 = vadd.f32 %v452_v34, %v378_v60  ;;  %v554_v27 = vmul.f32 %v2620_v3, %v553_v56  ;;  %v379_v49 = vadd.f32 %v377_v23, %v351_v18  ;;  %v1249_v47 = vmul.f32 %v5346_v50, %v1248_v20  ;;  %v2622_v45 = vld [vmem:[#allocation2 + $0x49] sm:$0xff]  ;;  %v2625_v50 = vld [vmem:[#allocation2 + $0x61] sm:$0xff] }
 0x1d6   : > { %v2009_v46 = vadd.f32 %v2007_v14, %v1983_v39  ;;  %v1602_v31 = vadd.f32 %v1600_v61, %v1576_v24  ;;  %v580_v14 = vmul.f32 %v2621_v37, %v579_v16  ;;  %v1274_v39 = vstv %s5525_s13  ;;  %s6507_s13 = sld [smem:[#allocation16_spill]] }
 0x1d7   : > { %v480_v43 = vadd.f32 %v478_v21, %v454_v36  ;;  %v455_v13 = vadd.f32 %v453_v15, %v379_v49  ;;  %v1350_v61 = vstv %s5530_s25  ;;  %v681_v24 = vstv %s5533_s5  ;;  %v5583_v36 = vld [vmem:[#allocation2 + $0x69] sm:$0xff]  ;;  %v2631_v49 = vld [vmem:[#allocation2 + $0x98] sm:$0xff]  ;;  %s2150_s25 = sshll.u32 %s5698_s7, 4  ;;  %s5740_s25 = int_to_ptr.vmem [resolvable:$true] %s2150_s25 }
 0x1d8   : > { %v2099_v62 = vsel %vm203_vm0, %v2009_v46, %v2094_v10  ;;  %v1678_v12 = vadd.f32 %v1676_v32, %v1602_v31  ;;  %v655_v10 = vstv %s5528_s23  ;;  %v1275_v46 = vmul.f32 %v5354_v55, %v1274_v39  ;;  %v2623_v32 = vld [vmem:[#allocation2 + $0x50] sm:$0xff]  ;;  %v2624_v55 = vld [vmem:[#allocation2 + $0x2] sm:$0xff]  ;;  %s6508_s23 = sld [smem:[#allocation19_spill]] }
 0x1d9   : > { %2119 = vrot.lane.b32.xlu0 %v2099_v62, %s2784_s27  ;;  %v556_v26 = vadd.f32 %v554_v27, %v480_v43  ;;  %v656_v62 = vmul.f32 %v2622_v45, %v655_v10  ;;  %v555_v31 = vmul.f32 %v2623_v32, %v553_v56  ;;  %v783_v42 = vstv %s5554_s24  ;;  %v5592_v43 = vpop.permute.xlu0 %2063 }
 0x1da   : > { %v1704_v1 = vadd.f32 %v1702_v63, %v1678_v12  ;;  %v481_v63 = vadd.f32 %v479_v30, %v455_v13  ;;  %v1277_v12 = vadd.f32 %v1275_v46, %v1249_v47  ;;  %v657_v25 = vmul.f32 %v5479_v59, %v655_v10  ;;  %v2633_v30 = vld [vmem:[#allocation2 + $0xa9] sm:$0xff] }
 0x1db   : > { %v582_v41 = vadd.f32 %v580_v14, %v556_v26  ;;  %v784_v60 = vmul.f32 %v2629_v33, %v783_v42  ;;  %v1478_v40 = vstv %s5559_s4  ;;  %v859_v21 = vstv %s5562_s22  ;;  %v2632_v14 = vld [vmem:[#allocation2 + $0x4a] sm:$0xff]  ;;  %s2137_s4 = scalar_lea.sflag [#allocation5], %s6505_s0  ;;  %s2702_s22 = scalar_lea.vmem %s5740_s25, 512 }
 0x1dc   : > { %v1780_v58 = vadd.f32 %v1778_v8, %v1704_v1  ;;  %v1351_v8 = vmul.f32 %v2624_v55, %v1350_v61  ;;  %v682_v1 = vmul.f32 %v2625_v50, %v681_v24  ;;  %v683_v56 = vmul.f32 %v5583_v36, %v681_v24  ;;  %v2635_v55 = vld [vmem:[#allocation2 + $0x62] sm:$0xff]  ;;  %s2516_s5 = sshll.u32 %s6507_s13, 9  ;;  %p2703_p5 = scmp.ne.s32.totalorder %s5740_s25, %s2702_s22 }
 0x1dd   : > { %v1479_v18 = vmul.f32 %v2625_v50, %v1478_v40  ;;  %v860_v23 = vmul.f32 %v5426_v28, %v859_v21  ;;  %v1554_v27 = vstv %s5567_s16  ;;  %v1580_v47 = vstv %s5578_s6  ;;  %s2785_s16 = smov [#allocation8]  }
 0x1de   : > { %v1806_v5 = vadd.f32 %v1804_v51, %v1780_v58  ;;  %v658_v51 = vadd.f32 %v656_v62, %v582_v41  ;;  %v1376_v58 = vstv %s5538_s3  ;;  %v1555_v26 = vmul.f32 %v2632_v14, %v1554_v27  ;;  %v5607_v41 = vpop.permute.xlu1 %1166  ;;  %p6510_p12 = scmp.ne.s32.totalorder %s6508_s23, 0 }
 0x1df   : > { %v961_v62 = vstv %s5581_s29  ;;  %v1276_v24 = vmul.f32 %v5464_v19, %v1274_v39  ;;  %v1250_v32 = vmul.f32 %v5459_v2, %v1248_v20  ;;  %v987_v19 = vstv %s5595_s14  ;;  %v2637_v20 = vld [vmem:[#allocation2 + $0xa] sm:$0xff] }
 0x1e0   : > { %v1882_v7 = vadd.f32 %v1880_v22, %v1806_v5  ;;  %v757_v22 = vstv %s5541_s20  ;;  %v2626_v5 = vld [vmem:[#allocation2 + $0x68] sm:$0xff]  ;;  %v1352_v39 = vmul.f32 %v2637_v20, %v1350_v61  ;;  %v1063_v61 = vstv %s5605_s21  ;;  %v2649_v20 = vld [vmem:[#allocation2 + $0x52] sm:$0xff]  ;;  %p2704_p8 = pnand %p2703_p5, %p6510_p12 }
 0x1e1   : > { %v759_v15 = vmul.f32 %v2631_v49, %v757_v22  ;;  %v1278_v2 = vadd.f32 %v1276_v24, %v1250_v32  ;;  %v1089_v49 = vstv %s5621_s2 }
 0x1e2   : > { %v1908_v52 = vadd.f32 %v1906_v35, %v1882_v7  ;;  %v581_v35 = vmul.f32 %v2626_v5, %v579_v16  ;;  %v557_v7 = vadd.f32 %v555_v31, %v481_v63  ;;  %v885_v16 = vstv %s5570_s11  ;;  %v2634_v31 = vld [vmem:[#allocation2 + $0xb0] sm:$0xff]  ;;  %p2705_p9 = pneg %p2704_p8  ;;  %s2706_s11 = sshll.u32 %s2785_s16, 4  ;;  %s2707_s11 = int_to_ptr.vmem [resolvable:$false] %s2706_s11 }
 0x1e3   : > { %v886_v13 = vmul.f32 %v2633_v30, %v885_v16  ;;  %v785_v63 = vmul.f32 %v2634_v31, %v783_v42  ;;  %v1656_v5 = vstv %s5590_s10  ;;  %v1354_v33 = vadd.f32 %v1352_v39, %v1278_v2  ;;  %s2708_s6 = scalar_lea.vmem %s2707_s11, 1024  ;;  %p2709_p10 = scmp.lt.s32.totalorder %s5740_s25, %s2707_s11 }
 0x1e4   : > { %v1984_v48 = vadd.f32 %v1982_v54, %v1908_v52  ;;  %v2627_v54 = vld [vmem:[#allocation2 + $0x1a] sm:$0xff]  ;;  %v583_v4 = vadd.f32 %v581_v35, %v557_v7  ;;  %v1784_v31 = vstv %s5636_s12  ;;  %v1860_v2 = vstv %s5649_s17  ;;  %p2710_p1 = scmp.lt.s32.totalorder %s2708_s6, %s2702_s22 }
 0x1e5   : > { %v1377_v52 = vmul.f32 %v2627_v54, %v1376_v58  ;;  %v5627_v7 = vld [vmem:[#allocation2 + $0x99] sm:$0xff]  ;;  %v1556_v39 = vmul.f32 %v2649_v20, %v1554_v27 }
 0x1e6   : > { %v2010_v44 = vadd.f32 %v2008_v57, %v1984_v48  ;;  %v1353_v57 = vadd.f32 %v1351_v8, %v1277_v12  ;;  %v2628_v48 = vld [vmem:[#allocation2 + $0x90] sm:$0xff]  ;;  %v659_v53 = vadd.f32 %v657_v25, %v583_v4  ;;  %v1581_v8 = vmul.f32 %v2635_v55, %v1580_v47  ;;  %p2711_p4 = por %p2710_p1, %p2709_p10 }
 0x1e7   : > { %v861_v54 = vmul.f32 %v5627_v7, %v859_v21  ;;  %v1682_v4 = vstv %s5600_s8 }
 0x1e8   : > { %v2100_v11 = vsel %vm203_vm0, %v2010_v44, %v2096_v9  ;;  %v758_v9 = vmul.f32 %v2628_v48, %v757_v22  ;;  %v684_v44 = vadd.f32 %v682_v1, %v658_v51  ;;  %v1379_v17 = vadd.f32 %v1377_v52, %v1353_v57  ;;  %v2636_v1 = vld [vmem:[#allocation2 + $0xd8] sm:$0xff]  ;;  %p2712_p11 = pnand %p2711_p4, %p2705_p9 }
 0x1e9   : > { %2121 = vrot.lane.b32.xlu1 %v2100_v11, %s2784_s27  ;;  %v1452_v11 = vstv %s5551_s30  ;;  %v685_v37 = vadd.f32 %v683_v56, %v659_v53  ;;  %v962_v51 = vmul.f32 %v2636_v1, %v961_v62  ;;  %v1657_v57 = vmul.f32 %v5426_v28, %v1656_v5  ;;  %s5658_s27 = sld [smem:[#allocation7 + $0x4d]]  ;;  %s6509_s30 = sld [smem:[#allocation171_spill]] }
 0x1ea   : > { %v1453_v6 = vmul.f32 %v2622_v45, %v1452_v11  ;;  %v760_v34 = vadd.f32 %v758_v9, %v684_v44  ;;  %v5633_v9 = vpop.permute.xlu1 %2065  ;;  %v2639_v44 = vld [vmem:[#allocation2 + $0xf0] sm:$0xff]  ;;  %v1683_v21 = vmul.f32 %v2633_v30, %v1682_v4 }
 0x1eb   : > { %v761_v12 = vadd.f32 %v759_v15, %v685_v37  ;;  %v988_v42 = vmul.f32 %v2639_v44, %v987_v19  ;;  %v2643_v37 = vld [vmem:[#allocation2 + $0xe0] sm:$0xff] }
 0x1ec   : > { %v1455_v0 = vadd.f32 %v1453_v6, %v1379_v17  ;;  %v786_v3 = vadd.f32 %v784_v60, %v760_v34  ;;  %v2640_v6 = vld [vmem:[#allocation2 + $0x22] sm:$0xff]  ;;  %v5641_v60 = vld [vmem:[#allocation2 + $0xb1] sm:$0xff]  ;;  %v963_v14 = vmul.f32 %v2643_v37, %v961_v62  ;;  %v2652_v37 = vld [vmem:[#allocation2 + $0xda] sm:$0xff] }
 0x1ed   : > { %v787_v52 = vadd.f32 %v785_v63, %v761_v12  ;;  %v1378_v17 = vmul.f32 %v2640_v6, %v1376_v58  ;;  %v887_v28 = vmul.f32 %v5641_v60, %v885_v16  ;;  %v1454_v16 = vmul.f32 %v5479_v59, %v1452_v11  ;;  %v2646_v12 = vld [vmem:[#allocation2 + $0xf8] sm:$0xff] }
 0x1ee   : > { %v1481_v10 = vadd.f32 %v1479_v18, %v1455_v0  ;;  %v862_v46 = vadd.f32 %v860_v23, %v786_v3  ;;  %v2642_v18 = vld [vmem:[#allocation2 + $0xd9] sm:$0xff]  ;;  %v1758_v3 = vstv %s5618_s1  ;;  %v1480_v59 = vmul.f32 %v5583_v36, %v1478_v40  ;;  %v5672_v40 = vld [vmem:[#allocation2 + $0xe1] sm:$0xff] }
 0x1ef   : > { %v863_v34 = vadd.f32 %v861_v54, %v787_v52  ;;  %v1064_v0 = vmul.f32 %v2642_v18, %v1063_v61  ;;  %v1380_v15 = vadd.f32 %v1378_v17, %v1354_v33  ;;  %v989_v55 = vmul.f32 %v2646_v12, %v987_v19  ;;  %v2650_v17 = vld [vmem:[#allocation2 + $0x6a] sm:$0xff]  ;;  %s5746_s24 = scalar_lea.hbm %s6509_s30, %s2516_s5 }
 0x1f0   : > { %v1557_v50 = vadd.f32 %v1555_v26, %v1481_v10  ;;  %v888_v22 = vadd.f32 %v886_v13, %v862_v46  ;;  %v2644_v10 = vld [vmem:[#allocation2 + $0x92] sm:$0xff]  ;;  %v1065_v36 = vmul.f32 %v5672_v40, %v1063_v61  ;;  %v1582_v33 = vmul.f32 %v2650_v17, %v1580_v47 }
 0x1f1   : > { %v889_v26 = vadd.f32 %v887_v28, %v863_v34  ;;  %v1759_v30 = vmul.f32 %v2644_v10, %v1758_v3  ;;  %v2645_v46 = vld [vmem:[#allocation2 + $0xf1] sm:$0xff]  ;;  %v1456_v11 = vadd.f32 %v1454_v16, %v1380_v15  ;;  %v2651_v34 = vld [vmem:[#allocation2 + $0xf9] sm:$0xff]  ;;  %v1658_v16 = vmul.f32 %v5627_v7, %v1656_v5 }
 0x1f2   : > { %v1583_v48 = vadd.f32 %v1581_v8, %v1557_v50  ;;  %v964_v25 = vadd.f32 %v962_v51, %v888_v22  ;;  %v1090_v24 = vmul.f32 %v2645_v46, %v1089_v49  ;;  %v2647_v50 = vld [vmem:[#allocation2 + $0xaa] sm:$0xff]  ;;  %v2653_v5 = vld [vmem:[#allocation2 + $0xf2] sm:$0xff] }
 0x1f3   : > { %v965_v8 = vadd.f32 %v963_v14, %v889_v26  ;;  %v1785_v1 = vmul.f32 %v2647_v50, %v1784_v31  ;;  %v1482_v54 = vadd.f32 %v1480_v59, %v1456_v11 }
 0x1f4   : > { %v1659_v56 = vadd.f32 %v1657_v57, %v1583_v48  ;;  %v990_v23 = vadd.f32 %v988_v42, %v964_v25  ;;  %v1861_v57 = vmul.f32 %v2642_v18, %v1860_v2  ;;  %v1886_v25 = vstv %s5658_s27 }
 0x1f5   : > { %v991_v52 = vadd.f32 %v989_v55, %v965_v8  ;;  %v1887_v18 = vmul.f32 %v2645_v46, %v1886_v25  ;;  %v2655_v8 = vld [vmem:[#allocation2 + $0xb2] sm:$0xff] }
 0x1f6   : > { %v1685_v13 = vadd.f32 %v1683_v21, %v1659_v56  ;;  %v1066_v32 = vadd.f32 %v1064_v0, %v990_v23  ;;  %v1091_v21 = vmul.f32 %v2651_v34, %v1089_v49  ;;  %v1962_v23 = vstv %s5670_s15 }
 0x1f7   : > { %v1067_v56 = vadd.f32 %v1065_v36, %v991_v52  ;;  %v1963_v14 = vmul.f32 %v2652_v37, %v1962_v23  ;;  %v1988_v49 = vstv %s5690_s26  ;;  %v1786_v50 = vmul.f32 %v2655_v8, %v1784_v31 }
 0x1f8   : > { %v1761_v51 = vadd.f32 %v1759_v30, %v1685_v13  ;;  %v1092_v22 = vadd.f32 %v1090_v24, %v1066_v32  ;;  %v1684_v30 = vmul.f32 %v5641_v60, %v1682_v4  ;;  %v1989_v7 = vmul.f32 %v2653_v5, %v1988_v49 }
 0x1f9   : > { %v1093_v15 = vadd.f32 %v1091_v21, %v1067_v56  ;;  %v1888_v31 = vmul.f32 %v2651_v34, %v1886_v25 }
 0x1fa   : > { %v1170_v19 = vsel %vm203_vm0, %v1092_v22, %v5572_v38  ;;  %v1787_v48 = vadd.f32 %v1785_v1, %v1761_v51  ;;  %v5687_v38 = vld [vmem:[%s6506_s9] ss:$0 sm:$0xff] }
 0x1fb   : > { %v1171_v10 = vsel %vm203_vm0, %v1093_v15, %v5607_v41  ;;  %v2654_v41 = vld [vmem:[#allocation2 + $0x9a] sm:$0xff] }
 0x1fc   : > { %v1863_v0 = vadd.f32 %v1861_v57, %v1787_v48  ;;  %v1760_v4 = vmul.f32 %v2654_v41, %v1758_v3 }
 0x1fe   : > { %v5602_v45 = vpop.permute.xlu0 %1204  ;;  %v1889_v26 = vadd.f32 %v1887_v18, %v1863_v0 }
 0x1ff   : > { %v1227_v44 = vsel %vm1226_vm4, %v1170_v19, %v5602_v45  ;;  %v1558_v45 = vadd.f32 %v1556_v39, %v1482_v54  ;;  %v2656_v54 = vld [vmem:[#allocation2 + $0xe2] sm:$0xff] }
 0x200   : > { %v1965_v24 = vadd.f32 %v1963_v14, %v1889_v26 }
 0x201   : > { %v1584_v47 = vadd.f32 %v1582_v33, %v1558_v45 }
 0x202   : > { %v5625_v35 = vpop.permute.xlu0 %2103  ;;  %v5646_v53 = vpop.permute.xlu1 %1206  ;;  %v1991_v55 = vadd.f32 %v1989_v7, %v1965_v24 }
 0x203   : > { %v1660_v13 = vadd.f32 %v1658_v16, %v1584_v47  ;;  %v1228_v46 = vsel %vm1226_vm4, %v1171_v10, %v5646_v53 }
 0x204   : > { %v2069_v53 = vsel %vm203_vm0, %v1991_v55, %v5592_v43  ;;  %v1862_v43 = vmul.f32 %v5672_v40, %v1860_v2 }
 0x205   : > { %v1686_v60 = vadd.f32 %v1684_v30, %v1660_v13  ;;  %v2125_v51 = vsel %vm1226_vm4, %v2069_v53, %v5625_v35  ;;  %v1964_v35 = vmul.f32 %v2656_v54, %v1962_v23 }
 0x207   : > { %v1762_v1 = vadd.f32 %v1760_v4, %v1686_v60 }
 0x208   : > { %v5660_v63 = vpop.permute.xlu1 %2105 }
 0x209   : > { %v1788_v20 = vadd.f32 %v1786_v50, %v1762_v1 }
 0x20b   : > { %v1213_v58 = vpop.permute.xlu0 %1212  ;;  %v1864_v39 = vadd.f32 %v1862_v43, %v1788_v20 }
 0x20c   : > { %v1230_v27 = vsel %vm1229_vm5, %v1227_v44, %v1213_v58 }
 0x20d   : > { %v1890_v52 = vadd.f32 %v1888_v31, %v1864_v39 }
 0x20f   : > { %v1966_v57 = vadd.f32 %v1964_v35, %v1890_v52 }
 0x217   : > { %v1215_v42 = vpop.permute.xlu1 %1214 }
 0x218   : > { %v1231_v32 = vsel %vm1229_vm5, %v1228_v46, %v1215_v42 }
 0x220   : > { %v5665_v62 = vpop.permute.xlu0 %2111 }
 0x221   : > { %v2127_v22 = vsel %vm1229_vm5, %v2125_v51, %v5665_v62  ;;  %v1990_v62 = vmul.f32 %v5506_v29, %v1988_v49 }
 0x223   : > { %v1992_v48 = vadd.f32 %v1990_v62, %v1966_v57 }
 0x225   : > { %v2070_v44 = vsel %vm203_vm0, %v1992_v48, %v5633_v9 }
 0x226   : > { %v2126_v2 = vsel %vm1226_vm4, %v2070_v44, %v5660_v63 }
 0x230   : > { %v2114_v58 = vpop.permute.xlu1 %2113 }
 0x231   : > { %v2128_v40 = vsel %vm1229_vm5, %v2126_v2, %v2114_v58 }
 0x238   : > { %v1221_v61 = vpop.permute.xlu0 %1220 }
 0x239   : > { %v1233_v6 = vsel %vm1232_vm6, %v1230_v27, %v1221_v61 }
 0x23a   : > { %v1241_v28 = vadd.f32 %v5687_v38, %v1233_v6 }
 0x23c   : > { %1243 = vst [vmem:[%s5698_s7] sm:$0xff] %v1241_v28 }
 0x243   : > { %v1223_v59 = vpop.permute.xlu1 %1222 }
 0x244   : > { %v1234_v11 = vsel %vm1232_vm6, %v1231_v32, %v1223_v59 }
 0x245   : > { %v1242_v12 = vadd.f32 %v5687_v38, %v1234_v11 }
 0x247   : > { %1244 = vst [vmem:[%s5698_s7 + $0x8] sm:$0xff] %v1242_v12 }
 0x24b   : > { %v2120_v36 = vpop.permute.xlu0 %2119 }
 0x24c   : > { %v2129_v3 = vsel %vm1232_vm6, %v2127_v22, %v2120_v36 }
 0x24d   : > { %v2131_v19 = vadd.f32 %v5687_v38, %v2129_v3 }
 0x24f   : > { %2508 = vst [vmem:[%s5698_s7 + $0x10] sm:$0xff] %v2131_v19 }
 0x25b   : > { %v2122_v42 = vpop.permute.xlu1 %2121 }
 0x25c   : > { %v2130_v29 = vsel %vm1232_vm6, %v2128_v40, %v2122_v42 }
 0x25d   : > { %v2132_v9 = vadd.f32 %v5687_v38, %v2130_v29 }
 0x25f   : > { %2509 = vst [vmem:[%s5698_s7 + $0x18] sm:$0xff] %v2132_v9 }
 0x260   : > { %2715 = shalt.err (!%p2712_p11)
}
 0x261   : > { %s2716_s29 = scalar_lea.hbm %s5746_s24, 512  ;;  %s2720_s8 = scalar_lea.hbm %s6509_s30, 1024 }
 0x262   : > { %p2717_p0 = scmp.ne.s32.totalorder %s5746_s24, %s2716_s29  ;;  %p2721_p6 = scmp.lt.u32.totalorder %s5746_s24, %s6509_s30 }
 0x263   : > { %p2722_p3 = scmp.lt.u32.totalorder %s2720_s8, %s2716_s29  ;;  %p2724_p5 = scmp.lt.u32.totalorder %s2716_s29, %s5746_s24 }
 0x264   : > { %p2718_p2 = pnand %p2717_p0, %p6510_p12 }
 0x265   : > { %p2723_p13 = por %p2722_p3, %p2721_p6 }
 0x266   : > { %p2719_p7 = pneg %p2718_p2 }
 0x267   : > { %p2725_p8 = por %p2724_p5, %p2723_p13 }
 0x269   : > { %p2726_p9 = pnand %p2725_p8, %p2719_p7 }
 0x26b   : > { %2729 = shalt.err (!%p2726_p9)
}
 0x26c   : > { %s2786_s2 = smov 128   ;;  %s2787_s12 = smov 8  }
 0x26d   : > { %2523 = dma.vmem_to_hbm [thread:$0]  (%p6510_p12), %s5740_s25, 512, %s5746_s24, %s2137_s4, %s2786_s2, %s2786_s2, %s2787_s12  }
 0x26e PF: > { %s6511_s17 = sld [smem:[#allocation12_spill]]  ;;  %s6512_s27 = sld [smem:[#allocation20_spill]] }
 0x26f   : > { %s6513_s15 = sld [smem:[#allocation15_spill]] }
 0x274   : > { %s2165_s18 = sand.u32 1, %s6511_s17   ;;  %p6514_p10 = scmp.ne.s32.totalorder %s6512_s27, 0 }
 0x275   : > { %p6515_p1 = scmp.ge.s32.totalorder %s6513_s15, 2  ;;  %s2166_s28 = scalar_lea.sflag [#allocation5], %s2165_s18 }
 0x277   : > { %p2534_p4 = pnand %p6515_p1, %p6514_p10 }
 0x279   : > { %2755 = dma.done.wait (!%p2534_p4), %s2166_s28, 512  }
 0x27a   : > { %2757 = vsyncadd (!%p2534_p4), %s2166_s28, 4294966784  ;;  %s6516_s15 = sld [smem:[#allocation17_spill]]  ;;  %s6517_s12 = sld [smem:[#allocation13_spill]] }
 0x27b   : > { %s6518_s13 = sld [smem:[#allocation14_spill]]  ;;  %s6519_s14 = sld [smem:[#allocation18_spill]] }
 0x280   : > { %p17_p11 = scmp.ge.s32.totalorder %s6516_s15, 4  }
 0x282   :  { %19 = sbr.rel (!%p17_p11) target bundleno = 11 (0xb), region = 97 }
 0x289   :  { %2171 = vsyncpa [#allocation4], 1 }
 0x28a   :  { %2173 = vsyncpa [#allocation4 + $0x1], 1 }
 0x28b   :  { %2174 = vsyncpa [#allocation5], 1 }
 0x28c   :  { %2176 = vsyncpa [#allocation5 + $0x1], 1 }
 0x28d   :  { %2177 = vsyncpa [#allocation6], 1 }
 0x28e   :  { %2179 = vsyncpa [#allocation6 + $0x1], 1 }

</bundles_post_ra>
